<compile_context>
chip_gen: v7x
topology: tpu7x:2x2x1
jax: 0.10.0
libtpu: 0.0.40
codegen_flags: <defaults>
</compile_context>

<pallas_src>
import numpy as np
import jax
import jax.numpy as jnp
from jax import lax
from jax.experimental import pallas as pl
from jax.experimental.pallas import tpu as pltpu

START_TAG = '<START>'
STOP_TAG = '<STOP>'

# ---------------- model hyper-parameters (small, consistent with the module) ----
VOCAB = 20
EMB_DIM = 16                  # embedding_dim
HIDDEN = 32                   # hidden_dim (BiLSTM output width); per-direction 16
SEQ = 8                       # sentence length (8 keeps per-sentence blocks sublane aligned)
WINDOW = 3
TAG_TO_IX = {'B': 0, 'I': 1, 'O': 2, START_TAG: 3, STOP_TAG: 4}
TAGSET = len(TAG_TO_IX)
START_IDX = TAG_TO_IX[START_TAG]
STOP_IDX = TAG_TO_IX[STOP_TAG]
LANE = 128                    # lane-dense width for the feats output


# ------------------------- host-side static index tables ------------------------
def local_attention_id_np(size, window):
    """Exact numpy port of local_attention_id from the torch module."""
    prior = []
    for k in range(window):
        prior.extend([window + k, window - k - 1])
    prior = np.array(prior, dtype=np.int64)
    ind = np.arange(size, dtype=np.int64).reshape(-1, 1)
    ind = np.broadcast_to(ind, (size, 2 * window)).copy()
    ind_bias = np.arange(1, window + 1, dtype=np.int64)
    ind_bias = np.concatenate((-ind_bias[::-1], ind_bias), axis=0)
    ind = ind + ind_bias
    for i in range(window):
        neg_ind = ind[i][ind[i] < 0]
        prior_ind = ind[i][prior]
        prior_ind = prior_ind[prior_ind >= 0]
        assert len(neg_ind) <= len(prior_ind)
        ind[i][:len(neg_ind)] = prior_ind[:len(neg_ind)]
        over_ind = ind[-(i + 1)][ind[-(i + 1)] >= size]
        prior_ind_over = ind[-(i + 1)][prior]
        prior_ind_over = prior_ind_over[prior_ind_over < size]
        assert len(over_ind) <= len(prior_ind_over)
        ind[-(i + 1)][-len(over_ind):] = prior_ind_over[:len(over_ind)]
    return ind


def _attention_counts(size, window):
    """counts[t, j] = multiplicity of position j inside row t's local window.

    Window softmax over (possibly duplicated) gathered keys == full-score softmax
    weighted by these counts, so the kernel can use one q @ K^T matmul instead of
    a 6-way one-hot gather.
    """
    ids = local_attention_id_np(size, window)
    counts = np.zeros((size, size), np.float32)
    for t in range(size):
        for j in ids[t]:
            counts[t, int(j)] += 1.0
    return counts


# -------------------------------- fused kernel ----------------------------------
def _bilstm_crf_kernel(
        ids_ref, emb_ref,
        wihf_ref, wihb_ref, ball_ref,
        whh_i_ref, whh_f_ref, whh_g_ref, whh_o_ref,
        wq_ref, bq_ref, wk_ref, bk_ref, wv_ref, bv_ref,
        wh2t_ref, bh2t_ref,
        counts_ref, trans_ref, transT_ref,
        feats_ref, path_ref, score_ref,
        ht_s):
    f32 = jnp.float32
    L = ids_ref.shape[0]
    V = emb_ref.shape[0]
    E = emb_ref.shape[1]
    Hd = whh_i_ref.shape[0] // 2
    H = 2 * Hd
    T = trans_ref.shape[0]

    # ---- embedding lookup: one-hot matmul against the table (kept in VMEM) ----
    ids = ids_ref[...]                                              # (L, 1) int32
    vocab_iota = lax.broadcasted_iota(jnp.int32, (L, V), 1)
    onehot = (ids == vocab_iota).astype(f32)                        # (L, V)
    x = jnp.dot(onehot, emb_ref[...], preferred_element_type=f32)   # (L, E)

    # ---- BiLSTM: both directions fused into one unrolled recurrence ----
    # time reversal of the input as a tiny anti-diagonal matmul (off critical path)
    r0 = lax.broadcasted_iota(jnp.int32, (L, L), 0)
    r1 = lax.broadcasted_iota(jnp.int32, (L, L), 1)
    rev = (r0 + r1 == L - 1).astype(f32)
    x_rev = jnp.dot(rev, x, preferred_element_type=f32)             # (L, E)

    # all input->gate contributions for the whole sequence: (L, 8*Hd) == (L, 128)
    xg_all = (jnp.dot(x, wihf_ref[...], preferred_element_type=f32)
              + jnp.dot(x_rev, wihb_ref[...], preferred_element_type=f32)
              + ball_ref[...])
    xgi = xg_all[:, 0 * 2 * Hd:1 * 2 * Hd]                          # (L, 2Hd) per gate
    xgf = xg_all[:, 1 * 2 * Hd:2 * 2 * Hd]
    xgg = xg_all[:, 2 * 2 * Hd:3 * 2 * Hd]
    xgo = xg_all[:, 3 * 2 * Hd:4 * 2 * Hd]

    whi = whh_i_ref[...]
    whf = whh_f_ref[...]
    whg = whh_g_ref[...]
    who = whh_o_ref[...]

    h = jnp.zeros((1, 2 * Hd), f32)      # [h_fwd | h_bwd]  (nn.LSTM default hx = 0)
    c = jnp.zeros((1, 2 * Hd), f32)
    for t in range(L):                   # fully unrolled -> static indices, full LLO visibility
        pre_i = xgi[t:t + 1, :] + jnp.dot(h, whi, preferred_element_type=f32)
        pre_f = xgf[t:t + 1, :] + jnp.dot(h, whf, preferred_element_type=f32)
        pre_g = xgg[t:t + 1, :] + jnp.dot(h, whg, preferred_element_type=f32)
        pre_o = xgo[t:t + 1, :] + jnp.dot(h, who, preferred_element_type=f32)
        gi = jax.nn.sigmoid(pre_i)       # PyTorch gate order: i, f, g, o
        gf = jax.nn.sigmoid(pre_f)
        gg = jnp.tanh(pre_g)
        go = jax.nn.sigmoid(pre_o)
        c = gf * c + gi * gg
        h = go * jnp.tanh(c)
        # forward half -> position t, backward half -> position L-1-t (VMEM resident)
        ht_s[pl.ds(t, 1), pl.ds(0, Hd)] = h[:, 0:Hd]
        ht_s[pl.ds(L - 1 - t, 1), pl.ds(Hd, Hd)] = h[:, Hd:2 * Hd]

    ht = ht_s[...]                                                   # (L, H) lstm_out

    # ---- local windowed attention (count-weighted full-score softmax) ----
    q = jnp.dot(ht, wq_ref[...], preferred_element_type=f32) + bq_ref[...]
    wk = wk_ref[...]
    wv = wv_ref[...]
    K = (jnp.dot(x, wk[0:E, :], preferred_element_type=f32)
         + jnp.dot(ht, wk[E:E + H, :], preferred_element_type=f32) + bk_ref[...])
    V_ = (jnp.dot(x, wv[0:E, :], preferred_element_type=f32)
          + jnp.dot(ht, wv[E:E + H, :], preferred_element_type=f32) + bv_ref[...])

    # S[t, j] = q[t] . K[j] / sqrt(H)  (one MXU matmul, transposed-rhs dot_general)
    s = lax.dot_general(q, K, (((1,), (1,)), ((), ())),
                        preferred_element_type=f32) * (1.0 / float(np.sqrt(H)))
    counts = counts_ref[...]                                         # (L, L) multiplicities
    in_win = counts > 0.0
    s_masked = jnp.where(in_win, s, f32(-1e30))
    m = jnp.max(s_masked, axis=1, keepdims=True)                     # window max per row
    p = counts * jnp.exp(s_masked - m)                               # (L, L)
    den = jnp.sum(p, axis=1, keepdims=True)                          # (L, 1)
    attention = (jnp.dot(p, V_, preferred_element_type=f32)
                 * pl.reciprocal(den, approx=True))                  # (L, H)
    # TODO(synk): dropout layers are eval-mode identity here.

    # ---- hidden2tag on cat((ht, attention)); weights are pre-padded to 128 lanes ----
    wh2t = wh2t_ref[...]
    feats_pad = (jnp.dot(ht, wh2t[0:H, :], preferred_element_type=f32)
                 + jnp.dot(attention, wh2t[H:2 * H, :], preferred_element_type=f32)
                 + bh2t_ref[...])                                    # (L, 128), cols >= T are 0
    feats_ref[...] = feats_pad                                       # lane-dense output store
    feats = feats_pad[:, 0:T]                                        # (L, T)

    # ---- Viterbi DP + in-kernel backtrace ----
    trans = trans_ref[...]
    transT = transT_ref[...]                                         # transT[j, i] = trans[i, j]
    row_tt = lax.broadcasted_iota(jnp.int32, (T, T), 0)
    col_tt = lax.broadcasted_iota(jnp.int32, (T, T), 1)
    eye = (row_tt == col_tt).astype(f32)
    lane_iota = lax.broadcasted_iota(jnp.int32, (1, T), 1)
    sub_iota = lax.broadcasted_iota(jnp.int32, (T, 1), 0)

    fv = jnp.where(sub_iota == START_IDX, 0.0, -10000.0).astype(f32)  # (T, 1) column
    bptr_rows = []
    for t in range(L):                                               # unrolled DP
        n = transT + fv                           # n[j, i] = forward_var[j] + trans[i, j]
        vmax = jnp.max(n, axis=0, keepdims=True)                     # (1, T)
        bptr = jnp.min(jnp.where(n >= vmax, row_tt, T), axis=0,
                       keepdims=True)                                # first argmax, (1, T) int32
        bptr_rows.append(bptr)
        new_row = vmax + feats[t:t + 1, :]                           # (1, T)
        fv = jnp.sum(eye * new_row, axis=1, keepdims=True)           # row -> column

    fv_row = jnp.sum(eye * fv, axis=0, keepdims=True)                # column -> row
    terminal = fv_row + trans[STOP_IDX:STOP_IDX + 1, :]              # (1, T)
    score = jnp.max(terminal, axis=1, keepdims=True)                 # (1, 1)
    best = jnp.min(jnp.where(terminal >= score, lane_iota, T), axis=1,
                   keepdims=True)                                    # (1, 1) int32

    # backtrace kept on-device (no host round trip); current tag held as a one-hot row
    path_ref[pl.ds(L - 1, 1), :] = best
    sel = lane_iota == best                                          # (1, T) one-hot
    for t in range(L - 1, 0, -1):
        prev = jnp.sum(jnp.where(sel, bptr_rows[t], 0), axis=1, keepdims=True)   # (1, 1)
        path_ref[pl.ds(t - 1, 1), :] = prev
        sel = lane_iota == prev

    score_ref[...] = jnp.zeros((L, 1), f32) + score                  # replicate over the block


# --------------------------------- wrapper --------------------------------------
def bilstm_crf_forward(kp, sentences):
    """sentences: (B, L) int32 word ids (batch of same-length sentences; B=1 == module.forward).

    Returns (scores (B,), best_paths (B, L) int32, feats (B, L, TAGSET))."""
    B, L = sentences.shape
    assert L == SEQ, "attention-count table / block shapes are built for SEQ-length sentences"
    ids = sentences.reshape(B * L, 1).astype(jnp.int32)

    weight_args = (kp['emb'], kp['wihf_all'], kp['wihb_all'], kp['b_all'],
                   kp['whh_gate_i'], kp['whh_gate_f'], kp['whh_gate_g'], kp['whh_gate_o'],
                   kp['wq'], kp['bq'], kp['wk'], kp['bk'], kp['wv'], kp['bv'],
                   kp['wh2t_pad'], kp['bh2t_pad'],
                   kp['counts'], kp['trans'], kp['transT'])

    in_specs = ([pl.BlockSpec((L, 1), lambda b: (b, 0))]
                + [pl.BlockSpec(w.shape, lambda b: (0, 0)) for w in weight_args])

    out_shape = (jax.ShapeDtypeStruct((B * L, LANE), jnp.float32),    # feats (lane-dense)
                 jax.ShapeDtypeStruct((B * L, 1), jnp.int32),         # Viterbi best path
                 jax.ShapeDtypeStruct((B * L, 1), jnp.float32))       # path score (replicated)
    out_specs = (pl.BlockSpec((L, LANE), lambda b: (b, 0)),
                 pl.BlockSpec((L, 1), lambda b: (b, 0)),
                 pl.BlockSpec((L, 1), lambda b: (b, 0)))

    feats_pad, path, score = pl.pallas_call(
        _bilstm_crf_kernel,
        out_shape=out_shape,
        grid=(B,),
        in_specs=in_specs,
        out_specs=out_specs,
        scratch_shapes=[pltpu.VMEM((L, HIDDEN), jnp.float32)],        # lstm_out stays in VMEM
        compiler_params=pltpu.CompilerParams(dimension_semantics=("parallel",)),
    )(ids, *weight_args)

    feats = feats_pad.reshape(B, L, LANE)[:, :, :TAGSET]
    paths = path.reshape(B, L)
    scores = score.reshape(B, L)[:, 0]
    return scores, paths, feats


# --------------------- kernel-layout parameter preparation ----------------------
def _make_kernel_params(std):
    """Re-layout standard (PyTorch-like) parameters for the fused kernel (host, one-time)."""
    E, Hd, H, T = EMB_DIM, HIDDEN // 2, HIDDEN, TAGSET
    wihf_all = np.zeros((E, 8 * Hd), np.float32)   # column blocks: [i_f i_b f_f f_b g_f g_b o_f o_b]
    wihb_all = np.zeros((E, 8 * Hd), np.float32)
    b_all = np.zeros((1, 8 * Hd), np.float32)
    whh_blk = [np.zeros((2 * Hd, 2 * Hd), np.float32) for _ in range(4)]
    for g in range(4):
        lo, hi = g * Hd, (g + 1) * Hd
        wihf_all[:, g * 2 * Hd:g * 2 * Hd + Hd] = std['wih_f'][:, lo:hi]
        wihb_all[:, g * 2 * Hd + Hd:(g + 1) * 2 * Hd] = std['wih_b'][:, lo:hi]
        b_all[:, g * 2 * Hd:g * 2 * Hd + Hd] = std['b_f'][:, lo:hi]
        b_all[:, g * 2 * Hd + Hd:(g + 1) * 2 * Hd] = std['b_b'][:, lo:hi]
        whh_blk[g][0:Hd, 0:Hd] = std['whh_f'][:, lo:hi]               # block-diag per gate
        whh_blk[g][Hd:2 * Hd, Hd:2 * Hd] = std['whh_b'][:, lo:hi]

    wh2t_pad = np.zeros((2 * H, LANE), np.float32)
    wh2t_pad[:, :T] = std['wh2t']
    bh2t_pad = np.zeros((1, LANE), np.float32)
    bh2t_pad[:, :T] = std['bh2t']

    return dict(
        emb=jnp.asarray(std['embeddings']),
        wihf_all=jnp.asarray(wihf_all), wihb_all=jnp.asarray(wihb_all), b_all=jnp.asarray(b_all),
        whh_gate_i=jnp.asarray(whh_blk[0]), whh_gate_f=jnp.asarray(whh_blk[1]),
        whh_gate_g=jnp.asarray(whh_blk[2]), whh_gate_o=jnp.asarray(whh_blk[3]),
        wq=jnp.asarray(std['wq']), bq=jnp.asarray(std['bq']),
        wk=jnp.asarray(std['wk']), bk=jnp.asarray(std['bk']),
        wv=jnp.asarray(std['wv']), bv=jnp.asarray(std['bv']),
        wh2t_pad=jnp.asarray(wh2t_pad), bh2t_pad=jnp.asarray(bh2t_pad),
        counts=jnp.asarray(_attention_counts(SEQ, WINDOW)),
        trans=jnp.asarray(std['transitions']),
        transT=jnp.asarray(std['transitions'].T.copy()),
    )


# ------------------------ pure-numpy reference (for checking) -------------------
def _sigmoid(x):
    return 1.0 / (1.0 + np.exp(-x))


def _reference_forward(std, ids):
    """Numpy float32 port of _get_lstm_features_batch + _viterbi_decode (eval mode)."""
    L = ids.shape[0]
    Hd, H, T = HIDDEN // 2, HIDDEN, TAGSET
    emb = std['embeddings'][ids]

    def run_dir(xseq, wih, whh, b):
        h = np.zeros((Hd,), np.float32)
        c = np.zeros((Hd,), np.float32)
        outs = []
        for t in range(L):
            g = xseq[t] @ wih + h @ whh + b[0]
            i = _sigmoid(g[0:Hd]); f = _sigmoid(g[Hd:2 * Hd])
            gg = np.tanh(g[2 * Hd:3 * Hd]); o = _sigmoid(g[3 * Hd:4 * Hd])
            c = f * c + i * gg
            h = o * np.tanh(c)
            outs.append(h)
        return np.stack(outs)

    hf = run_dir(emb, std['wih_f'], std['whh_f'], std['b_f'])
    hb = run_dir(emb[::-1], std['wih_b'], std['whh_b'], std['b_b'])[::-1]
    ht = np.concatenate([hf, hb], axis=1)

    q = ht @ std['wq'] + std['bq'][0]
    cat = np.concatenate([emb, ht], axis=1)
    K = cat @ std['wk'] + std['bk'][0]
    V = cat @ std['wv'] + std['bv'][0]
    att_id = local_attention_id_np(L, WINDOW)
    attn = np.zeros((L, H), np.float32)
    for t in range(L):
        kt, vt = K[att_id[t]], V[att_id[t]]
        s = kt @ q[t] / np.sqrt(H)
        s = s - s.max()
        p = np.exp(s)
        p = p / p.sum()
        attn[t] = p @ vt
    feats = (np.concatenate([ht, attn], axis=1) @ std['wh2t'] + std['bh2t'][0]).astype(np.float32)

    trans = std['transitions']
    fv = np.full((T,), -10000.0, np.float32)
    fv[START_IDX] = 0.0
    bps = []
    for t in range(L):
        tag_var = fv[None, :] + trans
        bps.append(tag_var.argmax(axis=1))
        fv = tag_var.max(axis=1) + feats[t]
    terminal = fv + trans[STOP_IDX]
    best = int(terminal.argmax())
    score = float(terminal[best])
    path = [best]
    for bp in reversed(bps):
        best = int(bp[best])
        path.append(best)
    start = path.pop()
    assert start == START_IDX
    path.reverse()
    return feats, score, path


def _viterbi_path_score(feats, trans, path):
    s = 0.0
    prev = START_IDX
    for t, tag in enumerate(path):
        s += float(trans[tag, prev]) + float(feats[t, tag])
        prev = tag
    s += float(trans[STOP_IDX, prev])
    return s


# ------------------------------------- main --------------------------------------
if __name__ == "__main__":
    key = jax.random.PRNGKey(0)
    ks = jax.random.split(key, 20)

    def rnd(k, shape, scale=0.1):
        return np.array(scale * jax.random.normal(k, shape, dtype=jnp.float32))

    Hd = HIDDEN // 2
    std = {
        'embeddings': rnd(ks[0], (VOCAB, EMB_DIM), 1.0),
        # LSTM weights laid out (in, 4*Hd) with gate order i,f,g,o; bias = b_ih + b_hh
        'wih_f': rnd(ks[1], (EMB_DIM, 4 * Hd)),
        'whh_f': rnd(ks[2], (Hd, 4 * Hd)),
        'b_f':   rnd(ks[3], (1, 4 * Hd)),
        'wih_b': rnd(ks[4], (EMB_DIM, 4 * Hd)),
        'whh_b': rnd(ks[5], (Hd, 4 * Hd)),
        'b_b':   rnd(ks[6], (1, 4 * Hd)),
        # Linear layers laid out (in, out)
        'wq':    rnd(ks[7], (HIDDEN, HIDDEN)),
        'bq':    rnd(ks[8], (1, HIDDEN)),
        'wk':    rnd(ks[9], (EMB_DIM + HIDDEN, HIDDEN)),
        'bk':    rnd(ks[10], (1, HIDDEN)),
        'wv':    rnd(ks[11], (EMB_DIM + HIDDEN, HIDDEN)),
        'bv':    rnd(ks[12], (1, HIDDEN)),
        'wh2t':  rnd(ks[13], (2 * HIDDEN, TAGSET)),
        'bh2t':  rnd(ks[14], (1, TAGSET)),
    }
    trans = np.array(jax.random.normal(ks[15], (TAGSET, TAGSET), dtype=jnp.float32))
    trans[START_IDX, :] = -10000.0
    trans[:, STOP_IDX] = -10000.0
    std['transitions'] = trans

    kparams = _make_kernel_params(std)

    B = 2
    sentences = jax.random.randint(ks[16], (B, SEQ), 1, VOCAB, dtype=jnp.int32)

    scores, paths, feats = bilstm_crf_forward(kparams, sentences)
    jax.block_until_ready((scores, paths, feats))

    # ----------------- validate against the numpy port of the torch math -----------------
    for b in range(B):
        ref_feats, ref_score, ref_path = _reference_forward(std, np.asarray(sentences[b]))
        k_feats = np.asarray(feats[b])
        k_path = [int(v) for v in np.asarray(paths[b])]
        k_score = float(scores[b])

        assert np.allclose(k_feats, ref_feats, rtol=5e-2, atol=2e-2), \
            "feats mismatch (batch %d): max err %g" % (b, np.abs(k_feats - ref_feats).max())
        assert abs(k_score - ref_score) < 0.25, (k_score, ref_score)
        assert len(k_path) == SEQ and all(0 <= v < TAGSET for v in k_path)
        # decoded path must be (near-)optimal under the reference scores (tie-tolerant check)
        assert _viterbi_path_score(ref_feats, std['transitions'], k_path) >= ref_score - 0.25

    print("KERNEL_OK")
</pallas_src>

<mosaic_0001>
module attributes {stable_mosaic.version = 11 : i64} {
  func.func @_bilstm_crf_kernel(%arg0: i32, %arg1: memref<8x1xi32, #tpu.memory_space<vmem>>, %arg2: memref<20x16xf32, #tpu.memory_space<vmem>>, %arg3: memref<16x128xf32, #tpu.memory_space<vmem>>, %arg4: memref<16x128xf32, #tpu.memory_space<vmem>>, %arg5: memref<1x128xf32, #tpu.memory_space<vmem>>, %arg6: memref<32x32xf32, #tpu.memory_space<vmem>>, %arg7: memref<32x32xf32, #tpu.memory_space<vmem>>, %arg8: memref<32x32xf32, #tpu.memory_space<vmem>>, %arg9: memref<32x32xf32, #tpu.memory_space<vmem>>, %arg10: memref<32x32xf32, #tpu.memory_space<vmem>>, %arg11: memref<1x32xf32, #tpu.memory_space<vmem>>, %arg12: memref<48x32xf32, #tpu.memory_space<vmem>>, %arg13: memref<1x32xf32, #tpu.memory_space<vmem>>, %arg14: memref<48x32xf32, #tpu.memory_space<vmem>>, %arg15: memref<1x32xf32, #tpu.memory_space<vmem>>, %arg16: memref<64x128xf32, #tpu.memory_space<vmem>>, %arg17: memref<1x128xf32, #tpu.memory_space<vmem>>, %arg18: memref<8x8xf32, #tpu.memory_space<vmem>>, %arg19: memref<5x5xf32, #tpu.memory_space<vmem>>, %arg20: memref<5x5xf32, #tpu.memory_space<vmem>>, %arg21: memref<8x128xf32, #tpu.memory_space<vmem>>, %arg22: memref<8x1xi32, #tpu.memory_space<vmem>>, %arg23: memref<8x1xf32, #tpu.memory_space<vmem>>, %arg24: memref<8x32xf32, #tpu.memory_space<vmem>>) attributes {dimension_semantics = [#tpu.dimension_semantics<parallel>], iteration_bounds = array<i64: 2>, scalar_prefetch = 0 : i64, scratch_operands = 1 : i64, tpu.core_type = #tpu.core_type<tc>, window_params = [{transform_indices = @transform_0, window_bounds = array<i64: 8, 1>}, {pipeline_mode = #tpu.pipeline_mode<synchronous>, transform_indices = @transform_1, window_bounds = array<i64: 20, 16>}, {pipeline_mode = #tpu.pipeline_mode<synchronous>, transform_indices = @transform_2, window_bounds = array<i64: 16, 128>}, {pipeline_mode = #tpu.pipeline_mode<synchronous>, transform_indices = @transform_3, window_bounds = array<i64: 16, 128>}, {pipeline_mode = #tpu.pipeline_mode<synchronous>, transform_indices = @transform_4, window_bounds = array<i64: 1, 128>}, {pipeline_mode = #tpu.pipeline_mode<synchronous>, transform_indices = @transform_5, window_bounds = array<i64: 32, 32>}, {pipeline_mode = #tpu.pipeline_mode<synchronous>, transform_indices = @transform_6, window_bounds = array<i64: 32, 32>}, {pipeline_mode = #tpu.pipeline_mode<synchronous>, transform_indices = @transform_7, window_bounds = array<i64: 32, 32>}, {pipeline_mode = #tpu.pipeline_mode<synchronous>, transform_indices = @transform_8, window_bounds = array<i64: 32, 32>}, {pipeline_mode = #tpu.pipeline_mode<synchronous>, transform_indices = @transform_9, window_bounds = array<i64: 32, 32>}, {pipeline_mode = #tpu.pipeline_mode<synchronous>, transform_indices = @transform_10, window_bounds = array<i64: 1, 32>}, {pipeline_mode = #tpu.pipeline_mode<synchronous>, transform_indices = @transform_11, window_bounds = array<i64: 48, 32>}, {pipeline_mode = #tpu.pipeline_mode<synchronous>, transform_indices = @transform_12, window_bounds = array<i64: 1, 32>}, {pipeline_mode = #tpu.pipeline_mode<synchronous>, transform_indices = @transform_13, window_bounds = array<i64: 48, 32>}, {pipeline_mode = #tpu.pipeline_mode<synchronous>, transform_indices = @transform_14, window_bounds = array<i64: 1, 32>}, {pipeline_mode = #tpu.pipeline_mode<synchronous>, transform_indices = @transform_15, window_bounds = array<i64: 64, 128>}, {pipeline_mode = #tpu.pipeline_mode<synchronous>, transform_indices = @transform_16, window_bounds = array<i64: 1, 128>}, {pipeline_mode = #tpu.pipeline_mode<synchronous>, transform_indices = @transform_17, window_bounds = array<i64: 8, 8>}, {pipeline_mode = #tpu.pipeline_mode<synchronous>, transform_indices = @transform_18, window_bounds = array<i64: 5, 5>}, {pipeline_mode = #tpu.pipeline_mode<synchronous>, transform_indices = @transform_19, window_bounds = array<i64: 5, 5>}, {transform_indices = @transform_20, window_bounds = array<i64: 8, 128>}, {transform_indices = @transform_21, window_bounds = array<i64: 8, 1>}, {transform_indices = @transform_22, window_bounds = array<i64: 8, 1>}]} {
    %c0 = arith.constant 0 : index
    %c0_0 = arith.constant 0 : index
    %0 = vector.load %arg1[%c0, %c0_0] : memref<8x1xi32, #tpu.memory_space<vmem>>, vector<8x1xi32>
    %1 = tpu.iota {dimensions = array<i32: 1>} : vector<8x20xi32>
    %2 = vector.broadcast %0 : vector<8x1xi32> to vector<8x20xi32>
    %3 = arith.cmpi eq, %2, %1 : vector<8x20xi32>
    %4 = arith.extui %3 : vector<8x20xi1> to vector<8x20xi32>
    %5 = arith.sitofp %4 : vector<8x20xi32> to vector<8x20xf32>
    %c0_1 = arith.constant 0 : index
    %c0_2 = arith.constant 0 : index
    %6 = vector.load %arg2[%c0_1, %c0_2] : memref<20x16xf32, #tpu.memory_space<vmem>>, vector<20x16xf32>
    %cst = arith.constant dense<0.000000e+00> : vector<8x16xf32>
    %7 = tpu.matmul %5, %6, %cst {dimension_numbers = #tpu.dot_dimension_numbers<[1], [0], [0], [1], [0, 0, 1, 1], [], []>} : vector<8x20xf32>, vector<20x16xf32>, vector<8x16xf32> -> vector<8x16xf32>
    %8 = tpu.iota {dimensions = array<i32: 0>} : vector<8x8xi32>
    %9 = tpu.iota {dimensions = array<i32: 1>} : vector<8x8xi32>
    %10 = arith.addi %8, %9 : vector<8x8xi32>
    %c7_i32 = arith.constant 7 : i32
    %11 = vector.broadcast %c7_i32 : i32 to vector<8x8xi32>
    %12 = arith.cmpi eq, %10, %11 : vector<8x8xi32>
    %13 = arith.extui %12 : vector<8x8xi1> to vector<8x8xi32>
    %14 = arith.sitofp %13 : vector<8x8xi32> to vector<8x8xf32>
    %cst_3 = arith.constant dense<0.000000e+00> : vector<8x16xf32>
    %15 = tpu.matmul %14, %7, %cst_3 {dimension_numbers = #tpu.dot_dimension_numbers<[1], [0], [0], [1], [0, 0, 1, 1], [], []>} : vector<8x8xf32>, vector<8x16xf32>, vector<8x16xf32> -> vector<8x16xf32>
    %c0_4 = arith.constant 0 : index
    %c0_5 = arith.constant 0 : index
    %16 = vector.load %arg3[%c0_4, %c0_5] : memref<16x128xf32, #tpu.memory_space<vmem>>, vector<16x128xf32>
    %cst_6 = arith.constant dense<0.000000e+00> : vector<8x128xf32>
    %17 = tpu.matmul %7, %16, %cst_6 {dimension_numbers = #tpu.dot_dimension_numbers<[1], [0], [0], [1], [0, 0, 1, 1], [], []>} : vector<8x16xf32>, vector<16x128xf32>, vector<8x128xf32> -> vector<8x128xf32>
    %c0_7 = arith.constant 0 : index
    %c0_8 = arith.constant 0 : index
    %18 = vector.load %arg4[%c0_7, %c0_8] : memref<16x128xf32, #tpu.memory_space<vmem>>, vector<16x128xf32>
    %cst_9 = arith.constant dense<0.000000e+00> : vector<8x128xf32>
    %19 = tpu.matmul %15, %18, %cst_9 {dimension_numbers = #tpu.dot_dimension_numbers<[1], [0], [0], [1], [0, 0, 1, 1], [], []>} : vector<8x16xf32>, vector<16x128xf32>, vector<8x128xf32> -> vector<8x128xf32>
    %20 = arith.addf %17, %19 : vector<8x128xf32>
    %c0_10 = arith.constant 0 : index
    %c0_11 = arith.constant 0 : index
    %21 = vector.load %arg5[%c0_10, %c0_11] : memref<1x128xf32, #tpu.memory_space<vmem>>, vector<1x128xf32>
    %22 = vector.broadcast %21 : vector<1x128xf32> to vector<8x128xf32>
    %23 = arith.addf %20, %22 : vector<8x128xf32>
    %24 = vector.extract_strided_slice %23 {offsets = [0, 0], sizes = [8, 32], strides = [1, 1]} : vector<8x128xf32> to vector<8x32xf32>
    %25 = vector.extract_strided_slice %23 {offsets = [0, 32], sizes = [8, 32], strides = [1, 1]} : vector<8x128xf32> to vector<8x32xf32>
    %26 = vector.extract_strided_slice %23 {offsets = [0, 64], sizes = [8, 32], strides = [1, 1]} : vector<8x128xf32> to vector<8x32xf32>
    %27 = vector.extract_strided_slice %23 {offsets = [0, 96], sizes = [8, 32], strides = [1, 1]} : vector<8x128xf32> to vector<8x32xf32>
    %c0_12 = arith.constant 0 : index
    %c0_13 = arith.constant 0 : index
    %28 = vector.load %arg6[%c0_12, %c0_13] : memref<32x32xf32, #tpu.memory_space<vmem>>, vector<32x32xf32>
    %c0_14 = arith.constant 0 : index
    %c0_15 = arith.constant 0 : index
    %29 = vector.load %arg7[%c0_14, %c0_15] : memref<32x32xf32, #tpu.memory_space<vmem>>, vector<32x32xf32>
    %c0_16 = arith.constant 0 : index
    %c0_17 = arith.constant 0 : index
    %30 = vector.load %arg8[%c0_16, %c0_17] : memref<32x32xf32, #tpu.memory_space<vmem>>, vector<32x32xf32>
    %c0_18 = arith.constant 0 : index
    %c0_19 = arith.constant 0 : index
    %31 = vector.load %arg9[%c0_18, %c0_19] : memref<32x32xf32, #tpu.memory_space<vmem>>, vector<32x32xf32>
    %cst_20 = arith.constant 0.000000e+00 : f32
    %32 = vector.broadcast %cst_20 : f32 to vector<1x32xf32>
    %cst_21 = arith.constant 0.000000e+00 : f32
    %33 = vector.broadcast %cst_21 : f32 to vector<1x32xf32>
    %34 = vector.extract_strided_slice %24 {offsets = [0, 0], sizes = [1, 32], strides = [1, 1]} : vector<8x32xf32> to vector<1x32xf32>
    %cst_22 = arith.constant dense<0.000000e+00> : vector<1x32xf32>
    %35 = tpu.matmul %32, %28, %cst_22 {dimension_numbers = #tpu.dot_dimension_numbers<[1], [0], [0], [1], [0, 0, 1, 1], [], []>} : vector<1x32xf32>, vector<32x32xf32>, vector<1x32xf32> -> vector<1x32xf32>
    %36 = arith.addf %34, %35 : vector<1x32xf32>
    %37 = vector.extract_strided_slice %25 {offsets = [0, 0], sizes = [1, 32], strides = [1, 1]} : vector<8x32xf32> to vector<1x32xf32>
    %cst_23 = arith.constant dense<0.000000e+00> : vector<1x32xf32>
    %38 = tpu.matmul %32, %29, %cst_23 {dimension_numbers = #tpu.dot_dimension_numbers<[1], [0], [0], [1], [0, 0, 1, 1], [], []>} : vector<1x32xf32>, vector<32x32xf32>, vector<1x32xf32> -> vector<1x32xf32>
    %39 = arith.addf %37, %38 : vector<1x32xf32>
    %40 = vector.extract_strided_slice %26 {offsets = [0, 0], sizes = [1, 32], strides = [1, 1]} : vector<8x32xf32> to vector<1x32xf32>
    %cst_24 = arith.constant dense<0.000000e+00> : vector<1x32xf32>
    %41 = tpu.matmul %32, %30, %cst_24 {dimension_numbers = #tpu.dot_dimension_numbers<[1], [0], [0], [1], [0, 0, 1, 1], [], []>} : vector<1x32xf32>, vector<32x32xf32>, vector<1x32xf32> -> vector<1x32xf32>
    %42 = arith.addf %40, %41 : vector<1x32xf32>
    %43 = vector.extract_strided_slice %27 {offsets = [0, 0], sizes = [1, 32], strides = [1, 1]} : vector<8x32xf32> to vector<1x32xf32>
    %cst_25 = arith.constant dense<0.000000e+00> : vector<1x32xf32>
    %44 = tpu.matmul %32, %31, %cst_25 {dimension_numbers = #tpu.dot_dimension_numbers<[1], [0], [0], [1], [0, 0, 1, 1], [], []>} : vector<1x32xf32>, vector<32x32xf32>, vector<1x32xf32> -> vector<1x32xf32>
    %45 = arith.addf %43, %44 : vector<1x32xf32>
    %46 = arith.negf %36 : vector<1x32xf32>
    %47 = math.exp %46 : vector<1x32xf32>
    %cst_26 = arith.constant 1.000000e+00 : f32
    %48 = vector.broadcast %cst_26 : f32 to vector<1x32xf32>
    %49 = arith.addf %48, %47 : vector<1x32xf32>
    %50 = arith.divf %48, %49 : vector<1x32xf32>
    %51 = arith.negf %39 : vector<1x32xf32>
    %52 = math.exp %51 : vector<1x32xf32>
    %cst_27 = arith.constant 1.000000e+00 : f32
    %53 = vector.broadcast %cst_27 : f32 to vector<1x32xf32>
    %54 = arith.addf %53, %52 : vector<1x32xf32>
    %55 = arith.divf %53, %54 : vector<1x32xf32>
    %56 = math.tanh %42 : vector<1x32xf32>
    %57 = arith.negf %45 : vector<1x32xf32>
    %58 = math.exp %57 : vector<1x32xf32>
    %cst_28 = arith.constant 1.000000e+00 : f32
    %59 = vector.broadcast %cst_28 : f32 to vector<1x32xf32>
    %60 = arith.addf %59, %58 : vector<1x32xf32>
    %61 = arith.divf %59, %60 : vector<1x32xf32>
    %62 = arith.mulf %55, %33 : vector<1x32xf32>
    %63 = arith.mulf %50, %56 : vector<1x32xf32>
    %64 = arith.addf %62, %63 : vector<1x32xf32>
    %65 = math.tanh %64 : vector<1x32xf32>
    %66 = arith.mulf %61, %65 : vector<1x32xf32>
    %67 = vector.extract_strided_slice %66 {offsets = [0, 0], sizes = [1, 16], strides = [1, 1]} : vector<1x32xf32> to vector<1x16xf32>
    %c0_29 = arith.constant 0 : index
    %c0_30 = arith.constant 0 : index
    %68 = vector.load %arg24[%c0_29, %c0_30] : memref<8x32xf32, #tpu.memory_space<vmem>>, vector<1x16xf32>
    tpu.vector_store %arg24[%c0_29, %c0_30], %67 {strides = array<i32>} : memref<8x32xf32, #tpu.memory_space<vmem>>, vector<1x16xf32>,
    %69 = vector.extract_strided_slice %66 {offsets = [0, 16], sizes = [1, 16], strides = [1, 1]} : vector<1x32xf32> to vector<1x16xf32>
    %c7 = arith.constant 7 : index
    %c16 = arith.constant 16 : index
    %70 = vector.load %arg24[%c7, %c16] : memref<8x32xf32, #tpu.memory_space<vmem>>, vector<1x16xf32>
    tpu.vector_store %arg24[%c7, %c16], %69 {strides = array<i32>} : memref<8x32xf32, #tpu.memory_space<vmem>>, vector<1x16xf32>,
    %71 = vector.extract_strided_slice %24 {offsets = [1, 0], sizes = [1, 32], strides = [1, 1]} : vector<8x32xf32> to vector<1x32xf32>
    %cst_31 = arith.constant dense<0.000000e+00> : vector<1x32xf32>
    %72 = tpu.matmul %66, %28, %cst_31 {dimension_numbers = #tpu.dot_dimension_numbers<[1], [0], [0], [1], [0, 0, 1, 1], [], []>} : vector<1x32xf32>, vector<32x32xf32>, vector<1x32xf32> -> vector<1x32xf32>
    %73 = arith.addf %71, %72 : vector<1x32xf32>
    %74 = vector.extract_strided_slice %25 {offsets = [1, 0], sizes = [1, 32], strides = [1, 1]} : vector<8x32xf32> to vector<1x32xf32>
    %cst_32 = arith.constant dense<0.000000e+00> : vector<1x32xf32>
    %75 = tpu.matmul %66, %29, %cst_32 {dimension_numbers = #tpu.dot_dimension_numbers<[1], [0], [0], [1], [0, 0, 1, 1], [], []>} : vector<1x32xf32>, vector<32x32xf32>, vector<1x32xf32> -> vector<1x32xf32>
    %76 = arith.addf %74, %75 : vector<1x32xf32>
    %77 = vector.extract_strided_slice %26 {offsets = [1, 0], sizes = [1, 32], strides = [1, 1]} : vector<8x32xf32> to vector<1x32xf32>
    %cst_33 = arith.constant dense<0.000000e+00> : vector<1x32xf32>
    %78 = tpu.matmul %66, %30, %cst_33 {dimension_numbers = #tpu.dot_dimension_numbers<[1], [0], [0], [1], [0, 0, 1, 1], [], []>} : vector<1x32xf32>, vector<32x32xf32>, vector<1x32xf32> -> vector<1x32xf32>
    %79 = arith.addf %77, %78 : vector<1x32xf32>
    %80 = vector.extract_strided_slice %27 {offsets = [1, 0], sizes = [1, 32], strides = [1, 1]} : vector<8x32xf32> to vector<1x32xf32>
    %cst_34 = arith.constant dense<0.000000e+00> : vector<1x32xf32>
    %81 = tpu.matmul %66, %31, %cst_34 {dimension_numbers = #tpu.dot_dimension_numbers<[1], [0], [0], [1], [0, 0, 1, 1], [], []>} : vector<1x32xf32>, vector<32x32xf32>, vector<1x32xf32> -> vector<1x32xf32>
    %82 = arith.addf %80, %81 : vector<1x32xf32>
    %83 = arith.negf %73 : vector<1x32xf32>
    %84 = math.exp %83 : vector<1x32xf32>
    %cst_35 = arith.constant 1.000000e+00 : f32
    %85 = vector.broadcast %cst_35 : f32 to vector<1x32xf32>
    %86 = arith.addf %85, %84 : vector<1x32xf32>
    %87 = arith.divf %85, %86 : vector<1x32xf32>
    %88 = arith.negf %76 : vector<1x32xf32>
    %89 = math.exp %88 : vector<1x32xf32>
    %cst_36 = arith.constant 1.000000e+00 : f32
    %90 = vector.broadcast %cst_36 : f32 to vector<1x32xf32>
    %91 = arith.addf %90, %89 : vector<1x32xf32>
    %92 = arith.divf %90, %91 : vector<1x32xf32>
    %93 = math.tanh %79 : vector<1x32xf32>
    %94 = arith.negf %82 : vector<1x32xf32>
    %95 = math.exp %94 : vector<1x32xf32>
    %cst_37 = arith.constant 1.000000e+00 : f32
    %96 = vector.broadcast %cst_37 : f32 to vector<1x32xf32>
    %97 = arith.addf %96, %95 : vector<1x32xf32>
    %98 = arith.divf %96, %97 : vector<1x32xf32>
    %99 = arith.mulf %92, %64 : vector<1x32xf32>
    %100 = arith.mulf %87, %93 : vector<1x32xf32>
    %101 = arith.addf %99, %100 : vector<1x32xf32>
    %102 = math.tanh %101 : vector<1x32xf32>
    %103 = arith.mulf %98, %102 : vector<1x32xf32>
    %104 = vector.extract_strided_slice %103 {offsets = [0, 0], sizes = [1, 16], strides = [1, 1]} : vector<1x32xf32> to vector<1x16xf32>
    %c1 = arith.constant 1 : index
    %c0_38 = arith.constant 0 : index
    %105 = vector.load %arg24[%c1, %c0_38] : memref<8x32xf32, #tpu.memory_space<vmem>>, vector<1x16xf32>
    tpu.vector_store %arg24[%c1, %c0_38], %104 {strides = array<i32>} : memref<8x32xf32, #tpu.memory_space<vmem>>, vector<1x16xf32>,
    %106 = vector.extract_strided_slice %103 {offsets = [0, 16], sizes = [1, 16], strides = [1, 1]} : vector<1x32xf32> to vector<1x16xf32>
    %c6 = arith.constant 6 : index
    %c16_39 = arith.constant 16 : index
    %107 = vector.load %arg24[%c6, %c16_39] : memref<8x32xf32, #tpu.memory_space<vmem>>, vector<1x16xf32>
    tpu.vector_store %arg24[%c6, %c16_39], %106 {strides = array<i32>} : memref<8x32xf32, #tpu.memory_space<vmem>>, vector<1x16xf32>,
    %108 = vector.extract_strided_slice %24 {offsets = [2, 0], sizes = [1, 32], strides = [1, 1]} : vector<8x32xf32> to vector<1x32xf32>
    %cst_40 = arith.constant dense<0.000000e+00> : vector<1x32xf32>
    %109 = tpu.matmul %103, %28, %cst_40 {dimension_numbers = #tpu.dot_dimension_numbers<[1], [0], [0], [1], [0, 0, 1, 1], [], []>} : vector<1x32xf32>, vector<32x32xf32>, vector<1x32xf32> -> vector<1x32xf32>
    %110 = arith.addf %108, %109 : vector<1x32xf32>
    %111 = vector.extract_strided_slice %25 {offsets = [2, 0], sizes = [1, 32], strides = [1, 1]} : vector<8x32xf32> to vector<1x32xf32>
    %cst_41 = arith.constant dense<0.000000e+00> : vector<1x32xf32>
    %112 = tpu.matmul %103, %29, %cst_41 {dimension_numbers = #tpu.dot_dimension_numbers<[1], [0], [0], [1], [0, 0, 1, 1], [], []>} : vector<1x32xf32>, vector<32x32xf32>, vector<1x32xf32> -> vector<1x32xf32>
    %113 = arith.addf %111, %112 : vector<1x32xf32>
    %114 = vector.extract_strided_slice %26 {offsets = [2, 0], sizes = [1, 32], strides = [1, 1]} : vector<8x32xf32> to vector<1x32xf32>
    %cst_42 = arith.constant dense<0.000000e+00> : vector<1x32xf32>
    %115 = tpu.matmul %103, %30, %cst_42 {dimension_numbers = #tpu.dot_dimension_numbers<[1], [0], [0], [1], [0, 0, 1, 1], [], []>} : vector<1x32xf32>, vector<32x32xf32>, vector<1x32xf32> -> vector<1x32xf32>
    %116 = arith.addf %114, %115 : vector<1x32xf32>
    %117 = vector.extract_strided_slice %27 {offsets = [2, 0], sizes = [1, 32], strides = [1, 1]} : vector<8x32xf32> to vector<1x32xf32>
    %cst_43 = arith.constant dense<0.000000e+00> : vector<1x32xf32>
    %118 = tpu.matmul %103, %31, %cst_43 {dimension_numbers = #tpu.dot_dimension_numbers<[1], [0], [0], [1], [0, 0, 1, 1], [], []>} : vector<1x32xf32>, vector<32x32xf32>, vector<1x32xf32> -> vector<1x32xf32>
    %119 = arith.addf %117, %118 : vector<1x32xf32>
    %120 = arith.negf %110 : vector<1x32xf32>
    %121 = math.exp %120 : vector<1x32xf32>
    %cst_44 = arith.constant 1.000000e+00 : f32
    %122 = vector.broadcast %cst_44 : f32 to vector<1x32xf32>
    %123 = arith.addf %122, %121 : vector<1x32xf32>
    %124 = arith.divf %122, %123 : vector<1x32xf32>
    %125 = arith.negf %113 : vector<1x32xf32>
    %126 = math.exp %125 : vector<1x32xf32>
    %cst_45 = arith.constant 1.000000e+00 : f32
    %127 = vector.broadcast %cst_45 : f32 to vector<1x32xf32>
    %128 = arith.addf %127, %126 : vector<1x32xf32>
    %129 = arith.divf %127, %128 : vector<1x32xf32>
    %130 = math.tanh %116 : vector<1x32xf32>
    %131 = arith.negf %119 : vector<1x32xf32>
    %132 = math.exp %131 : vector<1x32xf32>
    %cst_46 = arith.constant 1.000000e+00 : f32
    %133 = vector.broadcast %cst_46 : f32 to vector<1x32xf32>
    %134 = arith.addf %133, %132 : vector<1x32xf32>
    %135 = arith.divf %133, %134 : vector<1x32xf32>
    %136 = arith.mulf %129, %101 : vector<1x32xf32>
    %137 = arith.mulf %124, %130 : vector<1x32xf32>
    %138 = arith.addf %136, %137 : vector<1x32xf32>
    %139 = math.tanh %138 : vector<1x32xf32>
    %140 = arith.mulf %135, %139 : vector<1x32xf32>
    %141 = vector.extract_strided_slice %140 {offsets = [0, 0], sizes = [1, 16], strides = [1, 1]} : vector<1x32xf32> to vector<1x16xf32>
    %c2 = arith.constant 2 : index
    %c0_47 = arith.constant 0 : index
    %142 = vector.load %arg24[%c2, %c0_47] : memref<8x32xf32, #tpu.memory_space<vmem>>, vector<1x16xf32>
    tpu.vector_store %arg24[%c2, %c0_47], %141 {strides = array<i32>} : memref<8x32xf32, #tpu.memory_space<vmem>>, vector<1x16xf32>,
    %143 = vector.extract_strided_slice %140 {offsets = [0, 16], sizes = [1, 16], strides = [1, 1]} : vector<1x32xf32> to vector<1x16xf32>
    %c5 = arith.constant 5 : index
    %c16_48 = arith.constant 16 : index
    %144 = vector.load %arg24[%c5, %c16_48] : memref<8x32xf32, #tpu.memory_space<vmem>>, vector<1x16xf32>
    tpu.vector_store %arg24[%c5, %c16_48], %143 {strides = array<i32>} : memref<8x32xf32, #tpu.memory_space<vmem>>, vector<1x16xf32>,
    %145 = vector.extract_strided_slice %24 {offsets = [3, 0], sizes = [1, 32], strides = [1, 1]} : vector<8x32xf32> to vector<1x32xf32>
    %cst_49 = arith.constant dense<0.000000e+00> : vector<1x32xf32>
    %146 = tpu.matmul %140, %28, %cst_49 {dimension_numbers = #tpu.dot_dimension_numbers<[1], [0], [0], [1], [0, 0, 1, 1], [], []>} : vector<1x32xf32>, vector<32x32xf32>, vector<1x32xf32> -> vector<1x32xf32>
    %147 = arith.addf %145, %146 : vector<1x32xf32>
    %148 = vector.extract_strided_slice %25 {offsets = [3, 0], sizes = [1, 32], strides = [1, 1]} : vector<8x32xf32> to vector<1x32xf32>
    %cst_50 = arith.constant dense<0.000000e+00> : vector<1x32xf32>
    %149 = tpu.matmul %140, %29, %cst_50 {dimension_numbers = #tpu.dot_dimension_numbers<[1], [0], [0], [1], [0, 0, 1, 1], [], []>} : vector<1x32xf32>, vector<32x32xf32>, vector<1x32xf32> -> vector<1x32xf32>
    %150 = arith.addf %148, %149 : vector<1x32xf32>
    %151 = vector.extract_strided_slice %26 {offsets = [3, 0], sizes = [1, 32], strides = [1, 1]} : vector<8x32xf32> to vector<1x32xf32>
    %cst_51 = arith.constant dense<0.000000e+00> : vector<1x32xf32>
    %152 = tpu.matmul %140, %30, %cst_51 {dimension_numbers = #tpu.dot_dimension_numbers<[1], [0], [0], [1], [0, 0, 1, 1], [], []>} : vector<1x32xf32>, vector<32x32xf32>, vector<1x32xf32> -> vector<1x32xf32>
    %153 = arith.addf %151, %152 : vector<1x32xf32>
    %154 = vector.extract_strided_slice %27 {offsets = [3, 0], sizes = [1, 32], strides = [1, 1]} : vector<8x32xf32> to vector<1x32xf32>
    %cst_52 = arith.constant dense<0.000000e+00> : vector<1x32xf32>
    %155 = tpu.matmul %140, %31, %cst_52 {dimension_numbers = #tpu.dot_dimension_numbers<[1], [0], [0], [1], [0, 0, 1, 1], [], []>} : vector<1x32xf32>, vector<32x32xf32>, vector<1x32xf32> -> vector<1x32xf32>
    %156 = arith.addf %154, %155 : vector<1x32xf32>
    %157 = arith.negf %147 : vector<1x32xf32>
    %158 = math.exp %157 : vector<1x32xf32>
    %cst_53 = arith.constant 1.000000e+00 : f32
    %159 = vector.broadcast %cst_53 : f32 to vector<1x32xf32>
    %160 = arith.addf %159, %158 : vector<1x32xf32>
    %161 = arith.divf %159, %160 : vector<1x32xf32>
    %162 = arith.negf %150 : vector<1x32xf32>
    %163 = math.exp %162 : vector<1x32xf32>
    %cst_54 = arith.constant 1.000000e+00 : f32
    %164 = vector.broadcast %cst_54 : f32 to vector<1x32xf32>
    %165 = arith.addf %164, %163 : vector<1x32xf32>
    %166 = arith.divf %164, %165 : vector<1x32xf32>
    %167 = math.tanh %153 : vector<1x32xf32>
    %168 = arith.negf %156 : vector<1x32xf32>
    %169 = math.exp %168 : vector<1x32xf32>
    %cst_55 = arith.constant 1.000000e+00 : f32
    %170 = vector.broadcast %cst_55 : f32 to vector<1x32xf32>
    %171 = arith.addf %170, %169 : vector<1x32xf32>
    %172 = arith.divf %170, %171 : vector<1x32xf32>
    %173 = arith.mulf %166, %138 : vector<1x32xf32>
    %174 = arith.mulf %161, %167 : vector<1x32xf32>
    %175 = arith.addf %173, %174 : vector<1x32xf32>
    %176 = math.tanh %175 : vector<1x32xf32>
    %177 = arith.mulf %172, %176 : vector<1x32xf32>
    %178 = vector.extract_strided_slice %177 {offsets = [0, 0], sizes = [1, 16], strides = [1, 1]} : vector<1x32xf32> to vector<1x16xf32>
    %c3 = arith.constant 3 : index
    %c0_56 = arith.constant 0 : index
    %179 = vector.load %arg24[%c3, %c0_56] : memref<8x32xf32, #tpu.memory_space<vmem>>, vector<1x16xf32>
    tpu.vector_store %arg24[%c3, %c0_56], %178 {strides = array<i32>} : memref<8x32xf32, #tpu.memory_space<vmem>>, vector<1x16xf32>,
    %180 = vector.extract_strided_slice %177 {offsets = [0, 16], sizes = [1, 16], strides = [1, 1]} : vector<1x32xf32> to vector<1x16xf32>
    %c4 = arith.constant 4 : index
    %c16_57 = arith.constant 16 : index
    %181 = vector.load %arg24[%c4, %c16_57] : memref<8x32xf32, #tpu.memory_space<vmem>>, vector<1x16xf32>
    tpu.vector_store %arg24[%c4, %c16_57], %180 {strides = array<i32>} : memref<8x32xf32, #tpu.memory_space<vmem>>, vector<1x16xf32>,
    %182 = vector.extract_strided_slice %24 {offsets = [4, 0], sizes = [1, 32], strides = [1, 1]} : vector<8x32xf32> to vector<1x32xf32>
    %cst_58 = arith.constant dense<0.000000e+00> : vector<1x32xf32>
    %183 = tpu.matmul %177, %28, %cst_58 {dimension_numbers = #tpu.dot_dimension_numbers<[1], [0], [0], [1], [0, 0, 1, 1], [], []>} : vector<1x32xf32>, vector<32x32xf32>, vector<1x32xf32> -> vector<1x32xf32>
    %184 = arith.addf %182, %183 : vector<1x32xf32>
    %185 = vector.extract_strided_slice %25 {offsets = [4, 0], sizes = [1, 32], strides = [1, 1]} : vector<8x32xf32> to vector<1x32xf32>
    %cst_59 = arith.constant dense<0.000000e+00> : vector<1x32xf32>
    %186 = tpu.matmul %177, %29, %cst_59 {dimension_numbers = #tpu.dot_dimension_numbers<[1], [0], [0], [1], [0, 0, 1, 1], [], []>} : vector<1x32xf32>, vector<32x32xf32>, vector<1x32xf32> -> vector<1x32xf32>
    %187 = arith.addf %185, %186 : vector<1x32xf32>
    %188 = vector.extract_strided_slice %26 {offsets = [4, 0], sizes = [1, 32], strides = [1, 1]} : vector<8x32xf32> to vector<1x32xf32>
    %cst_60 = arith.constant dense<0.000000e+00> : vector<1x32xf32>
    %189 = tpu.matmul %177, %30, %cst_60 {dimension_numbers = #tpu.dot_dimension_numbers<[1], [0], [0], [1], [0, 0, 1, 1], [], []>} : vector<1x32xf32>, vector<32x32xf32>, vector<1x32xf32> -> vector<1x32xf32>
    %190 = arith.addf %188, %189 : vector<1x32xf32>
    %191 = vector.extract_strided_slice %27 {offsets = [4, 0], sizes = [1, 32], strides = [1, 1]} : vector<8x32xf32> to vector<1x32xf32>
    %cst_61 = arith.constant dense<0.000000e+00> : vector<1x32xf32>
    %192 = tpu.matmul %177, %31, %cst_61 {dimension_numbers = #tpu.dot_dimension_numbers<[1], [0], [0], [1], [0, 0, 1, 1], [], []>} : vector<1x32xf32>, vector<32x32xf32>, vector<1x32xf32> -> vector<1x32xf32>
    %193 = arith.addf %191, %192 : vector<1x32xf32>
    %194 = arith.negf %184 : vector<1x32xf32>
    %195 = math.exp %194 : vector<1x32xf32>
    %cst_62 = arith.constant 1.000000e+00 : f32
    %196 = vector.broadcast %cst_62 : f32 to vector<1x32xf32>
    %197 = arith.addf %196, %195 : vector<1x32xf32>
    %198 = arith.divf %196, %197 : vector<1x32xf32>
    %199 = arith.negf %187 : vector<1x32xf32>
    %200 = math.exp %199 : vector<1x32xf32>
    %cst_63 = arith.constant 1.000000e+00 : f32
    %201 = vector.broadcast %cst_63 : f32 to vector<1x32xf32>
    %202 = arith.addf %201, %200 : vector<1x32xf32>
    %203 = arith.divf %201, %202 : vector<1x32xf32>
    %204 = math.tanh %190 : vector<1x32xf32>
    %205 = arith.negf %193 : vector<1x32xf32>
    %206 = math.exp %205 : vector<1x32xf32>
    %cst_64 = arith.constant 1.000000e+00 : f32
    %207 = vector.broadcast %cst_64 : f32 to vector<1x32xf32>
    %208 = arith.addf %207, %206 : vector<1x32xf32>
    %209 = arith.divf %207, %208 : vector<1x32xf32>
    %210 = arith.mulf %203, %175 : vector<1x32xf32>
    %211 = arith.mulf %198, %204 : vector<1x32xf32>
    %212 = arith.addf %210, %211 : vector<1x32xf32>
    %213 = math.tanh %212 : vector<1x32xf32>
    %214 = arith.mulf %209, %213 : vector<1x32xf32>
    %215 = vector.extract_strided_slice %214 {offsets = [0, 0], sizes = [1, 16], strides = [1, 1]} : vector<1x32xf32> to vector<1x16xf32>
    %c4_65 = arith.constant 4 : index
    %c0_66 = arith.constant 0 : index
    %216 = vector.load %arg24[%c4_65, %c0_66] : memref<8x32xf32, #tpu.memory_space<vmem>>, vector<1x16xf32>
    tpu.vector_store %arg24[%c4_65, %c0_66], %215 {strides = array<i32>} : memref<8x32xf32, #tpu.memory_space<vmem>>, vector<1x16xf32>,
    %217 = vector.extract_strided_slice %214 {offsets = [0, 16], sizes = [1, 16], strides = [1, 1]} : vector<1x32xf32> to vector<1x16xf32>
    %c3_67 = arith.constant 3 : index
    %c16_68 = arith.constant 16 : index
    %218 = vector.load %arg24[%c3_67, %c16_68] : memref<8x32xf32, #tpu.memory_space<vmem>>, vector<1x16xf32>
    tpu.vector_store %arg24[%c3_67, %c16_68], %217 {strides = array<i32>} : memref<8x32xf32, #tpu.memory_space<vmem>>, vector<1x16xf32>,
    %219 = vector.extract_strided_slice %24 {offsets = [5, 0], sizes = [1, 32], strides = [1, 1]} : vector<8x32xf32> to vector<1x32xf32>
    %cst_69 = arith.constant dense<0.000000e+00> : vector<1x32xf32>
    %220 = tpu.matmul %214, %28, %cst_69 {dimension_numbers = #tpu.dot_dimension_numbers<[1], [0], [0], [1], [0, 0, 1, 1], [], []>} : vector<1x32xf32>, vector<32x32xf32>, vector<1x32xf32> -> vector<1x32xf32>
    %221 = arith.addf %219, %220 : vector<1x32xf32>
    %222 = vector.extract_strided_slice %25 {offsets = [5, 0], sizes = [1, 32], strides = [1, 1]} : vector<8x32xf32> to vector<1x32xf32>
    %cst_70 = arith.constant dense<0.000000e+00> : vector<1x32xf32>
    %223 = tpu.matmul %214, %29, %cst_70 {dimension_numbers = #tpu.dot_dimension_numbers<[1], [0], [0], [1], [0, 0, 1, 1], [], []>} : vector<1x32xf32>, vector<32x32xf32>, vector<1x32xf32> -> vector<1x32xf32>
    %224 = arith.addf %222, %223 : vector<1x32xf32>
    %225 = vector.extract_strided_slice %26 {offsets = [5, 0], sizes = [1, 32], strides = [1, 1]} : vector<8x32xf32> to vector<1x32xf32>
    %cst_71 = arith.constant dense<0.000000e+00> : vector<1x32xf32>
    %226 = tpu.matmul %214, %30, %cst_71 {dimension_numbers = #tpu.dot_dimension_numbers<[1], [0], [0], [1], [0, 0, 1, 1], [], []>} : vector<1x32xf32>, vector<32x32xf32>, vector<1x32xf32> -> vector<1x32xf32>
    %227 = arith.addf %225, %226 : vector<1x32xf32>
    %228 = vector.extract_strided_slice %27 {offsets = [5, 0], sizes = [1, 32], strides = [1, 1]} : vector<8x32xf32> to vector<1x32xf32>
    %cst_72 = arith.constant dense<0.000000e+00> : vector<1x32xf32>
    %229 = tpu.matmul %214, %31, %cst_72 {dimension_numbers = #tpu.dot_dimension_numbers<[1], [0], [0], [1], [0, 0, 1, 1], [], []>} : vector<1x32xf32>, vector<32x32xf32>, vector<1x32xf32> -> vector<1x32xf32>
    %230 = arith.addf %228, %229 : vector<1x32xf32>
    %231 = arith.negf %221 : vector<1x32xf32>
    %232 = math.exp %231 : vector<1x32xf32>
    %cst_73 = arith.constant 1.000000e+00 : f32
    %233 = vector.broadcast %cst_73 : f32 to vector<1x32xf32>
    %234 = arith.addf %233, %232 : vector<1x32xf32>
    %235 = arith.divf %233, %234 : vector<1x32xf32>
    %236 = arith.negf %224 : vector<1x32xf32>
    %237 = math.exp %236 : vector<1x32xf32>
    %cst_74 = arith.constant 1.000000e+00 : f32
    %238 = vector.broadcast %cst_74 : f32 to vector<1x32xf32>
    %239 = arith.addf %238, %237 : vector<1x32xf32>
    %240 = arith.divf %238, %239 : vector<1x32xf32>
    %241 = math.tanh %227 : vector<1x32xf32>
    %242 = arith.negf %230 : vector<1x32xf32>
    %243 = math.exp %242 : vector<1x32xf32>
    %cst_75 = arith.constant 1.000000e+00 : f32
    %244 = vector.broadcast %cst_75 : f32 to vector<1x32xf32>
    %245 = arith.addf %244, %243 : vector<1x32xf32>
    %246 = arith.divf %244, %245 : vector<1x32xf32>
    %247 = arith.mulf %240, %212 : vector<1x32xf32>
    %248 = arith.mulf %235, %241 : vector<1x32xf32>
    %249 = arith.addf %247, %248 : vector<1x32xf32>
    %250 = math.tanh %249 : vector<1x32xf32>
    %251 = arith.mulf %246, %250 : vector<1x32xf32>
    %252 = vector.extract_strided_slice %251 {offsets = [0, 0], sizes = [1, 16], strides = [1, 1]} : vector<1x32xf32> to vector<1x16xf32>
    %c5_76 = arith.constant 5 : index
    %c0_77 = arith.constant 0 : index
    %253 = vector.load %arg24[%c5_76, %c0_77] : memref<8x32xf32, #tpu.memory_space<vmem>>, vector<1x16xf32>
    tpu.vector_store %arg24[%c5_76, %c0_77], %252 {strides = array<i32>} : memref<8x32xf32, #tpu.memory_space<vmem>>, vector<1x16xf32>,
    %254 = vector.extract_strided_slice %251 {offsets = [0, 16], sizes = [1, 16], strides = [1, 1]} : vector<1x32xf32> to vector<1x16xf32>
    %c2_78 = arith.constant 2 : index
    %c16_79 = arith.constant 16 : index
    %255 = vector.load %arg24[%c2_78, %c16_79] : memref<8x32xf32, #tpu.memory_space<vmem>>, vector<1x16xf32>
    tpu.vector_store %arg24[%c2_78, %c16_79], %254 {strides = array<i32>} : memref<8x32xf32, #tpu.memory_space<vmem>>, vector<1x16xf32>,
    %256 = vector.extract_strided_slice %24 {offsets = [6, 0], sizes = [1, 32], strides = [1, 1]} : vector<8x32xf32> to vector<1x32xf32>
    %cst_80 = arith.constant dense<0.000000e+00> : vector<1x32xf32>
    %257 = tpu.matmul %251, %28, %cst_80 {dimension_numbers = #tpu.dot_dimension_numbers<[1], [0], [0], [1], [0, 0, 1, 1], [], []>} : vector<1x32xf32>, vector<32x32xf32>, vector<1x32xf32> -> vector<1x32xf32>
    %258 = arith.addf %256, %257 : vector<1x32xf32>
    %259 = vector.extract_strided_slice %25 {offsets = [6, 0], sizes = [1, 32], strides = [1, 1]} : vector<8x32xf32> to vector<1x32xf32>
    %cst_81 = arith.constant dense<0.000000e+00> : vector<1x32xf32>
    %260 = tpu.matmul %251, %29, %cst_81 {dimension_numbers = #tpu.dot_dimension_numbers<[1], [0], [0], [1], [0, 0, 1, 1], [], []>} : vector<1x32xf32>, vector<32x32xf32>, vector<1x32xf32> -> vector<1x32xf32>
    %261 = arith.addf %259, %260 : vector<1x32xf32>
    %262 = vector.extract_strided_slice %26 {offsets = [6, 0], sizes = [1, 32], strides = [1, 1]} : vector<8x32xf32> to vector<1x32xf32>
    %cst_82 = arith.constant dense<0.000000e+00> : vector<1x32xf32>
    %263 = tpu.matmul %251, %30, %cst_82 {dimension_numbers = #tpu.dot_dimension_numbers<[1], [0], [0], [1], [0, 0, 1, 1], [], []>} : vector<1x32xf32>, vector<32x32xf32>, vector<1x32xf32> -> vector<1x32xf32>
    %264 = arith.addf %262, %263 : vector<1x32xf32>
    %265 = vector.extract_strided_slice %27 {offsets = [6, 0], sizes = [1, 32], strides = [1, 1]} : vector<8x32xf32> to vector<1x32xf32>
    %cst_83 = arith.constant dense<0.000000e+00> : vector<1x32xf32>
    %266 = tpu.matmul %251, %31, %cst_83 {dimension_numbers = #tpu.dot_dimension_numbers<[1], [0], [0], [1], [0, 0, 1, 1], [], []>} : vector<1x32xf32>, vector<32x32xf32>, vector<1x32xf32> -> vector<1x32xf32>
    %267 = arith.addf %265, %266 : vector<1x32xf32>
    %268 = arith.negf %258 : vector<1x32xf32>
    %269 = math.exp %268 : vector<1x32xf32>
    %cst_84 = arith.constant 1.000000e+00 : f32
    %270 = vector.broadcast %cst_84 : f32 to vector<1x32xf32>
    %271 = arith.addf %270, %269 : vector<1x32xf32>
    %272 = arith.divf %270, %271 : vector<1x32xf32>
    %273 = arith.negf %261 : vector<1x32xf32>
    %274 = math.exp %273 : vector<1x32xf32>
    %cst_85 = arith.constant 1.000000e+00 : f32
    %275 = vector.broadcast %cst_85 : f32 to vector<1x32xf32>
    %276 = arith.addf %275, %274 : vector<1x32xf32>
    %277 = arith.divf %275, %276 : vector<1x32xf32>
    %278 = math.tanh %264 : vector<1x32xf32>
    %279 = arith.negf %267 : vector<1x32xf32>
    %280 = math.exp %279 : vector<1x32xf32>
    %cst_86 = arith.constant 1.000000e+00 : f32
    %281 = vector.broadcast %cst_86 : f32 to vector<1x32xf32>
    %282 = arith.addf %281, %280 : vector<1x32xf32>
    %283 = arith.divf %281, %282 : vector<1x32xf32>
    %284 = arith.mulf %277, %249 : vector<1x32xf32>
    %285 = arith.mulf %272, %278 : vector<1x32xf32>
    %286 = arith.addf %284, %285 : vector<1x32xf32>
    %287 = math.tanh %286 : vector<1x32xf32>
    %288 = arith.mulf %283, %287 : vector<1x32xf32>
    %289 = vector.extract_strided_slice %288 {offsets = [0, 0], sizes = [1, 16], strides = [1, 1]} : vector<1x32xf32> to vector<1x16xf32>
    %c6_87 = arith.constant 6 : index
    %c0_88 = arith.constant 0 : index
    %290 = vector.load %arg24[%c6_87, %c0_88] : memref<8x32xf32, #tpu.memory_space<vmem>>, vector<1x16xf32>
    tpu.vector_store %arg24[%c6_87, %c0_88], %289 {strides = array<i32>} : memref<8x32xf32, #tpu.memory_space<vmem>>, vector<1x16xf32>,
    %291 = vector.extract_strided_slice %288 {offsets = [0, 16], sizes = [1, 16], strides = [1, 1]} : vector<1x32xf32> to vector<1x16xf32>
    %c1_89 = arith.constant 1 : index
    %c16_90 = arith.constant 16 : index
    %292 = vector.load %arg24[%c1_89, %c16_90] : memref<8x32xf32, #tpu.memory_space<vmem>>, vector<1x16xf32>
    tpu.vector_store %arg24[%c1_89, %c16_90], %291 {strides = array<i32>} : memref<8x32xf32, #tpu.memory_space<vmem>>, vector<1x16xf32>,
    %293 = vector.extract_strided_slice %24 {offsets = [7, 0], sizes = [1, 32], strides = [1, 1]} : vector<8x32xf32> to vector<1x32xf32>
    %cst_91 = arith.constant dense<0.000000e+00> : vector<1x32xf32>
    %294 = tpu.matmul %288, %28, %cst_91 {dimension_numbers = #tpu.dot_dimension_numbers<[1], [0], [0], [1], [0, 0, 1, 1], [], []>} : vector<1x32xf32>, vector<32x32xf32>, vector<1x32xf32> -> vector<1x32xf32>
    %295 = arith.addf %293, %294 : vector<1x32xf32>
    %296 = vector.extract_strided_slice %25 {offsets = [7, 0], sizes = [1, 32], strides = [1, 1]} : vector<8x32xf32> to vector<1x32xf32>
    %cst_92 = arith.constant dense<0.000000e+00> : vector<1x32xf32>
    %297 = tpu.matmul %288, %29, %cst_92 {dimension_numbers = #tpu.dot_dimension_numbers<[1], [0], [0], [1], [0, 0, 1, 1], [], []>} : vector<1x32xf32>, vector<32x32xf32>, vector<1x32xf32> -> vector<1x32xf32>
    %298 = arith.addf %296, %297 : vector<1x32xf32>
    %299 = vector.extract_strided_slice %26 {offsets = [7, 0], sizes = [1, 32], strides = [1, 1]} : vector<8x32xf32> to vector<1x32xf32>
    %cst_93 = arith.constant dense<0.000000e+00> : vector<1x32xf32>
    %300 = tpu.matmul %288, %30, %cst_93 {dimension_numbers = #tpu.dot_dimension_numbers<[1], [0], [0], [1], [0, 0, 1, 1], [], []>} : vector<1x32xf32>, vector<32x32xf32>, vector<1x32xf32> -> vector<1x32xf32>
    %301 = arith.addf %299, %300 : vector<1x32xf32>
    %302 = vector.extract_strided_slice %27 {offsets = [7, 0], sizes = [1, 32], strides = [1, 1]} : vector<8x32xf32> to vector<1x32xf32>
    %cst_94 = arith.constant dense<0.000000e+00> : vector<1x32xf32>
    %303 = tpu.matmul %288, %31, %cst_94 {dimension_numbers = #tpu.dot_dimension_numbers<[1], [0], [0], [1], [0, 0, 1, 1], [], []>} : vector<1x32xf32>, vector<32x32xf32>, vector<1x32xf32> -> vector<1x32xf32>
    %304 = arith.addf %302, %303 : vector<1x32xf32>
    %305 = arith.negf %295 : vector<1x32xf32>
    %306 = math.exp %305 : vector<1x32xf32>
    %cst_95 = arith.constant 1.000000e+00 : f32
    %307 = vector.broadcast %cst_95 : f32 to vector<1x32xf32>
    %308 = arith.addf %307, %306 : vector<1x32xf32>
    %309 = arith.divf %307, %308 : vector<1x32xf32>
    %310 = arith.negf %298 : vector<1x32xf32>
    %311 = math.exp %310 : vector<1x32xf32>
    %cst_96 = arith.constant 1.000000e+00 : f32
    %312 = vector.broadcast %cst_96 : f32 to vector<1x32xf32>
    %313 = arith.addf %312, %311 : vector<1x32xf32>
    %314 = arith.divf %312, %313 : vector<1x32xf32>
    %315 = math.tanh %301 : vector<1x32xf32>
    %316 = arith.negf %304 : vector<1x32xf32>
    %317 = math.exp %316 : vector<1x32xf32>
    %cst_97 = arith.constant 1.000000e+00 : f32
    %318 = vector.broadcast %cst_97 : f32 to vector<1x32xf32>
    %319 = arith.addf %318, %317 : vector<1x32xf32>
    %320 = arith.divf %318, %319 : vector<1x32xf32>
    %321 = arith.mulf %314, %286 : vector<1x32xf32>
    %322 = arith.mulf %309, %315 : vector<1x32xf32>
    %323 = arith.addf %321, %322 : vector<1x32xf32>
    %324 = math.tanh %323 : vector<1x32xf32>
    %325 = arith.mulf %320, %324 : vector<1x32xf32>
    %326 = vector.extract_strided_slice %325 {offsets = [0, 0], sizes = [1, 16], strides = [1, 1]} : vector<1x32xf32> to vector<1x16xf32>
    %c7_98 = arith.constant 7 : index
    %c0_99 = arith.constant 0 : index
    %327 = vector.load %arg24[%c7_98, %c0_99] : memref<8x32xf32, #tpu.memory_space<vmem>>, vector<1x16xf32>
    tpu.vector_store %arg24[%c7_98, %c0_99], %326 {strides = array<i32>} : memref<8x32xf32, #tpu.memory_space<vmem>>, vector<1x16xf32>,
    %328 = vector.extract_strided_slice %325 {offsets = [0, 16], sizes = [1, 16], strides = [1, 1]} : vector<1x32xf32> to vector<1x16xf32>
    %c0_100 = arith.constant 0 : index
    %c16_101 = arith.constant 16 : index
    %329 = vector.load %arg24[%c0_100, %c16_101] : memref<8x32xf32, #tpu.memory_space<vmem>>, vector<1x16xf32>
    tpu.vector_store %arg24[%c0_100, %c16_101], %328 {strides = array<i32>} : memref<8x32xf32, #tpu.memory_space<vmem>>, vector<1x16xf32>,
    %c0_102 = arith.constant 0 : index
    %c0_103 = arith.constant 0 : index
    %330 = vector.load %arg24[%c0_102, %c0_103] : memref<8x32xf32, #tpu.memory_space<vmem>>, vector<8x32xf32>
    %c0_104 = arith.constant 0 : index
    %c0_105 = arith.constant 0 : index
    %331 = vector.load %arg10[%c0_104, %c0_105] : memref<32x32xf32, #tpu.memory_space<vmem>>, vector<32x32xf32>
    %cst_106 = arith.constant dense<0.000000e+00> : vector<8x32xf32>
    %332 = tpu.matmul %330, %331, %cst_106 {dimension_numbers = #tpu.dot_dimension_numbers<[1], [0], [0], [1], [0, 0, 1, 1], [], []>} : vector<8x32xf32>, vector<32x32xf32>, vector<8x32xf32> -> vector<8x32xf32>
    %c0_107 = arith.constant 0 : index
    %c0_108 = arith.constant 0 : index
    %333 = vector.load %arg11[%c0_107, %c0_108] : memref<1x32xf32, #tpu.memory_space<vmem>>, vector<1x32xf32>
    %334 = vector.broadcast %333 : vector<1x32xf32> to vector<8x32xf32>
    %335 = arith.addf %332, %334 : vector<8x32xf32>
    %c0_109 = arith.constant 0 : index
    %c0_110 = arith.constant 0 : index
    %336 = vector.load %arg12[%c0_109, %c0_110] : memref<48x32xf32, #tpu.memory_space<vmem>>, vector<48x32xf32>
    %c0_111 = arith.constant 0 : index
    %c0_112 = arith.constant 0 : index
    %337 = vector.load %arg14[%c0_111, %c0_112] : memref<48x32xf32, #tpu.memory_space<vmem>>, vector<48x32xf32>
    %338 = vector.extract_strided_slice %336 {offsets = [0, 0], sizes = [16, 32], strides = [1, 1]} : vector<48x32xf32> to vector<16x32xf32>
    %cst_113 = arith.constant dense<0.000000e+00> : vector<8x32xf32>
    %339 = tpu.matmul %7, %338, %cst_113 {dimension_numbers = #tpu.dot_dimension_numbers<[1], [0], [0], [1], [0, 0, 1, 1], [], []>} : vector<8x16xf32>, vector<16x32xf32>, vector<8x32xf32> -> vector<8x32xf32>
    %340 = vector.extract_strided_slice %336 {offsets = [16, 0], sizes = [32, 32], strides = [1, 1]} : vector<48x32xf32> to vector<32x32xf32>
    %cst_114 = arith.constant dense<0.000000e+00> : vector<8x32xf32>
    %341 = tpu.matmul %330, %340, %cst_114 {dimension_numbers = #tpu.dot_dimension_numbers<[1], [0], [0], [1], [0, 0, 1, 1], [], []>} : vector<8x32xf32>, vector<32x32xf32>, vector<8x32xf32> -> vector<8x32xf32>
    %342 = arith.addf %339, %341 : vector<8x32xf32>
    %c0_115 = arith.constant 0 : index
    %c0_116 = arith.constant 0 : index
    %343 = vector.load %arg13[%c0_115, %c0_116] : memref<1x32xf32, #tpu.memory_space<vmem>>, vector<1x32xf32>
    %344 = vector.broadcast %343 : vector<1x32xf32> to vector<8x32xf32>
    %345 = arith.addf %342, %344 : vector<8x32xf32>
    %346 = vector.extract_strided_slice %337 {offsets = [0, 0], sizes = [16, 32], strides = [1, 1]} : vector<48x32xf32> to vector<16x32xf32>
    %cst_117 = arith.constant dense<0.000000e+00> : vector<8x32xf32>
    %347 = tpu.matmul %7, %346, %cst_117 {dimension_numbers = #tpu.dot_dimension_numbers<[1], [0], [0], [1], [0, 0, 1, 1], [], []>} : vector<8x16xf32>, vector<16x32xf32>, vector<8x32xf32> -> vector<8x32xf32>
    %348 = vector.extract_strided_slice %337 {offsets = [16, 0], sizes = [32, 32], strides = [1, 1]} : vector<48x32xf32> to vector<32x32xf32>
    %cst_118 = arith.constant dense<0.000000e+00> : vector<8x32xf32>
    %349 = tpu.matmul %330, %348, %cst_118 {dimension_numbers = #tpu.dot_dimension_numbers<[1], [0], [0], [1], [0, 0, 1, 1], [], []>} : vector<8x32xf32>, vector<32x32xf32>, vector<8x32xf32> -> vector<8x32xf32>
    %350 = arith.addf %347, %349 : vector<8x32xf32>
    %c0_119 = arith.constant 0 : index
    %c0_120 = arith.constant 0 : index
    %351 = vector.load %arg15[%c0_119, %c0_120] : memref<1x32xf32, #tpu.memory_space<vmem>>, vector<1x32xf32>
    %352 = vector.broadcast %351 : vector<1x32xf32> to vector<8x32xf32>
    %353 = arith.addf %350, %352 : vector<8x32xf32>
    %cst_121 = arith.constant dense<0.000000e+00> : vector<8x8xf32>
    %354 = tpu.matmul %335, %345, %cst_121 {dimension_numbers = #tpu.dot_dimension_numbers<[1], [1], [0], [0], [0, 0, 1, 0], [], []>} : vector<8x32xf32>, vector<8x32xf32>, vector<8x8xf32> -> vector<8x8xf32>
    %cst_122 = arith.constant 0.176776692 : f32
    %355 = vector.broadcast %cst_122 : f32 to vector<8x8xf32>
    %356 = arith.mulf %354, %355 : vector<8x8xf32>
    %c0_123 = arith.constant 0 : index
    %c0_124 = arith.constant 0 : index
    %357 = vector.load %arg18[%c0_123, %c0_124] : memref<8x8xf32, #tpu.memory_space<vmem>>, vector<8x8xf32>
    %cst_125 = arith.constant 0.000000e+00 : f32
    %358 = vector.broadcast %cst_125 : f32 to vector<8x8xf32>
    %359 = arith.cmpf ogt, %357, %358 : vector<8x8xf32>
    %cst_126 = arith.constant -1.000000e+30 : f32
    %360 = vector.broadcast %cst_126 : f32 to vector<8x8xf32>
    %361 = arith.select %359, %356, %360 : vector<8x8xi1>, vector<8x8xf32>
    %cst_127 = arith.constant dense<0xFF800000> : vector<8xf32>
    %362 = vector.multi_reduction <maximumf>, %361, %cst_127 [1] : vector<8x8xf32> to vector<8xf32>
    %363 = vector.shape_cast %362 : vector<8xf32> to vector<8x1xf32>
    %364 = vector.broadcast %363 : vector<8x1xf32> to vector<8x8xf32>
    %365 = arith.subf %361, %364 : vector<8x8xf32>
    %366 = math.exp %365 : vector<8x8xf32>
    %367 = arith.mulf %357, %366 : vector<8x8xf32>
    %cst_128 = arith.constant dense<0.000000e+00> : vector<8xf32>
    %368 = vector.multi_reduction <add>, %367, %cst_128 [1] : vector<8x8xf32> to vector<8xf32>
    %369 = vector.shape_cast %368 : vector<8xf32> to vector<8x1xf32>
    %cst_129 = arith.constant dense<0.000000e+00> : vector<8x32xf32>
    %370 = tpu.matmul %367, %353, %cst_129 {dimension_numbers = #tpu.dot_dimension_numbers<[1], [0], [0], [1], [0, 0, 1, 1], [], []>} : vector<8x8xf32>, vector<8x32xf32>, vector<8x32xf32> -> vector<8x32xf32>
    %371 = tpu.reciprocal %369 {approx = true} : vector<8x1xf32> -> vector<8x1xf32>
    %372 = vector.broadcast %371 : vector<8x1xf32> to vector<8x32xf32>
    %373 = arith.mulf %370, %372 : vector<8x32xf32>
    %c0_130 = arith.constant 0 : index
    %c0_131 = arith.constant 0 : index
    %374 = vector.load %arg16[%c0_130, %c0_131] : memref<64x128xf32, #tpu.memory_space<vmem>>, vector<64x128xf32>
    %375 = vector.extract_strided_slice %374 {offsets = [0, 0], sizes = [32, 128], strides = [1, 1]} : vector<64x128xf32> to vector<32x128xf32>
    %cst_132 = arith.constant dense<0.000000e+00> : vector<8x128xf32>
    %376 = tpu.matmul %330, %375, %cst_132 {dimension_numbers = #tpu.dot_dimension_numbers<[1], [0], [0], [1], [0, 0, 1, 1], [], []>} : vector<8x32xf32>, vector<32x128xf32>, vector<8x128xf32> -> vector<8x128xf32>
    %377 = vector.extract_strided_slice %374 {offsets = [32, 0], sizes = [32, 128], strides = [1, 1]} : vector<64x128xf32> to vector<32x128xf32>
    %cst_133 = arith.constant dense<0.000000e+00> : vector<8x128xf32>
    %378 = tpu.matmul %373, %377, %cst_133 {dimension_numbers = #tpu.dot_dimension_numbers<[1], [0], [0], [1], [0, 0, 1, 1], [], []>} : vector<8x32xf32>, vector<32x128xf32>, vector<8x128xf32> -> vector<8x128xf32>
    %379 = arith.addf %376, %378 : vector<8x128xf32>
    %c0_134 = arith.constant 0 : index
    %c0_135 = arith.constant 0 : index
    %380 = vector.load %arg17[%c0_134, %c0_135] : memref<1x128xf32, #tpu.memory_space<vmem>>, vector<1x128xf32>
    %381 = vector.broadcast %380 : vector<1x128xf32> to vector<8x128xf32>
    %382 = arith.addf %379, %381 : vector<8x128xf32>
    %c0_136 = arith.constant 0 : index
    %c0_137 = arith.constant 0 : index
    %383 = vector.load %arg21[%c0_136, %c0_137] : memref<8x128xf32, #tpu.memory_space<vmem>>, vector<8x128xf32>
    tpu.vector_store %arg21[%c0_136, %c0_137], %382 {strides = array<i32>} : memref<8x128xf32, #tpu.memory_space<vmem>>, vector<8x128xf32>,
    %384 = vector.extract_strided_slice %382 {offsets = [0, 0], sizes = [8, 5], strides = [1, 1]} : vector<8x128xf32> to vector<8x5xf32>
    %c0_138 = arith.constant 0 : index
    %c0_139 = arith.constant 0 : index
    %385 = vector.load %arg19[%c0_138, %c0_139] : memref<5x5xf32, #tpu.memory_space<vmem>>, vector<5x5xf32>
    %c0_140 = arith.constant 0 : index
    %c0_141 = arith.constant 0 : index
    %386 = vector.load %arg20[%c0_140, %c0_141] : memref<5x5xf32, #tpu.memory_space<vmem>>, vector<5x5xf32>
    %387 = tpu.iota {dimensions = array<i32: 0>} : vector<5x5xi32>
    %388 = tpu.iota {dimensions = array<i32: 1>} : vector<5x5xi32>
    %389 = arith.cmpi eq, %387, %388 : vector<5x5xi32>
    %390 = arith.extui %389 : vector<5x5xi1> to vector<5x5xi32>
    %391 = arith.sitofp %390 : vector<5x5xi32> to vector<5x5xf32>
    %392 = tpu.iota {dimensions = array<i32: 1>} : vector<1x5xi32>
    %393 = tpu.iota {dimensions = array<i32: 0>} : vector<5x1xi32>
    %c3_i32 = arith.constant 3 : i32
    %394 = vector.broadcast %c3_i32 : i32 to vector<5x1xi32>
    %395 = arith.cmpi eq, %393, %394 : vector<5x1xi32>
    %cst_142 = arith.constant 0.000000e+00 : f32
    %cst_143 = arith.constant -1.000000e+04 : f32
    %396 = vector.broadcast %cst_142 : f32 to vector<5x1xf32>
    %397 = vector.broadcast %cst_143 : f32 to vector<5x1xf32>
    %398 = arith.select %395, %396, %397 : vector<5x1xi1>, vector<5x1xf32>
    %399 = vector.broadcast %398 : vector<5x1xf32> to vector<5x5xf32>
    %400 = arith.addf %386, %399 : vector<5x5xf32>
    %cst_144 = arith.constant dense<0xFF800000> : vector<5xf32>
    %401 = vector.multi_reduction <maximumf>, %400, %cst_144 [0] : vector<5x5xf32> to vector<5xf32>
    %402 = vector.shape_cast %401 : vector<5xf32> to vector<1x5xf32>
    %403 = vector.extract_strided_slice %384 {offsets = [0, 0], sizes = [1, 5], strides = [1, 1]} : vector<8x5xf32> to vector<1x5xf32>
    %404 = arith.addf %402, %403 : vector<1x5xf32>
    %405 = vector.broadcast %404 : vector<1x5xf32> to vector<5x5xf32>
    %406 = arith.mulf %391, %405 : vector<5x5xf32>
    %cst_145 = arith.constant dense<0.000000e+00> : vector<5xf32>
    %407 = vector.multi_reduction <add>, %406, %cst_145 [1] : vector<5x5xf32> to vector<5xf32>
    %408 = vector.shape_cast %407 : vector<5xf32> to vector<5x1xf32>
    %409 = vector.broadcast %408 : vector<5x1xf32> to vector<5x5xf32>
    %410 = arith.addf %386, %409 : vector<5x5xf32>
    %cst_146 = arith.constant dense<0xFF800000> : vector<5xf32>
    %411 = vector.multi_reduction <maximumf>, %410, %cst_146 [0] : vector<5x5xf32> to vector<5xf32>
    %412 = vector.shape_cast %411 : vector<5xf32> to vector<1x5xf32>
    %413 = vector.broadcast %412 : vector<1x5xf32> to vector<5x5xf32>
    %414 = arith.cmpf oge, %410, %413 : vector<5x5xf32>
    %c5_i32 = arith.constant 5 : i32
    %415 = vector.broadcast %c5_i32 : i32 to vector<5x5xi32>
    %416 = arith.select %414, %387, %415 : vector<5x5xi1>, vector<5x5xi32>
    %cst_147 = arith.constant dense<2147483647> : vector<5xi32>
    %417 = vector.multi_reduction <minsi>, %416, %cst_147 [0] : vector<5x5xi32> to vector<5xi32>
    %418 = vector.shape_cast %417 : vector<5xi32> to vector<1x5xi32>
    %419 = vector.extract_strided_slice %384 {offsets = [1, 0], sizes = [1, 5], strides = [1, 1]} : vector<8x5xf32> to vector<1x5xf32>
    %420 = arith.addf %412, %419 : vector<1x5xf32>
    %421 = vector.broadcast %420 : vector<1x5xf32> to vector<5x5xf32>
    %422 = arith.mulf %391, %421 : vector<5x5xf32>
    %cst_148 = arith.constant dense<0.000000e+00> : vector<5xf32>
    %423 = vector.multi_reduction <add>, %422, %cst_148 [1] : vector<5x5xf32> to vector<5xf32>
    %424 = vector.shape_cast %423 : vector<5xf32> to vector<5x1xf32>
    %425 = vector.broadcast %424 : vector<5x1xf32> to vector<5x5xf32>
    %426 = arith.addf %386, %425 : vector<5x5xf32>
    %cst_149 = arith.constant dense<0xFF800000> : vector<5xf32>
    %427 = vector.multi_reduction <maximumf>, %426, %cst_149 [0] : vector<5x5xf32> to vector<5xf32>
    %428 = vector.shape_cast %427 : vector<5xf32> to vector<1x5xf32>
    %429 = vector.broadcast %428 : vector<1x5xf32> to vector<5x5xf32>
    %430 = arith.cmpf oge, %426, %429 : vector<5x5xf32>
    %c5_i32_150 = arith.constant 5 : i32
    %431 = vector.broadcast %c5_i32_150 : i32 to vector<5x5xi32>
    %432 = arith.select %430, %387, %431 : vector<5x5xi1>, vector<5x5xi32>
    %cst_151 = arith.constant dense<2147483647> : vector<5xi32>
    %433 = vector.multi_reduction <minsi>, %432, %cst_151 [0] : vector<5x5xi32> to vector<5xi32>
    %434 = vector.shape_cast %433 : vector<5xi32> to vector<1x5xi32>
    %435 = vector.extract_strided_slice %384 {offsets = [2, 0], sizes = [1, 5], strides = [1, 1]} : vector<8x5xf32> to vector<1x5xf32>
    %436 = arith.addf %428, %435 : vector<1x5xf32>
    %437 = vector.broadcast %436 : vector<1x5xf32> to vector<5x5xf32>
    %438 = arith.mulf %391, %437 : vector<5x5xf32>
    %cst_152 = arith.constant dense<0.000000e+00> : vector<5xf32>
    %439 = vector.multi_reduction <add>, %438, %cst_152 [1] : vector<5x5xf32> to vector<5xf32>
    %440 = vector.shape_cast %439 : vector<5xf32> to vector<5x1xf32>
    %441 = vector.broadcast %440 : vector<5x1xf32> to vector<5x5xf32>
    %442 = arith.addf %386, %441 : vector<5x5xf32>
    %cst_153 = arith.constant dense<0xFF800000> : vector<5xf32>
    %443 = vector.multi_reduction <maximumf>, %442, %cst_153 [0] : vector<5x5xf32> to vector<5xf32>
    %444 = vector.shape_cast %443 : vector<5xf32> to vector<1x5xf32>
    %445 = vector.broadcast %444 : vector<1x5xf32> to vector<5x5xf32>
    %446 = arith.cmpf oge, %442, %445 : vector<5x5xf32>
    %c5_i32_154 = arith.constant 5 : i32
    %447 = vector.broadcast %c5_i32_154 : i32 to vector<5x5xi32>
    %448 = arith.select %446, %387, %447 : vector<5x5xi1>, vector<5x5xi32>
    %cst_155 = arith.constant dense<2147483647> : vector<5xi32>
    %449 = vector.multi_reduction <minsi>, %448, %cst_155 [0] : vector<5x5xi32> to vector<5xi32>
    %450 = vector.shape_cast %449 : vector<5xi32> to vector<1x5xi32>
    %451 = vector.extract_strided_slice %384 {offsets = [3, 0], sizes = [1, 5], strides = [1, 1]} : vector<8x5xf32> to vector<1x5xf32>
    %452 = arith.addf %444, %451 : vector<1x5xf32>
    %453 = vector.broadcast %452 : vector<1x5xf32> to vector<5x5xf32>
    %454 = arith.mulf %391, %453 : vector<5x5xf32>
    %cst_156 = arith.constant dense<0.000000e+00> : vector<5xf32>
    %455 = vector.multi_reduction <add>, %454, %cst_156 [1] : vector<5x5xf32> to vector<5xf32>
    %456 = vector.shape_cast %455 : vector<5xf32> to vector<5x1xf32>
    %457 = vector.broadcast %456 : vector<5x1xf32> to vector<5x5xf32>
    %458 = arith.addf %386, %457 : vector<5x5xf32>
    %cst_157 = arith.constant dense<0xFF800000> : vector<5xf32>
    %459 = vector.multi_reduction <maximumf>, %458, %cst_157 [0] : vector<5x5xf32> to vector<5xf32>
    %460 = vector.shape_cast %459 : vector<5xf32> to vector<1x5xf32>
    %461 = vector.broadcast %460 : vector<1x5xf32> to vector<5x5xf32>
    %462 = arith.cmpf oge, %458, %461 : vector<5x5xf32>
    %c5_i32_158 = arith.constant 5 : i32
    %463 = vector.broadcast %c5_i32_158 : i32 to vector<5x5xi32>
    %464 = arith.select %462, %387, %463 : vector<5x5xi1>, vector<5x5xi32>
    %cst_159 = arith.constant dense<2147483647> : vector<5xi32>
    %465 = vector.multi_reduction <minsi>, %464, %cst_159 [0] : vector<5x5xi32> to vector<5xi32>
    %466 = vector.shape_cast %465 : vector<5xi32> to vector<1x5xi32>
    %467 = vector.extract_strided_slice %384 {offsets = [4, 0], sizes = [1, 5], strides = [1, 1]} : vector<8x5xf32> to vector<1x5xf32>
    %468 = arith.addf %460, %467 : vector<1x5xf32>
    %469 = vector.broadcast %468 : vector<1x5xf32> to vector<5x5xf32>
    %470 = arith.mulf %391, %469 : vector<5x5xf32>
    %cst_160 = arith.constant dense<0.000000e+00> : vector<5xf32>
    %471 = vector.multi_reduction <add>, %470, %cst_160 [1] : vector<5x5xf32> to vector<5xf32>
    %472 = vector.shape_cast %471 : vector<5xf32> to vector<5x1xf32>
    %473 = vector.broadcast %472 : vector<5x1xf32> to vector<5x5xf32>
    %474 = arith.addf %386, %473 : vector<5x5xf32>
    %cst_161 = arith.constant dense<0xFF800000> : vector<5xf32>
    %475 = vector.multi_reduction <maximumf>, %474, %cst_161 [0] : vector<5x5xf32> to vector<5xf32>
    %476 = vector.shape_cast %475 : vector<5xf32> to vector<1x5xf32>
    %477 = vector.broadcast %476 : vector<1x5xf32> to vector<5x5xf32>
    %478 = arith.cmpf oge, %474, %477 : vector<5x5xf32>
    %c5_i32_162 = arith.constant 5 : i32
    %479 = vector.broadcast %c5_i32_162 : i32 to vector<5x5xi32>
    %480 = arith.select %478, %387, %479 : vector<5x5xi1>, vector<5x5xi32>
    %cst_163 = arith.constant dense<2147483647> : vector<5xi32>
    %481 = vector.multi_reduction <minsi>, %480, %cst_163 [0] : vector<5x5xi32> to vector<5xi32>
    %482 = vector.shape_cast %481 : vector<5xi32> to vector<1x5xi32>
    %483 = vector.extract_strided_slice %384 {offsets = [5, 0], sizes = [1, 5], strides = [1, 1]} : vector<8x5xf32> to vector<1x5xf32>
    %484 = arith.addf %476, %483 : vector<1x5xf32>
    %485 = vector.broadcast %484 : vector<1x5xf32> to vector<5x5xf32>
    %486 = arith.mulf %391, %485 : vector<5x5xf32>
    %cst_164 = arith.constant dense<0.000000e+00> : vector<5xf32>
    %487 = vector.multi_reduction <add>, %486, %cst_164 [1] : vector<5x5xf32> to vector<5xf32>
    %488 = vector.shape_cast %487 : vector<5xf32> to vector<5x1xf32>
    %489 = vector.broadcast %488 : vector<5x1xf32> to vector<5x5xf32>
    %490 = arith.addf %386, %489 : vector<5x5xf32>
    %cst_165 = arith.constant dense<0xFF800000> : vector<5xf32>
    %491 = vector.multi_reduction <maximumf>, %490, %cst_165 [0] : vector<5x5xf32> to vector<5xf32>
    %492 = vector.shape_cast %491 : vector<5xf32> to vector<1x5xf32>
    %493 = vector.broadcast %492 : vector<1x5xf32> to vector<5x5xf32>
    %494 = arith.cmpf oge, %490, %493 : vector<5x5xf32>
    %c5_i32_166 = arith.constant 5 : i32
    %495 = vector.broadcast %c5_i32_166 : i32 to vector<5x5xi32>
    %496 = arith.select %494, %387, %495 : vector<5x5xi1>, vector<5x5xi32>
    %cst_167 = arith.constant dense<2147483647> : vector<5xi32>
    %497 = vector.multi_reduction <minsi>, %496, %cst_167 [0] : vector<5x5xi32> to vector<5xi32>
    %498 = vector.shape_cast %497 : vector<5xi32> to vector<1x5xi32>
    %499 = vector.extract_strided_slice %384 {offsets = [6, 0], sizes = [1, 5], strides = [1, 1]} : vector<8x5xf32> to vector<1x5xf32>
    %500 = arith.addf %492, %499 : vector<1x5xf32>
    %501 = vector.broadcast %500 : vector<1x5xf32> to vector<5x5xf32>
    %502 = arith.mulf %391, %501 : vector<5x5xf32>
    %cst_168 = arith.constant dense<0.000000e+00> : vector<5xf32>
    %503 = vector.multi_reduction <add>, %502, %cst_168 [1] : vector<5x5xf32> to vector<5xf32>
    %504 = vector.shape_cast %503 : vector<5xf32> to vector<5x1xf32>
    %505 = vector.broadcast %504 : vector<5x1xf32> to vector<5x5xf32>
    %506 = arith.addf %386, %505 : vector<5x5xf32>
    %cst_169 = arith.constant dense<0xFF800000> : vector<5xf32>
    %507 = vector.multi_reduction <maximumf>, %506, %cst_169 [0] : vector<5x5xf32> to vector<5xf32>
    %508 = vector.shape_cast %507 : vector<5xf32> to vector<1x5xf32>
    %509 = vector.broadcast %508 : vector<1x5xf32> to vector<5x5xf32>
    %510 = arith.cmpf oge, %506, %509 : vector<5x5xf32>
    %c5_i32_170 = arith.constant 5 : i32
    %511 = vector.broadcast %c5_i32_170 : i32 to vector<5x5xi32>
    %512 = arith.select %510, %387, %511 : vector<5x5xi1>, vector<5x5xi32>
    %cst_171 = arith.constant dense<2147483647> : vector<5xi32>
    %513 = vector.multi_reduction <minsi>, %512, %cst_171 [0] : vector<5x5xi32> to vector<5xi32>
    %514 = vector.shape_cast %513 : vector<5xi32> to vector<1x5xi32>
    %515 = vector.extract_strided_slice %384 {offsets = [7, 0], sizes = [1, 5], strides = [1, 1]} : vector<8x5xf32> to vector<1x5xf32>
    %516 = arith.addf %508, %515 : vector<1x5xf32>
    %517 = vector.broadcast %516 : vector<1x5xf32> to vector<5x5xf32>
    %518 = arith.mulf %391, %517 : vector<5x5xf32>
    %cst_172 = arith.constant dense<0.000000e+00> : vector<5xf32>
    %519 = vector.multi_reduction <add>, %518, %cst_172 [1] : vector<5x5xf32> to vector<5xf32>
    %520 = vector.shape_cast %519 : vector<5xf32> to vector<5x1xf32>
    %521 = vector.broadcast %520 : vector<5x1xf32> to vector<5x5xf32>
    %522 = arith.mulf %391, %521 : vector<5x5xf32>
    %cst_173 = arith.constant dense<0.000000e+00> : vector<5xf32>
    %523 = vector.multi_reduction <add>, %522, %cst_173 [0] : vector<5x5xf32> to vector<5xf32>
    %524 = vector.shape_cast %523 : vector<5xf32> to vector<1x5xf32>
    %525 = vector.extract_strided_slice %385 {offsets = [4, 0], sizes = [1, 5], strides = [1, 1]} : vector<5x5xf32> to vector<1x5xf32>
    %526 = arith.addf %524, %525 : vector<1x5xf32>
    %cst_174 = arith.constant dense<0xFF800000> : vector<1xf32>
    %527 = vector.multi_reduction <maximumf>, %526, %cst_174 [1] : vector<1x5xf32> to vector<1xf32>
    %528 = vector.shape_cast %527 : vector<1xf32> to vector<1x1xf32>
    %529 = vector.broadcast %528 : vector<1x1xf32> to vector<1x5xf32>
    %530 = arith.cmpf oge, %526, %529 : vector<1x5xf32>
    %c5_i32_175 = arith.constant 5 : i32
    %531 = vector.broadcast %c5_i32_175 : i32 to vector<1x5xi32>
    %532 = arith.select %530, %392, %531 : vector<1x5xi1>, vector<1x5xi32>
    %cst_176 = arith.constant dense<2147483647> : vector<1xi32>
    %533 = vector.multi_reduction <minsi>, %532, %cst_176 [1] : vector<1x5xi32> to vector<1xi32>
    %534 = vector.shape_cast %533 : vector<1xi32> to vector<1x1xi32>
    %c7_177 = arith.constant 7 : index
    %c0_178 = arith.constant 0 : index
    %535 = vector.load %arg22[%c7_177, %c0_178] : memref<8x1xi32, #tpu.memory_space<vmem>>, vector<1x1xi32>
    tpu.vector_store %arg22[%c7_177, %c0_178], %534 {strides = array<i32>} : memref<8x1xi32, #tpu.memory_space<vmem>>, vector<1x1xi32>,
    %536 = vector.broadcast %534 : vector<1x1xi32> to vector<1x5xi32>
    %537 = arith.cmpi eq, %392, %536 : vector<1x5xi32>
    %c0_i32 = arith.constant 0 : i32
    %538 = vector.broadcast %c0_i32 : i32 to vector<1x5xi32>
    %539 = arith.select %537, %514, %538 : vector<1x5xi1>, vector<1x5xi32>
    %cst_179 = arith.constant dense<0> : vector<1xi32>
    %540 = vector.multi_reduction <add>, %539, %cst_179 [1] : vector<1x5xi32> to vector<1xi32>
    %541 = vector.shape_cast %540 : vector<1xi32> to vector<1x1xi32>
    %c6_180 = arith.constant 6 : index
    %c0_181 = arith.constant 0 : index
    %542 = vector.load %arg22[%c6_180, %c0_181] : memref<8x1xi32, #tpu.memory_space<vmem>>, vector<1x1xi32>
    tpu.vector_store %arg22[%c6_180, %c0_181], %541 {strides = array<i32>} : memref<8x1xi32, #tpu.memory_space<vmem>>, vector<1x1xi32>,
    %543 = vector.broadcast %541 : vector<1x1xi32> to vector<1x5xi32>
    %544 = arith.cmpi eq, %392, %543 : vector<1x5xi32>
    %c0_i32_182 = arith.constant 0 : i32
    %545 = vector.broadcast %c0_i32_182 : i32 to vector<1x5xi32>
    %546 = arith.select %544, %498, %545 : vector<1x5xi1>, vector<1x5xi32>
    %cst_183 = arith.constant dense<0> : vector<1xi32>
    %547 = vector.multi_reduction <add>, %546, %cst_183 [1] : vector<1x5xi32> to vector<1xi32>
    %548 = vector.shape_cast %547 : vector<1xi32> to vector<1x1xi32>
    %c5_184 = arith.constant 5 : index
    %c0_185 = arith.constant 0 : index
    %549 = vector.load %arg22[%c5_184, %c0_185] : memref<8x1xi32, #tpu.memory_space<vmem>>, vector<1x1xi32>
    tpu.vector_store %arg22[%c5_184, %c0_185], %548 {strides = array<i32>} : memref<8x1xi32, #tpu.memory_space<vmem>>, vector<1x1xi32>,
    %550 = vector.broadcast %548 : vector<1x1xi32> to vector<1x5xi32>
    %551 = arith.cmpi eq, %392, %550 : vector<1x5xi32>
    %c0_i32_186 = arith.constant 0 : i32
    %552 = vector.broadcast %c0_i32_186 : i32 to vector<1x5xi32>
    %553 = arith.select %551, %482, %552 : vector<1x5xi1>, vector<1x5xi32>
    %cst_187 = arith.constant dense<0> : vector<1xi32>
    %554 = vector.multi_reduction <add>, %553, %cst_187 [1] : vector<1x5xi32> to vector<1xi32>
    %555 = vector.shape_cast %554 : vector<1xi32> to vector<1x1xi32>
    %c4_188 = arith.constant 4 : index
    %c0_189 = arith.constant 0 : index
    %556 = vector.load %arg22[%c4_188, %c0_189] : memref<8x1xi32, #tpu.memory_space<vmem>>, vector<1x1xi32>
    tpu.vector_store %arg22[%c4_188, %c0_189], %555 {strides = array<i32>} : memref<8x1xi32, #tpu.memory_space<vmem>>, vector<1x1xi32>,
    %557 = vector.broadcast %555 : vector<1x1xi32> to vector<1x5xi32>
    %558 = arith.cmpi eq, %392, %557 : vector<1x5xi32>
    %c0_i32_190 = arith.constant 0 : i32
    %559 = vector.broadcast %c0_i32_190 : i32 to vector<1x5xi32>
    %560 = arith.select %558, %466, %559 : vector<1x5xi1>, vector<1x5xi32>
    %cst_191 = arith.constant dense<0> : vector<1xi32>
    %561 = vector.multi_reduction <add>, %560, %cst_191 [1] : vector<1x5xi32> to vector<1xi32>
    %562 = vector.shape_cast %561 : vector<1xi32> to vector<1x1xi32>
    %c3_192 = arith.constant 3 : index
    %c0_193 = arith.constant 0 : index
    %563 = vector.load %arg22[%c3_192, %c0_193] : memref<8x1xi32, #tpu.memory_space<vmem>>, vector<1x1xi32>
    tpu.vector_store %arg22[%c3_192, %c0_193], %562 {strides = array<i32>} : memref<8x1xi32, #tpu.memory_space<vmem>>, vector<1x1xi32>,
    %564 = vector.broadcast %562 : vector<1x1xi32> to vector<1x5xi32>
    %565 = arith.cmpi eq, %392, %564 : vector<1x5xi32>
    %c0_i32_194 = arith.constant 0 : i32
    %566 = vector.broadcast %c0_i32_194 : i32 to vector<1x5xi32>
    %567 = arith.select %565, %450, %566 : vector<1x5xi1>, vector<1x5xi32>
    %cst_195 = arith.constant dense<0> : vector<1xi32>
    %568 = vector.multi_reduction <add>, %567, %cst_195 [1] : vector<1x5xi32> to vector<1xi32>
    %569 = vector.shape_cast %568 : vector<1xi32> to vector<1x1xi32>
    %c2_196 = arith.constant 2 : index
    %c0_197 = arith.constant 0 : index
    %570 = vector.load %arg22[%c2_196, %c0_197] : memref<8x1xi32, #tpu.memory_space<vmem>>, vector<1x1xi32>
    tpu.vector_store %arg22[%c2_196, %c0_197], %569 {strides = array<i32>} : memref<8x1xi32, #tpu.memory_space<vmem>>, vector<1x1xi32>,
    %571 = vector.broadcast %569 : vector<1x1xi32> to vector<1x5xi32>
    %572 = arith.cmpi eq, %392, %571 : vector<1x5xi32>
    %c0_i32_198 = arith.constant 0 : i32
    %573 = vector.broadcast %c0_i32_198 : i32 to vector<1x5xi32>
    %574 = arith.select %572, %434, %573 : vector<1x5xi1>, vector<1x5xi32>
    %cst_199 = arith.constant dense<0> : vector<1xi32>
    %575 = vector.multi_reduction <add>, %574, %cst_199 [1] : vector<1x5xi32> to vector<1xi32>
    %576 = vector.shape_cast %575 : vector<1xi32> to vector<1x1xi32>
    %c1_200 = arith.constant 1 : index
    %c0_201 = arith.constant 0 : index
    %577 = vector.load %arg22[%c1_200, %c0_201] : memref<8x1xi32, #tpu.memory_space<vmem>>, vector<1x1xi32>
    tpu.vector_store %arg22[%c1_200, %c0_201], %576 {strides = array<i32>} : memref<8x1xi32, #tpu.memory_space<vmem>>, vector<1x1xi32>,
    %578 = vector.broadcast %576 : vector<1x1xi32> to vector<1x5xi32>
    %579 = arith.cmpi eq, %392, %578 : vector<1x5xi32>
    %c0_i32_202 = arith.constant 0 : i32
    %580 = vector.broadcast %c0_i32_202 : i32 to vector<1x5xi32>
    %581 = arith.select %579, %418, %580 : vector<1x5xi1>, vector<1x5xi32>
    %cst_203 = arith.constant dense<0> : vector<1xi32>
    %582 = vector.multi_reduction <add>, %581, %cst_203 [1] : vector<1x5xi32> to vector<1xi32>
    %583 = vector.shape_cast %582 : vector<1xi32> to vector<1x1xi32>
    %c0_204 = arith.constant 0 : index
    %c0_205 = arith.constant 0 : index
    %584 = vector.load %arg22[%c0_204, %c0_205] : memref<8x1xi32, #tpu.memory_space<vmem>>, vector<1x1xi32>
    tpu.vector_store %arg22[%c0_204, %c0_205], %583 {strides = array<i32>} : memref<8x1xi32, #tpu.memory_space<vmem>>, vector<1x1xi32>,
    %cst_206 = arith.constant 0.000000e+00 : f32
    %585 = vector.broadcast %cst_206 : f32 to vector<8x1xf32>
    %586 = vector.broadcast %528 : vector<1x1xf32> to vector<8x1xf32>
    %587 = arith.addf %585, %586 : vector<8x1xf32>
    %c0_207 = arith.constant 0 : index
    %c0_208 = arith.constant 0 : index
    %588 = vector.load %arg23[%c0_207, %c0_208] : memref<8x1xf32, #tpu.memory_space<vmem>>, vector<8x1xf32>
    tpu.vector_store %arg23[%c0_207, %c0_208], %587 {strides = array<i32>} : memref<8x1xf32, #tpu.memory_space<vmem>>, vector<8x1xf32>,
    return
  }
  func.func @transform_0(%arg0: i32) -> (i32, i32) {
    %c0_i32 = arith.constant 0 : i32
    %c0_i32_0 = arith.constant 0 : i32
    return %arg0, %c0_i32 : i32, i32
  }
  func.func @transform_1(%arg0: i32) -> (i32, i32) {
    %c0_i32 = arith.constant 0 : i32
    %c0_i32_0 = arith.constant 0 : i32
    %c0_i32_1 = arith.constant 0 : i32
    return %c0_i32, %c0_i32_0 : i32, i32
  }
  func.func @transform_2(%arg0: i32) -> (i32, i32) {
    %c0_i32 = arith.constant 0 : i32
    %c0_i32_0 = arith.constant 0 : i32
    %c0_i32_1 = arith.constant 0 : i32
    return %c0_i32, %c0_i32_0 : i32, i32
  }
  func.func @transform_3(%arg0: i32) -> (i32, i32) {
    %c0_i32 = arith.constant 0 : i32
    %c0_i32_0 = arith.constant 0 : i32
    %c0_i32_1 = arith.constant 0 : i32
    return %c0_i32, %c0_i32_0 : i32, i32
  }
  func.func @transform_4(%arg0: i32) -> (i32, i32) {
    %c0_i32 = arith.constant 0 : i32
    %c0_i32_0 = arith.constant 0 : i32
    %c0_i32_1 = arith.constant 0 : i32
    return %c0_i32, %c0_i32_0 : i32, i32
  }
  func.func @transform_5(%arg0: i32) -> (i32, i32) {
    %c0_i32 = arith.constant 0 : i32
    %c0_i32_0 = arith.constant 0 : i32
    %c0_i32_1 = arith.constant 0 : i32
    return %c0_i32, %c0_i32_0 : i32, i32
  }
  func.func @transform_6(%arg0: i32) -> (i32, i32) {
    %c0_i32 = arith.constant 0 : i32
    %c0_i32_0 = arith.constant 0 : i32
    %c0_i32_1 = arith.constant 0 : i32
    return %c0_i32, %c0_i32_0 : i32, i32
  }
  func.func @transform_7(%arg0: i32) -> (i32, i32) {
    %c0_i32 = arith.constant 0 : i32
    %c0_i32_0 = arith.constant 0 : i32
    %c0_i32_1 = arith.constant 0 : i32
    return %c0_i32, %c0_i32_0 : i32, i32
  }
  func.func @transform_8(%arg0: i32) -> (i32, i32) {
    %c0_i32 = arith.constant 0 : i32
    %c0_i32_0 = arith.constant 0 : i32
    %c0_i32_1 = arith.constant 0 : i32
    return %c0_i32, %c0_i32_0 : i32, i32
  }
  func.func @transform_9(%arg0: i32) -> (i32, i32) {
    %c0_i32 = arith.constant 0 : i32
    %c0_i32_0 = arith.constant 0 : i32
    %c0_i32_1 = arith.constant 0 : i32
    return %c0_i32, %c0_i32_0 : i32, i32
  }
  func.func @transform_10(%arg0: i32) -> (i32, i32) {
    %c0_i32 = arith.constant 0 : i32
    %c0_i32_0 = arith.constant 0 : i32
    %c0_i32_1 = arith.constant 0 : i32
    return %c0_i32, %c0_i32_0 : i32, i32
  }
  func.func @transform_11(%arg0: i32) -> (i32, i32) {
    %c0_i32 = arith.constant 0 : i32
    %c0_i32_0 = arith.constant 0 : i32
    %c0_i32_1 = arith.constant 0 : i32
    return %c0_i32, %c0_i32_0 : i32, i32
  }
  func.func @transform_12(%arg0: i32) -> (i32, i32) {
    %c0_i32 = arith.constant 0 : i32
    %c0_i32_0 = arith.constant 0 : i32
    %c0_i32_1 = arith.constant 0 : i32
    return %c0_i32, %c0_i32_0 : i32, i32
  }
  func.func @transform_13(%arg0: i32) -> (i32, i32) {
    %c0_i32 = arith.constant 0 : i32
    %c0_i32_0 = arith.constant 0 : i32
    %c0_i32_1 = arith.constant 0 : i32
    return %c0_i32, %c0_i32_0 : i32, i32
  }
  func.func @transform_14(%arg0: i32) -> (i32, i32) {
    %c0_i32 = arith.constant 0 : i32
    %c0_i32_0 = arith.constant 0 : i32
    %c0_i32_1 = arith.constant 0 : i32
    return %c0_i32, %c0_i32_0 : i32, i32
  }
  func.func @transform_15(%arg0: i32) -> (i32, i32) {
    %c0_i32 = arith.constant 0 : i32
    %c0_i32_0 = arith.constant 0 : i32
    %c0_i32_1 = arith.constant 0 : i32
    return %c0_i32, %c0_i32_0 : i32, i32
  }
  func.func @transform_16(%arg0: i32) -> (i32, i32) {
    %c0_i32 = arith.constant 0 : i32
    %c0_i32_0 = arith.constant 0 : i32
    %c0_i32_1 = arith.constant 0 : i32
    return %c0_i32, %c0_i32_0 : i32, i32
  }
  func.func @transform_17(%arg0: i32) -> (i32, i32) {
    %c0_i32 = arith.constant 0 : i32
    %c0_i32_0 = arith.constant 0 : i32
    %c0_i32_1 = arith.constant 0 : i32
    return %c0_i32, %c0_i32_0 : i32, i32
  }
  func.func @transform_18(%arg0: i32) -> (i32, i32) {
    %c0_i32 = arith.constant 0 : i32
    %c0_i32_0 = arith.constant 0 : i32
    %c0_i32_1 = arith.constant 0 : i32
    return %c0_i32, %c0_i32_0 : i32, i32
  }
  func.func @transform_19(%arg0: i32) -> (i32, i32) {
    %c0_i32 = arith.constant 0 : i32
    %c0_i32_0 = arith.constant 0 : i32
    %c0_i32_1 = arith.constant 0 : i32
    return %c0_i32, %c0_i32_0 : i32, i32
  }
  func.func @transform_20(%arg0: i32) -> (i32, i32) {
    %c0_i32 = arith.constant 0 : i32
    %c0_i32_0 = arith.constant 0 : i32
    return %arg0, %c0_i32 : i32, i32
  }
  func.func @transform_21(%arg0: i32) -> (i32, i32) {
    %c0_i32 = arith.constant 0 : i32
    %c0_i32_0 = arith.constant 0 : i32
    return %arg0, %c0_i32 : i32, i32
  }
  func.func @transform_22(%arg0: i32) -> (i32, i32) {
    %c0_i32 = arith.constant 0 : i32
    %c0_i32_0 = arith.constant 0 : i32
    return %arg0, %c0_i32 : i32, i32
  }
}

</mosaic_0001>

<bundles_post_ra>
// kernel: tpu_custom_call.1
= control target key start
LH: loop header
LB: loop body
LE: loop exit
PB: predicated region body
PF: predicated region fallthrough
CT: control target
= control target key end

     0   :  { %s7841_s0 = inlined_call_operand.vmem [shape: s32[16,1], index: 0, kind: input, shape index: {}]   ;;  %s7842_s1 = inlined_call_operand.vmem [shape: f32[20,16], index: 1, kind: input, shape index: {}]   ;;  %s7843_s2 = inlined_call_operand.hbm [shape: f32[16,128], index: 2, kind: input, shape index: {}]   ;;  %s7844_s3 = inlined_call_operand.hbm [shape: f32[16,128], index: 3, kind: input, shape index: {}]   ;;  %s7845_s4 = inlined_call_operand.hbm [shape: f32[1,128], index: 4, kind: input, shape index: {}]   ;;  %s7846_s5 = inlined_call_operand.vmem [shape: f32[32,32], index: 5, kind: input, shape index: {}]   ;;  %s7847_s6 = inlined_call_operand.vmem [shape: f32[32,32], index: 6, kind: input, shape index: {}]   ;;  %s7848_s7 = inlined_call_operand.vmem [shape: f32[32,32], index: 7, kind: input, shape index: {}]   ;;  %s7849_s8 = inlined_call_operand.hbm [shape: f32[32,32], index: 8, kind: input, shape index: {}]   ;;  %s7850_s9 = inlined_call_operand.hbm [shape: f32[32,32], index: 9, kind: input, shape index: {}]   ;;  %s7851_s10 = inlined_call_operand.vmem [shape: f32[1,32], index: 10, kind: input, shape index: {}]   ;;  %s7852_s11 = inlined_call_operand.vmem [shape: f32[48,32], index: 11, kind: input, shape index: {}]   ;;  %s7853_s12 = inlined_call_operand.vmem [shape: f32[1,32], index: 12, kind: input, shape index: {}]   ;;  %s7854_s13 = inlined_call_operand.vmem [shape: f32[48,32], index: 13, kind: input, shape index: {}]   ;;  %s7855_s14 = inlined_call_operand.vmem [shape: f32[1,32], index: 14, kind: input, shape index: {}]   ;;  %s7856_s15 = inlined_call_operand.vmem [shape: f32[64,128], index: 15, kind: input, shape index: {}]   ;;  %s7857_s16 = inlined_call_operand.vmem [shape: f32[1,128], index: 16, kind: input, shape index: {}]   ;;  %s7858_s17 = inlined_call_operand.vmem [shape: f32[8,8], index: 17, kind: input, shape index: {}]   ;;  %s7859_s18 = inlined_call_operand.vmem [shape: f32[5,5], index: 18, kind: input, shape index: {}]   ;;  %s7860_s19 = inlined_call_operand.vmem [shape: f32[5,5], index: 19, kind: input, shape index: {}]   ;;  %s7861_s20 = inlined_call_operand.hbm [shape: f32[16,128], index: 20, kind: output, shape index: {0}]   ;;  %s7862_s21 = inlined_call_operand.vmem [shape: s32[16,1], index: 21, kind: output, shape index: {1}]   ;;  %s7863_s22 = inlined_call_operand.vmem [shape: f32[16,1], index: 22, kind: output, shape index: {2}]  }
   0x1   :  { %7884 = sst [smem:[#allocation24_spill]] %s7841_s0 }
   0x2   :  { %7885 = sst [smem:[#allocation25_spill]] %s7842_s1 }
   0x3   :  { %7886 = sst [smem:[#allocation26_spill]] %s7843_s2 }
   0x4   :  { %7887 = sst [smem:[#allocation27_spill]] %s7844_s3 }
   0x5   :  { %7888 = sst [smem:[#allocation28_spill]] %s7845_s4 }
   0x6   :  { %7889 = sst [smem:[#allocation29_spill]] %s7846_s5 }
   0x7   :  { %7890 = sst [smem:[#allocation30_spill]] %s7847_s6 }
   0x8   :  { %7891 = sst [smem:[#allocation31_spill]] %s7849_s8 }
   0x9   :  { %7892 = sst [smem:[#allocation32_spill]] %s7857_s16 }
   0xa   :  { %7893 = sst [smem:[#allocation33_spill]] %s7859_s18 }
   0xb   :  { %7894 = sst [smem:[#allocation34_spill]] %s7860_s19 }
   0xc   :  { %7895 = sst [smem:[#allocation35_spill]] %s7861_s20 }
   0xd   :  { %7896 = sst [smem:[#allocation36_spill]] %s7862_s21 }
   0xe   :  { %7897 = sst [smem:[#allocation37_spill]] %s7863_s22 }
   0xf   :  { %28 = vsyncpa [#allocation4], 0 }
  0x10   :  { %29 = vsyncpa [#allocation7], 0 }
  0x11   :  { %30 = vsyncpa [#allocation10], 0 }
  0x12   :  { %31 = vsyncpa [#allocation5], 0 }
  0x13   :  { %33 = vsyncpa [#allocation5 + $0x1], 0  ;;  %s6797_s3 = smov 0   ;;  %s6799_s28 = smov 0  }
  0x14   :  { %s6801_s29 = smov 0   ;;  %s6803_s30 = smov 0  }
  0x15 LB: > { %7898 = sst [smem:[#allocation17_spill]] %s6652_s3  ;;  %s6818_s4 = sadd.s32 4294967295, %s6664_s30   ;;  %s6664_s30 = sphi %s6803_s30, %s7939_s30   ;;  %s6660_s29 = sphi %s6801_s29, %s7944_s29   ;;  %s6656_s28 = sphi %s6799_s28, %s7943_s28   ;;  %s6652_s3 = sphi %s6797_s3, %s7942_s3  }
  0x16   : > { %7899 = sst [smem:[#allocation18_spill]] %s6660_s29  ;;  %s5217_s0 = sadd.s32 4294967294, %s6664_s30  }
  0x17   : > { %7900 = sst [smem:[#allocation19_spill]] %s6664_s30  ;;  %s6822_s23 = sadd.s32 1, %s6664_s30  }
  0x18   : > { %7901 = sst [smem:[#allocation20_spill]] %s6822_s23  ;;  %s471_s1 = sadd.s32 1, %s6660_s29 }
  0x19   : > { %s468_s5 = ssub.s32 %s6664_s30, %s6822_s23  ;;  %p481_p0 = scmp.ne.s32.totalorder %s6660_s29, %s6656_s28 }
  0x1a   : > { %p469_p1 = scmp.eq.s32.totalorder %s468_s5, 0  ;;  %p482_p2 = scmp.eq.s32.totalorder %s6818_s4, 1 }
  0x1b   : > { %p487_p3 = scmp.ne.s32.totalorder %s6656_s28, %s6652_s3  ;;  %p488_p4 = scmp.eq.s32.totalorder %s5217_s0, 1 }
  0x1c   : > { %s6833_s24 = scalar_select %p469_p1, %s6660_s29, %s471_s1  }
  0x1d   : > { %p6835_p5 = por %p482_p2, %p481_p0  ;;  %p6839_p6 = por %p488_p4, %p487_p3 }
  0x1e   : > { %7902 = sst [smem:[#allocation21_spill]] %s6833_s24  ;;  %p5218_p7 = scmp.ge.s32.totalorder %s6664_s30, 1 }
  0x1f   : > { %s7903_s6 = scalar_select %p6835_p5, 1, 0 }
  0x20   : > { %s7905_s25 = scalar_select %p6839_p6, 1, 0 }
  0x21   : > { %7904 = sst [smem:[#allocation22_spill]] %s7903_s6  ;;  %p547_p8 = scmp.lt.s32.totalorder %s6664_s30, 3 }
  0x22   : > { %7906 = sst [smem:[#allocation23_spill]] %s7905_s25  ;;  %p7879_p9 = scmp.eq.s32.totalorder %s6818_s4, 0 }
  0x23   : > { %p6846_p10 = pnand %p5218_p7, %p547_p8  ;;  %s6666_s2 = smov [#allocation6]  }
  0x24   : > { %s575_s27 = sshll.u32 %s6666_s2, 4  ;;  %s6667_s1 = smov [#allocation9]   ;;  %s6852_s27 = int_to_ptr.vmem [resolvable:$true] %s575_s27 }
  0x25   : > { %s7907_s26 = scalar_select %p6846_p10, 1, 0 }
  0x26   : > { %p6239_p11 = pneg %p6846_p10  ;;  %s608_s5 = sshll.u32 %s6667_s1, 4  ;;  %s6860_s5 = int_to_ptr.vmem [resolvable:$true] %s608_s5 }
  0x27   : > { %s6668_s24 = smov [#allocation3]   ;;  %s7909_s3 = sld [smem:[#allocation27_spill]] }
  0x28   : > { %p6856_p12 = pnand %p7879_p9, %p6239_p11  ;;  %s6862_s29 = sshll.u32 %s6668_s24, 4  ;;  %s563_s29 = int_to_ptr.vmem [resolvable:$true] %s6862_s29 }
  0x2a   : > { %p6872_p0 = pneg %p6856_p12 }
  0x2d   : > { %s7910_s20 = smov %s7909_s3  ;;  %s6450_s30 = scalar_lea.hbm %s7909_s3, 256 }
  0x2e   : > { %p6451_p13 = scmp.ne.s32.totalorder %s7910_s20, %s6450_s30  ;;  %p6457_p3 = scmp.lt.u32.totalorder %s6450_s30, %s7910_s20 }
  0x30   : > { %p6453_p1 = pnand %p6872_p0, %p6451_p13 }
  0x32   : > { %p6454_p2 = pneg %p6453_p1 }
  0x34   : > { %p6459_p4 = pnand %p6457_p3, %p6454_p2 }
  0x36   : > { %6462 = shalt.err (!%p6459_p4)
}
  0x37   : > { %s6463_s3 = scalar_lea.vmem %s6852_s27, 256  ;;  %p6471_p9 = scmp.lt.s32.totalorder %s6852_s27, %s6852_s27 }
  0x38   : > { %p6464_p7 = scmp.ne.s32.totalorder %s6852_s27, %s6463_s3  ;;  %p6472_p6 = scmp.lt.s32.totalorder %s6463_s3, %s6463_s3 }
  0x3a   : > { %p6466_p8 = pnand %p6464_p7, %p6872_p0  ;;  %p6473_p13 = por %p6472_p6, %p6471_p9 }
  0x3c   : > { %p6467_p11 = pneg %p6466_p8 }
  0x3e   : > { %p6474_p1 = pnand %p6473_p13, %p6467_p11 }
  0x40   : > { %6477 = shalt.err (!%p6474_p1)
}
  0x41   : > { %s6669_s23 = smov 128   ;;  %s6670_s30 = smov 8  }
  0x42   : > { %6245 = dma.hbm_to_vmem [thread:$0]  (!%p6856_p12), %s7910_s20, 256, %s6852_s27, [#allocation7], %s6669_s23, %s6669_s23, %s6670_s30  }
  0x43   : > { %s7912_s8 = sld [smem:[#allocation31_spill]] }
  0x49   : > { %s6478_s24 = scalar_lea.hbm %s7912_s8, 512 }
  0x4a   : > { %p6479_p6 = scmp.ne.s32.totalorder %s7912_s8, %s6478_s24  ;;  %p6485_p3 = scmp.lt.u32.totalorder %s6478_s24, %s7912_s8 }
  0x4c   : > { %p6481_p9 = pnand %p6479_p6, %p6872_p0 }
  0x4e   : > { %p6482_p2 = pneg %p6481_p9 }
  0x50   : > { %p6487_p4 = pnand %p6485_p3, %p6482_p2 }
  0x52   : > { %6490 = shalt.err (!%p6487_p4)
}
  0x53   : > { %s6491_s27 = scalar_lea.vmem %s6860_s5, 512  ;;  %p6499_p13 = scmp.lt.s32.totalorder %s6860_s5, %s6860_s5 }
  0x54   : > { %p6492_p7 = scmp.ne.s32.totalorder %s6860_s5, %s6491_s27  ;;  %p6500_p1 = scmp.lt.s32.totalorder %s6491_s27, %s6491_s27 }
  0x56   : > { %p6494_p8 = pnand %p6492_p7, %p6872_p0  ;;  %p6501_p6 = por %p6500_p1, %p6499_p13 }
  0x58   : > { %p6495_p11 = pneg %p6494_p8 }
  0x5a   : > { %p6502_p9 = pnand %p6501_p6, %p6495_p11 }
  0x5c   : > { %6505 = shalt.err (!%p6502_p9)
}
  0x5d   : > { %6251 = dma.hbm_to_vmem [thread:$0]  (!%p6856_p12), %s7912_s8, 512, %s6860_s5, [#allocation10], %s6669_s23, %s6669_s23, %s6670_s30  }
  0x5e   : > { %s7913_s25 = sld [smem:[#allocation26_spill]] }
  0x64   : > { %s6506_s2 = scalar_lea.hbm %s7913_s25, 256 }
  0x65   : > { %p6507_p2 = scmp.ne.s32.totalorder %s7913_s25, %s6506_s2  ;;  %p6513_p7 = scmp.lt.u32.totalorder %s6506_s2, %s7913_s25 }
  0x67   : > { %p6509_p3 = pnand %p6507_p2, %p6872_p0 }
  0x69   : > { %p6510_p4 = pneg %p6509_p3 }
  0x6b   : > { %p6515_p8 = pnand %p6513_p7, %p6510_p4 }
  0x6d   : > { %6518 = shalt.err (!%p6515_p8)
}
  0x6e   : > { %s6519_s16 = scalar_lea.vmem %s563_s29, 256  ;;  %p6527_p6 = scmp.lt.s32.totalorder %s563_s29, %s563_s29 }
  0x6f   : > { %p6520_p11 = scmp.ne.s32.totalorder %s563_s29, %s6519_s16  ;;  %p6528_p9 = scmp.lt.s32.totalorder %s6519_s16, %s6519_s16 }
  0x71   : > { %p6522_p13 = pnand %p6520_p11, %p6872_p0  ;;  %p6529_p5 = por %p6528_p9, %p6527_p6 }
  0x73   : > { %p6523_p1 = pneg %p6522_p13 }
  0x75   : > { %p6530_p10 = pnand %p6529_p5, %p6523_p1 }
  0x77   : > { %6533 = shalt.err (!%p6530_p10)
}
  0x78   : > { %6242 = dma.hbm_to_vmem [thread:$0]  (!%p6856_p12), %s7913_s25, 256, %s563_s29, [#allocation4], %s6669_s23, %s6669_s23, %s6670_s30  }
  0x79   : > { %s6671_s22 = smov [#allocation8]   ;;  %s6672_s2 = smov [#allocation11]  }
  0x7a   : > { %s589_s6 = sshll.u32 %s6671_s22, 4  ;;  %s621_s1 = sshll.u32 %s6672_s2, 4  ;;  %s590_s6 = int_to_ptr.vmem [resolvable:$true] %s589_s6  ;;  %s622_s1 = int_to_ptr.vmem [resolvable:$true] %s621_s1 }
  0x7b   : > { %s7914_s27 = sld [smem:[#allocation28_spill]] }
  0x81   : > { %s6534_s16 = scalar_lea.hbm %s7914_s27, 16 }
  0x82   : > { %p6535_p5 = scmp.ne.s32.totalorder %s7914_s27, %s6534_s16  ;;  %p6541_p3 = scmp.lt.u32.totalorder %s6534_s16, %s7914_s27 }
  0x84   : > { %p6537_p10 = pnand %p6535_p5, %p6872_p0 }
  0x86   : > { %p6538_p2 = pneg %p6537_p10 }
  0x88   : > { %p6543_p4 = pnand %p6541_p3, %p6538_p2 }
  0x8a   : > { %6546 = shalt.err (!%p6543_p4)
}
  0x8b   : > { %s6547_s29 = scalar_lea.vmem %s590_s6, 16  ;;  %s6554_s18 = scalar_lea.vmem %s590_s6, 32 }
  0x8c   : > { %p6548_p7 = scmp.ne.s32.totalorder %s590_s6, %s6547_s29  ;;  %p6555_p13 = scmp.lt.s32.totalorder %s590_s6, %s590_s6 }
  0x8d   : > { %p6556_p1 = scmp.lt.s32.totalorder %s6554_s18, %s6547_s29 }
  0x8e   : > { %p6550_p8 = pnand %p6548_p7, %p6872_p0 }
  0x8f   : > { %p6557_p6 = por %p6556_p1, %p6555_p13 }
  0x90   : > { %p6551_p11 = pneg %p6550_p8 }
  0x92   : > { %p6558_p9 = pnand %p6557_p6, %p6551_p11 }
  0x94   : > { %6561 = shalt.err (!%p6558_p9)
}
  0x95   : > { %6248 = dma.hbm_to_vmem [thread:$0]  (!%p6856_p12), %s7914_s27, 16, %s590_s6, [#allocation7]  }
  0x96   : > { %s6562_s2 = scalar_lea.hbm %s7850_s9, 512 }
  0x97   : > { %p6563_p5 = scmp.ne.s32.totalorder %s7850_s9, %s6562_s2  ;;  %p6569_p3 = scmp.lt.u32.totalorder %s6562_s2, %s7850_s9 }
  0x99   : > { %p6565_p10 = pnand %p6563_p5, %p6872_p0 }
  0x9b   : > { %p6566_p2 = pneg %p6565_p10 }
  0x9d   : > { %p6571_p4 = pnand %p6569_p3, %p6566_p2 }
  0x9f   : > { %6574 = shalt.err (!%p6571_p4)
}
  0xa0   : > { %s6575_s29 = scalar_lea.vmem %s622_s1, 512  ;;  %p6583_p13 = scmp.lt.s32.totalorder %s622_s1, %s622_s1 }
  0xa1   : > { %p6576_p7 = scmp.ne.s32.totalorder %s622_s1, %s6575_s29  ;;  %p6584_p1 = scmp.lt.s32.totalorder %s6575_s29, %s6575_s29 }
  0xa3   : > { %p6578_p8 = pnand %p6576_p7, %p6872_p0  ;;  %p6585_p6 = por %p6584_p1, %p6583_p13 }
  0xa5   : > { %p6579_p11 = pneg %p6578_p8 }
  0xa7   : > { %p6586_p9 = pnand %p6585_p6, %p6579_p11 }
  0xa9   : > { %6589 = shalt.err (!%p6586_p9)
}
  0xaa   : > { %6254 = dma.hbm_to_vmem [thread:$0]  (!%p6856_p12), %s7850_s9, 512, %s622_s1, [#allocation10], %s6669_s23, %s6669_s23, %s6670_s30  }
  0xab   : > { %p7915_p5 = scmp.ne.s32.totalorder %s7907_s26, 0 }
  0xac   : > { %p7916_p0 = scmp.eq.s32.totalorder (!%p7915_p5), %s6818_s4, 0 }
  0xad   : > { %674 = sbr.rel (%p7915_p5) target bundleno = 11261 (0x2bfd), region = 100 }
  0xb4   : > { %6635 = dma.done.wait (%p7916_p0), [#allocation4], 256   ;;  %p7917_p10 = pmov %p7916_p0 }
  0xb5   : > { %p7918_p2 = pmov %p7916_p0 }
  0xb6   : > { %6637 = vsyncadd (%p7917_p10), [#allocation4], 4294967040 }
  0xb7   : > { %6639 = dma.done.wait (%p7918_p2), [#allocation7], 272   ;;  %p7919_p3 = pmov %p7916_p0 }
  0xb8   : > { %p7920_p4 = pmov %p7916_p0 }
  0xb9   : > { %6641 = vsyncadd (%p7919_p3), [#allocation7], 4294967024 }
  0xba   : > { %6643 = dma.done.wait (%p7920_p4), [#allocation10], 1024   ;;  %p7921_p12 = pmov %p7916_p0 }
  0xbb   : > { %p759_p7 = scmp.lt.s32.totalorder %s6818_s4, 1  ;;  %v6673_v0 = vmov 0   ;;  %v6674_v1 = vmov 0.0|0.0   ;;  %v6675_v2 = vmov 0.0   ;;  %s7922_s30 = sld [smem:[#allocation24_spill]]  ;;  %vm6676_vm0 = vmmov 0  }
  0xbc   : > { %6645 = vsyncadd (%p7921_p12), [#allocation10], 4294966272  ;;  %6317 = vset.pattern.permute.xlu0 %v6673_v0  ;;  %5980 = vmatprep.subr.bf16.mxu0 %v6674_v1  ;;  %s7923_s19 = sld [smem:[#allocation25_spill]]  ;;  %vm787_vm1 = vcmask 1043456   ;;  %v772_v8 = vlaneseq  ;;  %v941_v10 = vld [vmem:[#allocation3] sm:$0xff]  ;;  %v942_v11 = vld [vmem:[#allocation3 + $0x8] sm:$0xff] }
  0xbd   : > { %s760_s21 = scalar_select %p759_p7, %s6818_s4, 1  ;;  %5530 = vmatprep.subr.mxu1 %v6675_v2  ;;  %5527 = vmatprep.mubr.msk.f32.mxu0 %vm6676_vm0, %v6675_v2  ;;  %vm783_vm2 = vcmask 162816   ;;  %v5987_v13 = vpack.c.bf16 %v942_v11, %v941_v10  ;;  %v943_v17 = vld [vmem:[#allocation6] sm:$0xff]  ;;  %v944_v18 = vld [vmem:[#allocation6 + $0x8] sm:$0xff]  ;;  %vm945_vm5 = vcmask 130048   ;;  %vm867_vm6 = vcmask 64512  }
  0xbe   : > { %5532 = vmatprep.mubr.msk.f32.mxu1 %vm6676_vm0, %v6675_v2  ;;  %v7022_v9 = vand.u32 127, %v772_v8  ;;  %v7029_v15 = vshrl.u32 %v772_v8, 7  ;;  %v5984_v20 = vpack.c.bf16 %v944_v18, %v943_v17  ;;  %s7924_s29 = sld [smem:[#allocation30_spill]]  ;;  %v1112_v29 = vld [vmem:[#allocation9] sm:$0xff]  ;;  %v1113_v30 = vld [vmem:[#allocation9 + $0x8] sm:$0xff]  ;;  %v1114_v32 = vld [vmem:[#allocation9 + $0x10] sm:$0xff] }
  0xbf   : > { %s7001_s26 = sshll.u32 %s760_s21, 3  ;;  %v7065_v31 = vpack.c.bf16 %v1113_v30, %v1112_v29  ;;  %v1115_v33 = vld [vmem:[#allocation9 + $0x18] sm:$0xff]  ;;  %s7926_s22 = sld [smem:[#allocation29_spill]]  ;;  %v1109_v46 = vld [vmem:[%s7848_s7 + $0x8] sm:$0xff]  ;;  %v1110_v48 = vld [vmem:[%s7848_s7 + $0x10] sm:$0xff]  ;;  %vm1116_vm7 = vcmask 261120  }
  0xc0   : > { %v863_v16 = vadd.s32 %v7029_v15, %v7022_v9  ;;  %v7070_v34 = vpack.c.bf16 %v1115_v33, %v1114_v32  ;;  %v1108_v45 = vld [vmem:[%s7848_s7] sm:$0xff]  ;;  %v1111_v49 = vld [vmem:[%s7848_s7 + $0x18] sm:$0xff]  ;;  %s6677_s2 = smov 64   ;;  %s6678_s24 = smov 32   ;;  %vm1456_vm8 = vcmask 122880   ;;  %vm1458_vm9 = vcmask 254080  }
  0xc1   : > { %s762_s1 = scalar_lea.vmem %s7922_s30, %s7001_s26  ;;  %v7112_v47 = vpack.c.bf16 %v1109_v46, %v1108_v45  ;;  %v7123_v50 = vpack.c.bf16 %v1111_v49, %v1110_v48  ;;  %v5242_v62 = vld [vmem:[#allocation8] ss:$0 sm:$0xff]  ;;  %s6679_s3 = smov 96   ;;  %vm1807_vm10 = vcmask 123905   ;;  %vm1809_vm11 = vcmask 255105  }
  0xc2   : > { %v771_v3 = vld [vmem:[%s762_s1] sm:$0xff]  ;;  %v781_v5 = vld [vmem:[%s7923_s19 + $0x8] sm:$0xff]  ;;  %v782_v7 = vld [vmem:[%s7923_s19 + $0x10] sm:$0xf]  ;;  %vm864_vm4 = vcmp.eq.s32.totalorder %v863_v16, 7  ;;  %vm2515_vm12 = vcmask 125955  }
  0xc3   : > { %v780_v4 = vld [vmem:[%s7923_s19] sm:$0xff]  ;;  %775 = vperm.xlu0 %6317, %v771_v3   ;;  %v5238_v19 = vsel %vm864_vm4, 1.0, %v6675_v2  ;;  %vm2517_vm13 = vcmask 257155   ;;  %vm2161_vm14 = vcmask 124930   ;;  %vm2163_vm15 = vcmask 256130   ;;  %s7927_s1 = sld [smem:[#allocation34_spill]] }
  0xc4   : > { %v5981_v6 = vpack.c.bf16 %v781_v5, %v780_v4  ;;  %s7925_s6 = smov %s7924_s29  ;;  %v1104_v23 = vld [vmem:[%s7924_s29] sm:$0xff]  ;;  %vm2871_vm4 = vcmask 258180   ;;  %s744_s8 = sand.u32 1, %s6656_s28  }
  0xc5   : > { %v1105_v24 = vld [vmem:[%s7925_s6 + $0x8] sm:$0xff]  ;;  %v1106_v25 = vld [vmem:[%s7925_s6 + $0x10] sm:$0xff]  ;;  %v1107_v27 = vld [vmem:[%s7925_s6 + $0x18] sm:$0xff]  ;;  %s7602_s20 = sshll.u32 %s744_s8, 3  ;;  %s7929_s18 = sld [smem:[#allocation33_spill]] }
  0xc6   : > { %5982 = vmatpush3.bf16.msra.mxu0 %v5981_v6  ;;  %v7055_v26 = vpack.c.bf16 %v1105_v24, %v1104_v23  ;;  %v7061_v28 = vpack.c.bf16 %v1107_v27, %v1106_v25  ;;  %v1100_v35 = vld [vmem:[%s7926_s22] sm:$0xff]  ;;  %v1101_v36 = vld [vmem:[%s7926_s22 + $0x8] sm:$0xff]  ;;  %v1102_v39 = vld [vmem:[%s7926_s22 + $0x10] sm:$0xff]  ;;  %s746_s16 = scalar_lea.vmem [#allocation12], %s7602_s20  ;;  %s7930_s23 = sld [smem:[#allocation37_spill]] }
  0xc7   : > { %5525 = vmatprep.subr.mxu0 %v6675_v2  ;;  %v7090_v37 = vpack.c.bf16 %v1101_v36, %v1100_v35  ;;  %v1103_v40 = vld [vmem:[%s7926_s22 + $0x18] sm:$0xff]  ;;  %s5311_s5 = sshll.u32 %s6818_s4, 7  ;;  %s5054_s29 = sshll.u32 %s746_s16, 4  ;;  %s5055_s29 = int_to_ptr.vmem [resolvable:$true] %s5054_s29 }
  0xc8   : > { %v7100_v44 = vpack.c.bf16 %v1103_v40, %v1102_v39  ;;  %s7933_s0 = sld [smem:[#allocation35_spill]] }
  0xca   : > { %5526 = vmatpush3.msk.msra.mxu0 %vm787_vm1, %v782_v7  ;;  %vm3223_vm1 = vcmask 128005  }
  0xcb   : > { %5986 = vmatprep.subr.bf16.mxu0 %v6674_v1 }
  0xcc   : > { %s770_s30 = scalar_lea.vmem %s7930_s23, %s7001_s26 }
  0xce   : > { %s7801_s23 = scalar_lea.hbm %s7933_s0, %s5311_s5 }
 0x142   : > { %v776_v12 = vpop.permute.xlu0 %775 }
 0x143   : > { %vm777_vm3 = vcmp.eq.s32.totalorder %v776_v12, %v7022_v9 }
 0x144   : > { %v5235_v14 = vsel %vm777_vm3, 1.0, %v6675_v2  ;;  %vm2869_vm3 = vcmask 126980  }
 0x145   : > { %5528 = vmatmul.mubr.msk.f32.vlgmr.msra.gmra.mrb[0].mxu0 %vm783_vm2, %v5235_v14  ;;  %vm3225_vm2 = vcmask 259205  }
 0x146   : > { %5988 = vmatpush3.bf16.msra.mxu0 %v5987_v13  ;;  %5546 = vmatprep.mubr.msk.f32.mxu0 %vm6676_vm0, %v6675_v2 }
 0x147   : > { %5995 = vmatprep.subr.bf16.mxu0 %v6674_v1 }
 0x218   : > { %v7034_v21 = vpop.f32.mrb[0].mxu0 }
 0x219   : > { %v5529_v22 = vpop.f32.mrb[1].mxu0  ;;  %5531 = vmatpush3.msra.mxu1 %v7034_v21  ;;  %5547 = vmatmul.mubr.msk.f32.vlgmr.msra.gmra.mrb[2].mxu0 %vm945_vm5, %v7034_v21 }
 0x21a   : > { %5533 = vmatmul.mubr.msk.f32.vlgmr.msra.gmra.mrb[0].mxu1 %vm867_vm6, %v5238_v19  ;;  %5983 = vmatprep.subr.bf16.mxu1 %v6674_v1 }
 0x21b   : > { %5985 = vmatpush3.bf16.msra.mxu1 %v5984_v20  ;;  %5539 = vmatprep.mubr.msk.f32.mxu1 %vm6676_vm0, %v6675_v2 }
 0x21c   : > { %5989 = vmatprep.subr.bf16.mxu1 %v6674_v1  ;;  %5568 = vmatprep.mubr.msk.f32.mxu0 %vm6676_vm0, %v6675_v2 }
 0x21d   : > { %5997 = vmatpush3.bf16.msra.mxu0 %v7055_v26 }
 0x21e   : > { %5998 = vmatprep.subr.bf16.mxu0 %v6674_v1 }
 0x221   : > { %6000 = vmatpush3.bf16.msra.mxu0 %v7061_v28 }
 0x222   : > { %6007 = vmatprep.subr.bf16.mxu0 %v6674_v1 }
 0x224   : > { %5569 = vmatmul.mubr.f32.vlgmr.msra.gmra.mrb[4].mxu0 %v6675_v2 }
 0x225   : > { %6009 = vmatpush3.bf16.msra.mxu0 %v7065_v31  ;;  %5590 = vmatprep.mubr.msk.f32.mxu0 %vm6676_vm0, %v6675_v2 }
 0x226   : > { %6010 = vmatprep.subr.bf16.mxu0 %v6674_v1 }
 0x229   : > { %6012 = vmatpush3.bf16.msra.mxu0 %v7070_v34 }
 0x22a   : > { %6019 = vmatprep.subr.bf16.mxu0 %v6674_v1 }
 0x22c   : > { %5591 = vmatmul.mubr.f32.vlgmr.msra.gmra.mrb[6].mxu0 %v6675_v2 }
 0x22d   : > { %6021 = vmatpush3.bf16.msra.mxu0 %v7055_v26  ;;  %5612 = vmatprep.mubr.msk.f32.mxu0 %vm6676_vm0, %v6675_v2 }
 0x22e   : > { %6022 = vmatprep.subr.bf16.mxu0 %v6674_v1 }
 0x231   : > { %6024 = vmatpush3.bf16.msra.mxu0 %v7061_v28 }
 0x232   : > { %6031 = vmatprep.subr.bf16.mxu0 %v6674_v1 }
 0x2ec   : > { %v1088_v38 = vpop.f32.mrb[2].mxu0 }
 0x2ed   : > { %v937_v41 = vpop.f32.mrb[0].mxu1  ;;  %v5548_v42 = vpop.f32.mrb[3].mxu0 }
 0x2ee   : > { %v5534_v43 = vpop.f32.mrb[1].mxu1  ;;  %5540 = vmatmul.mubr.msk.f32.vlgmr.msra.gmra.mrb[2].mxu1 %vm945_vm5, %v937_v41 }
 0x2ef   : > { %5991 = vmatpush3.bf16.msra.mxu1 %v7090_v37  ;;  %5557 = vmatprep.mubr.msk.f32.mxu1 %vm6676_vm0, %v6675_v2 }
 0x2f0   : > { %5992 = vmatprep.subr.bf16.mxu1 %v6674_v1 }
 0x2f3   : > { %5994 = vmatpush3.bf16.msra.mxu1 %v7100_v44 }
 0x2f4   : > { %6001 = vmatprep.subr.bf16.mxu1 %v6674_v1 }
 0x2f6   : > { %5558 = vmatmul.mubr.f32.vlgmr.msra.gmra.mrb[4].mxu1 %v6675_v2 }
 0x2f7   : > { %6003 = vmatpush3.bf16.msra.mxu1 %v7112_v47  ;;  %5579 = vmatprep.mubr.msk.f32.mxu1 %vm6676_vm0, %v6675_v2  ;;  %v1257_v58 = vpop.f32.mrb[4].mxu0 }
 0x2f8   : > { %6004 = vmatprep.subr.bf16.mxu1 %v6674_v1  ;;  %v5570_v59 = vpop.f32.mrb[5].mxu0 }
 0x2fb   : > { %6006 = vmatpush3.bf16.msra.mxu1 %v7123_v50 }
 0x2fc   : > { %6013 = vmatprep.subr.bf16.mxu1 %v6674_v1 }
 0x2fe   : > { %5580 = vmatmul.mubr.f32.vlgmr.msra.gmra.mrb[6].mxu1 %v6675_v2 }
 0x2ff   : > { %6015 = vmatpush3.bf16.msra.mxu1 %v7090_v37  ;;  %5601 = vmatprep.mubr.msk.f32.mxu1 %vm6676_vm0, %v6675_v2  ;;  %v1407_v60 = vpop.f32.mrb[6].mxu0 }
 0x300   : > { %6016 = vmatprep.subr.bf16.mxu1 %v6674_v1  ;;  %v5592_v61 = vpop.f32.mrb[7].mxu0 }
 0x303   : > { %6018 = vmatpush3.bf16.msra.mxu1 %v7100_v44 }
 0x304   : > { %6025 = vmatprep.subr.bf16.mxu1 %v6674_v1 }
 0x3c1   : > { %v1015_v51 = vpop.f32.mrb[2].mxu1 }
 0x3c2   : > { %v1089_v52 = vadd.f32 %v1088_v38, %v1015_v51  ;;  %v5541_v53 = vpop.f32.mrb[3].mxu1 }
 0x3c4   : > { %v7138_v63 = vadd.f32 %v5242_v62, %v1089_v52 }
 0x3c9   : > { %v1186_v54 = vpop.f32.mrb[4].mxu1 }
 0x3ca   : > { %v5559_v55 = vpop.f32.mrb[5].mxu1  ;;  %v1190_v5 = vadd.f32 %v1186_v54, %v7138_v63 }
 0x3cc   : > { %v5243_v6 = vmul.f32 -1.442695, %v1190_v5 }
 0x3d1   : > { %v1332_v56 = vpop.f32.mrb[6].mxu1 }
 0x3d2   : > { %1337 = vrot.lane.b32.xlu0 %v1332_v56, %s6677_s2  ;;  %v5581_v57 = vpop.f32.mrb[7].mxu1 }
 0x444   : > { %v1338_v0 = vpop.permute.xlu0 %1337 }
 0x445   : > { %v1340_v3 = vadd.f32 %v1338_v0, %v7138_v63 }
 0x447   : > { %6318 = vtanh.f32 %v1340_v3 }
 0x448   : > { %6320 = vpow2.f32 %v5243_v6 }
 0x451   : > { %v6319_v4 = vpop.eup %6318 }
 0x452   : > { %1437 = vrot.lane.b32.xlu1 %v6319_v4, %s6677_s2  ;;  %v6321_v7 = vpop.eup %6320 }
 0x453   : > { %v1419_v8 = vadd.f32 1.0, %v6321_v7 }
 0x455   : > { %6322 = vrcp.f32 %v1419_v8 }
 0x456   : > { %1262 = vrot.lane.b32.xlu1 %v1257_v58, %s6678_s24 }
 0x45a   : > { %1412 = vrot.lane.b32.xlu1 %v1407_v60, %s6679_s3 }
 0x45f   : > { %v6323_v10 = vpop.eup %6322 }
 0x4c4   : > { %v1438_v11 = vpop.permute.xlu1 %1437 }
 0x4c5   : > { %v1440_v12 = vmul.f32 %v6323_v10, %v1438_v11 }
 0x4c7   : > { %1442 = vrot.lane.b32.xlu0 %v1440_v12, %s6678_s24 }
 0x4c8   : > { %v1263_v13 = vpop.permute.xlu1 %1262 }
 0x4c9   : > { %v1265_v14 = vadd.f32 %v1263_v13, %v7138_v63 }
 0x4cb   : > { %v5244_v16 = vmul.f32 -1.442695, %v1265_v14 }
 0x4cc   : > { %v1413_v25 = vpop.permute.xlu1 %1412 }
 0x4cd   : > { %6324 = vpow2.f32 %v5244_v16  ;;  %v1415_v27 = vadd.f32 %v1413_v25, %v7138_v63 }
 0x4cf   : > { %v5245_v29 = vmul.f32 -1.442695, %v1415_v27 }
 0x4d7   : > { %v6325_v17 = vpop.eup %6324 }
 0x4d8   : > { %v1425_v18 = vadd.f32 1.0, %v6325_v17 }
 0x4da   : > { %6326 = vrcp.f32 %v1425_v18 }
 0x4e4   : > { %v6327_v19 = vpop.eup %6326 }
 0x4e5   : > { %v1435_v20 = vmul.f32 0.0, %v6327_v19 }
 0x539   : > { %v1443_v22 = vpop.permute.xlu0 %1442 }
 0x53a   : > { %v7147_v23 = vadd.f32 %v1443_v22, %v1435_v20 }
 0x53c   : > { %6328 = vtanh.f32 %v7147_v23  ;;  %v1784_v10 = vrot.slane %v7147_v23, 7 }
 0x53d   : > { %6330 = vpow2.f32 %v5245_v29 }
 0x546   : > { %v6329_v24 = vpop.eup %6328 }
 0x547   : > { %1448 = vrot.lane.b32.xlu0 %v6329_v24, %s6677_s2  ;;  %v6331_v30 = vpop.eup %6330 }
 0x548   : > { %v1432_v32 = vadd.f32 1.0, %v6331_v30 }
 0x54a   : > { %6332 = vrcp.f32 %v1432_v32 }
 0x554   : > { %v6333_v33 = vpop.eup %6332 }
 0x5b9   : > { %v1449_v35 = vpop.permute.xlu0 %1448 }
 0x5ba   : > { %v1451_v36 = vmul.f32 %v6333_v33, %v1449_v35 }
 0x5bc   : > { %1453 = vrot.lane.b32.xlu1 %v1451_v36, %s6678_s24 }
 0x62e   : > { %v1454_v38 = vpop.permute.xlu1 %1453 }
 0x62f   : > { %5602 = vmatmul.mubr.msk.f32.vlgmr.msra.gmra.mrb[8].mxu1 %vm1116_vm7, %v1454_v38  ;;  %5613 = vmatmul.mubr.msk.f32.vlgmr.msra.gmra.mrb[8].mxu0 %vm1116_vm7, %v1454_v38  ;;  %1457 = vst.msk [vmem:[#allocation2] sm:$0x1] %vm1456_vm8, %v1454_v38  ;;  %vm3577_vm8 = vcmask 129030  }
 0x630   : > { %1459 = vst.msk [vmem:[#allocation2 + $0x7] sm:$0x1] %vm1458_vm9, %v1454_v38  ;;  %6027 = vmatpush3.bf16.msra.mxu1 %v7112_v47  ;;  %6033 = vmatpush3.bf16.msra.mxu0 %v7065_v31  ;;  %vm3579_vm9 = vcmask 260230  }
 0x631   : > { %6028 = vmatprep.subr.bf16.mxu1 %v6674_v1  ;;  %6034 = vmatprep.subr.bf16.mxu0 %v6674_v1 }
 0x632   : > { %5623 = vmatprep.mubr.msk.f32.mxu1 %vm6676_vm0, %v6675_v2  ;;  %5634 = vmatprep.mubr.msk.f32.mxu0 %vm6676_vm0, %v6675_v2 }
 0x634   : > { %6030 = vmatpush3.bf16.msra.mxu1 %v7123_v50  ;;  %6036 = vmatpush3.bf16.msra.mxu0 %v7070_v34 }
 0x635   : > { %6037 = vmatprep.subr.bf16.mxu1 %v6674_v1  ;;  %6043 = vmatprep.subr.bf16.mxu0 %v6674_v1 }
 0x637   : > { %5624 = vmatmul.mubr.msk.f32.vlgmr.msra.gmra.mrb[10].mxu1 %vm1116_vm7, %v1454_v38  ;;  %5635 = vmatmul.mubr.msk.f32.vlgmr.msra.gmra.mrb[10].mxu0 %vm1116_vm7, %v1454_v38 }
 0x638   : > { %6039 = vmatpush3.bf16.msra.mxu1 %v7090_v37  ;;  %6045 = vmatpush3.bf16.msra.mxu0 %v7055_v26 }
 0x639   : > { %6040 = vmatprep.subr.bf16.mxu1 %v6674_v1  ;;  %6046 = vmatprep.subr.bf16.mxu0 %v6674_v1 }
 0x63a   : > { %5645 = vmatprep.mubr.msk.f32.mxu1 %vm6676_vm0, %v6675_v2  ;;  %5656 = vmatprep.mubr.msk.f32.mxu0 %vm6676_vm0, %v6675_v2 }
 0x63c   : > { %6042 = vmatpush3.bf16.msra.mxu1 %v7100_v44  ;;  %6048 = vmatpush3.bf16.msra.mxu0 %v7061_v28 }
 0x63d   : > { %6049 = vmatprep.subr.bf16.mxu1 %v6674_v1  ;;  %6055 = vmatprep.subr.bf16.mxu0 %v6674_v1 }
 0x702   : > { %v1528_v39 = vpop.f32.mrb[8].mxu1  ;;  %v1602_v40 = vpop.f32.mrb[8].mxu0 }
 0x703   : > { %v5603_v41 = vpop.f32.mrb[9].mxu1  ;;  %v5614_v42 = vpop.f32.mrb[9].mxu0  ;;  %v1607_v51 = vrot.slane %v1602_v40, 7  ;;  %v1533_v56 = vrot.slane %v1528_v39, 7 }
 0x705   : > { %v1535_v57 = vadd.f32 %v1533_v56, %v7138_v63 }
 0x707   : > { %v5250_v58 = vmul.f32 -1.442695, %v1535_v57 }
 0x70a   : > { %v1678_v43 = vpop.f32.mrb[10].mxu1  ;;  %v1754_v45 = vpop.f32.mrb[10].mxu0 }
 0x70b   : > { %v1683_v46 = vrot.slane %v1678_v43, 7  ;;  %v5625_v48 = vpop.f32.mrb[11].mxu1  ;;  %v5636_v49 = vpop.f32.mrb[11].mxu0  ;;  %v1759_v52 = vrot.slane %v1754_v45, 7 }
 0x70d   : > { %1684 = vrot.lane.b32.xlu0 %v1683_v46, %s6677_s2 }
 0x711   : > { %1608 = vrot.lane.b32.xlu0 %v1607_v51, %s6678_s24 }
 0x715   : > { %1760 = vrot.lane.b32.xlu0 %v1759_v52, %s6679_s3 }
 0x77f   : > { %v1685_v53 = vpop.permute.xlu0 %1684 }
 0x780   : > { %v1687_v54 = vadd.f32 %v1685_v53, %v7138_v63 }
 0x782   : > { %6334 = vtanh.f32 %v1687_v54 }
 0x783   : > { %6336 = vpow2.f32 %v5250_v58  ;;  %v1609_v3 = vpop.permute.xlu0 %1608 }
 0x784   : > { %v1611_v4 = vadd.f32 %v1609_v3, %v7138_v63 }
 0x786   : > { %v5251_v5 = vmul.f32 -1.442695, %v1611_v4 }
 0x787   : > { %v1761_v16 = vpop.permute.xlu0 %1760 }
 0x788   : > { %v1763_v17 = vadd.f32 %v1761_v16, %v7138_v63 }
 0x78a   : > { %v5252_v18 = vmul.f32 -1.442695, %v1763_v17 }
 0x78c   : > { %v6335_v55 = vpop.eup %6334 }
 0x78d   : > { %1788 = vrot.lane.b32.xlu1 %v6335_v55, %s6677_s2  ;;  %v6337_v59 = vpop.eup %6336 }
 0x78e   : > { %v1767_v60 = vadd.f32 1.0, %v6337_v59 }
 0x790   : > { %6338 = vrcp.f32 %v1767_v60 }
 0x791   : > { %6340 = vpow2.f32 %v5251_v5 }
 0x79a   : > { %v6339_v61 = vpop.eup %6338 }
 0x79b   : > { %v6341_v6 = vpop.eup %6340 }
 0x79c   : > { %v1773_v7 = vadd.f32 1.0, %v6341_v6 }
 0x79e   : > { %6342 = vrcp.f32 %v1773_v7 }
 0x7a8   : > { %v6343_v8 = vpop.eup %6342 }
 0x7a9   : > { %v1786_v11 = vmul.f32 %v6343_v8, %v1784_v10 }
 0x7ff   : > { %v1789_v62 = vpop.permute.xlu1 %1788 }
 0x800   : > { %v1791_v0 = vmul.f32 %v6339_v61, %v1789_v62 }
 0x802   : > { %1793 = vrot.lane.b32.xlu1 %v1791_v0, %s6678_s24 }
 0x874   : > { %v1794_v12 = vpop.permute.xlu1 %1793 }
 0x875   : > { %v7190_v13 = vadd.f32 %v1794_v12, %v1786_v11 }
 0x877   : > { %6344 = vtanh.f32 %v7190_v13  ;;  %v2138_v0 = vrot.slane %v7190_v13, 7 }
 0x878   : > { %6346 = vpow2.f32 %v5252_v18 }
 0x881   : > { %v6345_v14 = vpop.eup %6344 }
 0x882   : > { %1799 = vrot.lane.b32.xlu1 %v6345_v14, %s6677_s2  ;;  %v6347_v19 = vpop.eup %6346 }
 0x883   : > { %v1780_v20 = vadd.f32 1.0, %v6347_v19 }
 0x885   : > { %6348 = vrcp.f32 %v1780_v20 }
 0x88f   : > { %v6349_v22 = vpop.eup %6348 }
 0x8f4   : > { %v1800_v24 = vpop.permute.xlu1 %1799 }
 0x8f5   : > { %v7195_v23 = vmul.f32 %v6349_v22, %v1800_v24 }
 0x8f7   : > { %v1811_v25 = vrot.slane %v7195_v23, 1 }
 0x8f9   : > { %1812 = vrot.lane.b32.xlu0 %v1811_v25, %s6678_s24 }
 0x96b   : > { %v1813_v27 = vpop.permute.xlu0 %1812 }
 0x96c   : > { %5646 = vmatmul.mubr.msk.f32.vlgmr.msra.gmra.mrb[12].mxu1 %vm1116_vm7, %v1813_v27  ;;  %5657 = vmatmul.mubr.msk.f32.vlgmr.msra.gmra.mrb[12].mxu0 %vm1116_vm7, %v1813_v27 }
 0x96d   : > { %6051 = vmatpush3.bf16.msra.mxu1 %v7112_v47  ;;  %6057 = vmatpush3.bf16.msra.mxu0 %v7065_v31 }
 0x96e   : > { %6052 = vmatprep.subr.bf16.mxu1 %v6674_v1  ;;  %6058 = vmatprep.subr.bf16.mxu0 %v6674_v1 }
 0x96f   : > { %5667 = vmatprep.mubr.msk.f32.mxu1 %vm6676_vm0, %v6675_v2  ;;  %5678 = vmatprep.mubr.msk.f32.mxu0 %vm6676_vm0, %v6675_v2 }
 0x971   : > { %6054 = vmatpush3.bf16.msra.mxu1 %v7123_v50  ;;  %6060 = vmatpush3.bf16.msra.mxu0 %v7070_v34 }
 0x972   : > { %6061 = vmatprep.subr.bf16.mxu1 %v6674_v1  ;;  %6067 = vmatprep.subr.bf16.mxu0 %v6674_v1 }
 0x974   : > { %5668 = vmatmul.mubr.msk.f32.vlgmr.msra.gmra.mrb[14].mxu1 %vm1116_vm7, %v1813_v27  ;;  %5679 = vmatmul.mubr.msk.f32.vlgmr.msra.gmra.mrb[14].mxu0 %vm1116_vm7, %v1813_v27 }
 0x975   : > { %6063 = vmatpush3.bf16.msra.mxu1 %v7090_v37  ;;  %6069 = vmatpush3.bf16.msra.mxu0 %v7055_v26 }
 0x976   : > { %6064 = vmatprep.subr.bf16.mxu1 %v6674_v1  ;;  %6070 = vmatprep.subr.bf16.mxu0 %v6674_v1 }
 0x977   : > { %5689 = vmatprep.mubr.msk.f32.mxu1 %vm6676_vm0, %v6675_v2  ;;  %5700 = vmatprep.mubr.msk.f32.mxu0 %vm6676_vm0, %v6675_v2 }
 0x979   : > { %6066 = vmatpush3.bf16.msra.mxu1 %v7100_v44  ;;  %6072 = vmatpush3.bf16.msra.mxu0 %v7061_v28 }
 0x97a   : > { %6073 = vmatprep.subr.bf16.mxu1 %v6674_v1  ;;  %6079 = vmatprep.subr.bf16.mxu0 %v6674_v1 }
 0xa3f   : > { %v1882_v29 = vpop.f32.mrb[12].mxu1  ;;  %v1956_v30 = vpop.f32.mrb[12].mxu0 }
 0xa40   : > { %v5647_v32 = vpop.f32.mrb[13].mxu1  ;;  %v5658_v33 = vpop.f32.mrb[13].mxu0  ;;  %v1961_v41 = vrot.slane %v1956_v30, 6  ;;  %v1887_v48 = vrot.slane %v1882_v29, 6 }
 0xa42   : > { %v1889_v49 = vadd.f32 %v1887_v48, %v7138_v63 }
 0xa44   : > { %v5257_v51 = vmul.f32 -1.442695, %v1889_v49 }
 0xa47   : > { %v2032_v35 = vpop.f32.mrb[14].mxu1  ;;  %v2108_v36 = vpop.f32.mrb[14].mxu0 }
 0xa48   : > { %v2037_v38 = vrot.slane %v2032_v35, 6  ;;  %v5669_v39 = vpop.f32.mrb[15].mxu1  ;;  %v5680_v40 = vpop.f32.mrb[15].mxu0  ;;  %v2113_v42 = vrot.slane %v2108_v36, 6 }
 0xa4a   : > { %2038 = vrot.lane.b32.xlu1 %v2037_v38, %s6677_s2 }
 0xa4e   : > { %1962 = vrot.lane.b32.xlu1 %v1961_v41, %s6678_s24 }
 0xa52   : > { %2114 = vrot.lane.b32.xlu1 %v2113_v42, %s6679_s3 }
 0xabc   : > { %v2039_v43 = vpop.permute.xlu1 %2038 }
 0xabd   : > { %v2041_v45 = vadd.f32 %v2039_v43, %v7138_v63 }
 0xabf   : > { %6350 = vtanh.f32 %v2041_v45 }
 0xac0   : > { %6352 = vpow2.f32 %v5257_v51  ;;  %v1963_v57 = vpop.permute.xlu1 %1962 }
 0xac1   : > { %v1965_v58 = vadd.f32 %v1963_v57, %v7138_v63 }
 0xac3   : > { %v5258_v59 = vmul.f32 -1.442695, %v1965_v58 }
 0xac4   : > { %v2115_v7 = vpop.permute.xlu1 %2114 }
 0xac5   : > { %v2117_v8 = vadd.f32 %v2115_v7, %v7138_v63 }
 0xac7   : > { %v5259_v10 = vmul.f32 -1.442695, %v2117_v8 }
 0xac9   : > { %v6351_v46 = vpop.eup %6350 }
 0xaca   : > { %2142 = vrot.lane.b32.xlu0 %v6351_v46, %s6677_s2  ;;  %v6353_v52 = vpop.eup %6352 }
 0xacb   : > { %v2121_v53 = vadd.f32 1.0, %v6353_v52 }
 0xacd   : > { %6354 = vrcp.f32 %v2121_v53 }
 0xace   : > { %6356 = vpow2.f32 %v5258_v59 }
 0xad7   : > { %v6355_v54 = vpop.eup %6354 }
 0xad8   : > { %v6357_v60 = vpop.eup %6356 }
 0xad9   : > { %v2127_v61 = vadd.f32 1.0, %v6357_v60 }
 0xadb   : > { %6358 = vrcp.f32 %v2127_v61 }
 0xae5   : > { %v6359_v62 = vpop.eup %6358 }
 0xae6   : > { %v2140_v3 = vmul.f32 %v6359_v62, %v2138_v0 }
 0xb3c   : > { %v2143_v55 = vpop.permute.xlu0 %2142 }
 0xb3d   : > { %v2145_v56 = vmul.f32 %v6355_v54, %v2143_v55 }
 0xb3f   : > { %2147 = vrot.lane.b32.xlu0 %v2145_v56, %s6678_s24 }
 0xbb1   : > { %v2148_v4 = vpop.permute.xlu0 %2147 }
 0xbb2   : > { %v7236_v5 = vadd.f32 %v2148_v4, %v2140_v3 }
 0xbb4   : > { %6360 = vtanh.f32 %v7236_v5  ;;  %v2492_v57 = vrot.slane %v7236_v5, 7 }
 0xbb5   : > { %6362 = vpow2.f32 %v5259_v10 }
 0xbbe   : > { %v6361_v6 = vpop.eup %6360 }
 0xbbf   : > { %2153 = vrot.lane.b32.xlu0 %v6361_v6, %s6677_s2  ;;  %v6363_v11 = vpop.eup %6362 }
 0xbc0   : > { %v2134_v12 = vadd.f32 1.0, %v6363_v11 }
 0xbc2   : > { %6364 = vrcp.f32 %v2134_v12 }
 0xbcc   : > { %v6365_v14 = vpop.eup %6364 }
 0xc31   : > { %v2154_v16 = vpop.permute.xlu0 %2153 }
 0xc32   : > { %v7241_v13 = vmul.f32 %v6365_v14, %v2154_v16 }
 0xc34   : > { %v2165_v17 = vrot.slane %v7241_v13, 2 }
 0xc36   : > { %2166 = vrot.lane.b32.xlu1 %v2165_v17, %s6678_s24 }
 0xca8   : > { %v2167_v18 = vpop.permute.xlu1 %2166 }
 0xca9   : > { %5690 = vmatmul.mubr.msk.f32.vlgmr.msra.gmra.mrb[16].mxu1 %vm1116_vm7, %v2167_v18  ;;  %5701 = vmatmul.mubr.msk.f32.vlgmr.msra.gmra.mrb[16].mxu0 %vm1116_vm7, %v2167_v18 }
 0xcaa   : > { %6075 = vmatpush3.bf16.msra.mxu1 %v7112_v47  ;;  %6081 = vmatpush3.bf16.msra.mxu0 %v7065_v31 }
 0xcab   : > { %6076 = vmatprep.subr.bf16.mxu1 %v6674_v1  ;;  %6082 = vmatprep.subr.bf16.mxu0 %v6674_v1 }
 0xcac   : > { %5711 = vmatprep.mubr.msk.f32.mxu1 %vm6676_vm0, %v6675_v2  ;;  %5722 = vmatprep.mubr.msk.f32.mxu0 %vm6676_vm0, %v6675_v2 }
 0xcae   : > { %6078 = vmatpush3.bf16.msra.mxu1 %v7123_v50  ;;  %6084 = vmatpush3.bf16.msra.mxu0 %v7070_v34 }
 0xcaf   : > { %6085 = vmatprep.subr.bf16.mxu1 %v6674_v1  ;;  %6091 = vmatprep.subr.bf16.mxu0 %v6674_v1 }
 0xcb1   : > { %5712 = vmatmul.mubr.msk.f32.vlgmr.msra.gmra.mrb[18].mxu1 %vm1116_vm7, %v2167_v18  ;;  %5723 = vmatmul.mubr.msk.f32.vlgmr.msra.gmra.mrb[18].mxu0 %vm1116_vm7, %v2167_v18 }
 0xcb2   : > { %6087 = vmatpush3.bf16.msra.mxu1 %v7090_v37  ;;  %6093 = vmatpush3.bf16.msra.mxu0 %v7055_v26 }
 0xcb3   : > { %6088 = vmatprep.subr.bf16.mxu1 %v6674_v1  ;;  %6094 = vmatprep.subr.bf16.mxu0 %v6674_v1 }
 0xcb4   : > { %5733 = vmatprep.mubr.msk.f32.mxu1 %vm6676_vm0, %v6675_v2  ;;  %5744 = vmatprep.mubr.msk.f32.mxu0 %vm6676_vm0, %v6675_v2 }
 0xcb6   : > { %6090 = vmatpush3.bf16.msra.mxu1 %v7100_v44  ;;  %6096 = vmatpush3.bf16.msra.mxu0 %v7061_v28 }
 0xcb7   : > { %6097 = vmatprep.subr.bf16.mxu1 %v6674_v1  ;;  %6103 = vmatprep.subr.bf16.mxu0 %v6674_v1 }
 0xd7c   : > { %v2236_v19 = vpop.f32.mrb[16].mxu1  ;;  %v2310_v20 = vpop.f32.mrb[16].mxu0 }
 0xd7d   : > { %v5691_v22 = vpop.f32.mrb[17].mxu1  ;;  %v5702_v24 = vpop.f32.mrb[17].mxu0  ;;  %v2315_v33 = vrot.slane %v2310_v20, 5  ;;  %v2241_v40 = vrot.slane %v2236_v19, 5 }
 0xd7f   : > { %v2243_v41 = vadd.f32 %v2241_v40, %v7138_v63 }
 0xd81   : > { %v5264_v42 = vmul.f32 -1.442695, %v2243_v41 }
 0xd84   : > { %v2386_v25 = vpop.f32.mrb[18].mxu1  ;;  %v2462_v27 = vpop.f32.mrb[18].mxu0 }
 0xd85   : > { %v2391_v29 = vrot.slane %v2386_v25, 5  ;;  %v5713_v30 = vpop.f32.mrb[19].mxu1  ;;  %v5724_v32 = vpop.f32.mrb[19].mxu0  ;;  %v2467_v35 = vrot.slane %v2462_v27, 5 }
 0xd87   : > { %2392 = vrot.lane.b32.xlu0 %v2391_v29, %s6677_s2 }
 0xd8b   : > { %2316 = vrot.lane.b32.xlu0 %v2315_v33, %s6678_s24 }
 0xd8f   : > { %2468 = vrot.lane.b32.xlu0 %v2467_v35, %s6679_s3 }
 0xdf9   : > { %v2393_v36 = vpop.permute.xlu0 %2392 }
 0xdfa   : > { %v2395_v38 = vadd.f32 %v2393_v36, %v7138_v63 }
 0xdfc   : > { %6366 = vtanh.f32 %v2395_v38 }
 0xdfd   : > { %6368 = vpow2.f32 %v5264_v42  ;;  %v2317_v51 = vpop.permute.xlu0 %2316 }
 0xdfe   : > { %v2319_v52 = vadd.f32 %v2317_v51, %v7138_v63 }
 0xe00   : > { %v5265_v53 = vmul.f32 -1.442695, %v2319_v52 }
 0xe01   : > { %v2469_v62 = vpop.permute.xlu0 %2468 }
 0xe02   : > { %v2471_v0 = vadd.f32 %v2469_v62, %v7138_v63 }
 0xe04   : > { %v5266_v3 = vmul.f32 -1.442695, %v2471_v0 }
 0xe06   : > { %v6367_v39 = vpop.eup %6366 }
 0xe07   : > { %2496 = vrot.lane.b32.xlu1 %v6367_v39, %s6677_s2  ;;  %v6369_v43 = vpop.eup %6368 }
 0xe08   : > { %v2475_v45 = vadd.f32 1.0, %v6369_v43 }
 0xe0a   : > { %6370 = vrcp.f32 %v2475_v45 }
 0xe0b   : > { %6372 = vpow2.f32 %v5265_v53 }
 0xe14   : > { %v6371_v46 = vpop.eup %6370 }
 0xe15   : > { %v6373_v54 = vpop.eup %6372 }
 0xe16   : > { %v2481_v55 = vadd.f32 1.0, %v6373_v54 }
 0xe18   : > { %6374 = vrcp.f32 %v2481_v55 }
 0xe22   : > { %v6375_v56 = vpop.eup %6374 }
 0xe23   : > { %v2494_v58 = vmul.f32 %v6375_v56, %v2492_v57 }
 0xe79   : > { %v2497_v48 = vpop.permute.xlu1 %2496 }
 0xe7a   : > { %v2499_v49 = vmul.f32 %v6371_v46, %v2497_v48 }
 0xe7c   : > { %2501 = vrot.lane.b32.xlu1 %v2499_v49, %s6678_s24 }
 0xeee   : > { %v2502_v59 = vpop.permute.xlu1 %2501 }
 0xeef   : > { %v7282_v60 = vadd.f32 %v2502_v59, %v2494_v58 }
 0xef1   : > { %6376 = vtanh.f32 %v7282_v60  ;;  %v2846_v52 = vrot.slane %v7282_v60, 7 }
 0xef2   : > { %6378 = vpow2.f32 %v5266_v3 }
 0xefb   : > { %v6377_v61 = vpop.eup %6376 }
 0xefc   : > { %2507 = vrot.lane.b32.xlu1 %v6377_v61, %s6677_s2  ;;  %v6379_v4 = vpop.eup %6378 }
 0xefd   : > { %v2488_v6 = vadd.f32 1.0, %v6379_v4 }
 0xeff   : > { %6380 = vrcp.f32 %v2488_v6 }
 0xf09   : > { %v6381_v7 = vpop.eup %6380 }
 0xf6e   : > { %v2508_v8 = vpop.permute.xlu1 %2507 }
 0xf6f   : > { %v7287_v5 = vmul.f32 %v6381_v7, %v2508_v8 }
 0xf71   : > { %v2519_v10 = vrot.slane %v7287_v5, 3 }
 0xf73   : > { %2520 = vrot.lane.b32.xlu0 %v2519_v10, %s6678_s24 }
 0xfe5   : > { %v2521_v11 = vpop.permute.xlu0 %2520 }
 0xfe6   : > { %5734 = vmatmul.mubr.msk.f32.vlgmr.msra.gmra.mrb[20].mxu1 %vm1116_vm7, %v2521_v11  ;;  %5745 = vmatmul.mubr.msk.f32.vlgmr.msra.gmra.mrb[20].mxu0 %vm1116_vm7, %v2521_v11 }
 0xfe7   : > { %6099 = vmatpush3.bf16.msra.mxu1 %v7112_v47  ;;  %6105 = vmatpush3.bf16.msra.mxu0 %v7065_v31 }
 0xfe8   : > { %6100 = vmatprep.subr.bf16.mxu1 %v6674_v1  ;;  %6106 = vmatprep.subr.bf16.mxu0 %v6674_v1 }
 0xfe9   : > { %5755 = vmatprep.mubr.msk.f32.mxu1 %vm6676_vm0, %v6675_v2  ;;  %5766 = vmatprep.mubr.msk.f32.mxu0 %vm6676_vm0, %v6675_v2 }
 0xfeb   : > { %6102 = vmatpush3.bf16.msra.mxu1 %v7123_v50  ;;  %6108 = vmatpush3.bf16.msra.mxu0 %v7070_v34 }
 0xfec   : > { %6109 = vmatprep.subr.bf16.mxu1 %v6674_v1  ;;  %6115 = vmatprep.subr.bf16.mxu0 %v6674_v1 }
 0xfee   : > { %5756 = vmatmul.mubr.msk.f32.vlgmr.msra.gmra.mrb[22].mxu1 %vm1116_vm7, %v2521_v11  ;;  %5767 = vmatmul.mubr.msk.f32.vlgmr.msra.gmra.mrb[22].mxu0 %vm1116_vm7, %v2521_v11 }
 0xfef   : > { %6111 = vmatpush3.bf16.msra.mxu1 %v7090_v37  ;;  %6117 = vmatpush3.bf16.msra.mxu0 %v7055_v26 }
 0xff0   : > { %6112 = vmatprep.subr.bf16.mxu1 %v6674_v1  ;;  %6118 = vmatprep.subr.bf16.mxu0 %v6674_v1 }
 0xff1   : > { %5777 = vmatprep.mubr.msk.f32.mxu1 %vm6676_vm0, %v6675_v2  ;;  %5788 = vmatprep.mubr.msk.f32.mxu0 %vm6676_vm0, %v6675_v2 }
 0xff3   : > { %6114 = vmatpush3.bf16.msra.mxu1 %v7100_v44  ;;  %6120 = vmatpush3.bf16.msra.mxu0 %v7061_v28 }
 0xff4   : > { %6121 = vmatprep.subr.bf16.mxu1 %v6674_v1  ;;  %6127 = vmatprep.subr.bf16.mxu0 %v6674_v1 }
0x10b9   : > { %v2590_v12 = vpop.f32.mrb[20].mxu1  ;;  %v2664_v14 = vpop.f32.mrb[20].mxu0 }
0x10ba   : > { %v5735_v16 = vpop.f32.mrb[21].mxu1  ;;  %v5746_v17 = vpop.f32.mrb[21].mxu0  ;;  %v2669_v25 = vrot.slane %v2664_v14, 4  ;;  %v2595_v33 = vrot.slane %v2590_v12, 4 }
0x10bc   : > { %v2597_v35 = vadd.f32 %v2595_v33, %v7138_v63 }
0x10be   : > { %v5271_v36 = vmul.f32 -1.442695, %v2597_v35 }
0x10c1   : > { %v2740_v18 = vpop.f32.mrb[22].mxu1  ;;  %v2816_v19 = vpop.f32.mrb[22].mxu0 }
0x10c2   : > { %v2745_v20 = vrot.slane %v2740_v18, 4  ;;  %v5757_v22 = vpop.f32.mrb[23].mxu1  ;;  %v5768_v24 = vpop.f32.mrb[23].mxu0  ;;  %v2821_v27 = vrot.slane %v2816_v19, 4 }
0x10c4   : > { %2746 = vrot.lane.b32.xlu1 %v2745_v20, %s6677_s2 }
0x10c8   : > { %2670 = vrot.lane.b32.xlu1 %v2669_v25, %s6678_s24 }
0x10cc   : > { %2822 = vrot.lane.b32.xlu1 %v2821_v27, %s6679_s3 }
0x1136   : > { %v2747_v29 = vpop.permute.xlu1 %2746 }
0x1137   : > { %v2749_v30 = vadd.f32 %v2747_v29, %v7138_v63 }
0x1139   : > { %6382 = vtanh.f32 %v2749_v30 }
0x113a   : > { %6384 = vpow2.f32 %v5271_v36  ;;  %v2671_v43 = vpop.permute.xlu1 %2670 }
0x113b   : > { %v2673_v45 = vadd.f32 %v2671_v43, %v7138_v63 }
0x113d   : > { %v5272_v46 = vmul.f32 -1.442695, %v2673_v45 }
0x113e   : > { %v2823_v57 = vpop.permute.xlu1 %2822 }
0x113f   : > { %v2825_v58 = vadd.f32 %v2823_v57, %v7138_v63 }
0x1141   : > { %v5273_v59 = vmul.f32 -1.442695, %v2825_v58 }
0x1143   : > { %v6383_v32 = vpop.eup %6382 }
0x1144   : > { %2850 = vrot.lane.b32.xlu0 %v6383_v32, %s6677_s2  ;;  %v6385_v38 = vpop.eup %6384 }
0x1145   : > { %v2829_v39 = vadd.f32 1.0, %v6385_v38 }
0x1147   : > { %6386 = vrcp.f32 %v2829_v39 }
0x1148   : > { %6388 = vpow2.f32 %v5272_v46 }
0x1151   : > { %v6387_v40 = vpop.eup %6386 }
0x1152   : > { %v6389_v48 = vpop.eup %6388 }
0x1153   : > { %v2835_v49 = vadd.f32 1.0, %v6389_v48 }
0x1155   : > { %6390 = vrcp.f32 %v2835_v49 }
0x115f   : > { %v6391_v51 = vpop.eup %6390 }
0x1160   : > { %v2848_v53 = vmul.f32 %v6391_v51, %v2846_v52 }
0x11b6   : > { %v2851_v41 = vpop.permute.xlu0 %2850 }
0x11b7   : > { %v2853_v42 = vmul.f32 %v6387_v40, %v2851_v41 }
0x11b9   : > { %2855 = vrot.lane.b32.xlu0 %v2853_v42, %s6678_s24 }
0x122b   : > { %v2856_v54 = vpop.permute.xlu0 %2855 }
0x122c   : > { %v7328_v55 = vadd.f32 %v2856_v54, %v2848_v53 }
0x122e   : > { %6392 = vtanh.f32 %v7328_v55  ;;  %v3200_v46 = vrot.slane %v7328_v55, 7 }
0x122f   : > { %6394 = vpow2.f32 %v5273_v59 }
0x1238   : > { %v6393_v56 = vpop.eup %6392 }
0x1239   : > { %2861 = vrot.lane.b32.xlu0 %v6393_v56, %s6677_s2  ;;  %v6395_v61 = vpop.eup %6394 }
0x123a   : > { %v2842_v62 = vadd.f32 1.0, %v6395_v61 }
0x123c   : > { %6396 = vrcp.f32 %v2842_v62 }
0x1246   : > { %v6397_v0 = vpop.eup %6396 }
0x12ab   : > { %v2862_v3 = vpop.permute.xlu0 %2861 }
0x12ac   : > { %v7333_v60 = vmul.f32 %v6397_v0, %v2862_v3 }
0x12ae   : > { %v2873_v4 = vrot.slane %v7333_v60, 4 }
0x12b0   : > { %2874 = vrot.lane.b32.xlu1 %v2873_v4, %s6678_s24 }
0x1322   : > { %v2875_v6 = vpop.permute.xlu1 %2874 }
0x1323   : > { %5778 = vmatmul.mubr.msk.f32.vlgmr.msra.gmra.mrb[24].mxu1 %vm1116_vm7, %v2875_v6  ;;  %5789 = vmatmul.mubr.msk.f32.vlgmr.msra.gmra.mrb[24].mxu0 %vm1116_vm7, %v2875_v6 }
0x1324   : > { %6123 = vmatpush3.bf16.msra.mxu1 %v7112_v47  ;;  %6129 = vmatpush3.bf16.msra.mxu0 %v7065_v31 }
0x1325   : > { %6124 = vmatprep.subr.bf16.mxu1 %v6674_v1  ;;  %6130 = vmatprep.subr.bf16.mxu0 %v6674_v1 }
0x1326   : > { %5799 = vmatprep.mubr.msk.f32.mxu1 %vm6676_vm0, %v6675_v2  ;;  %5810 = vmatprep.mubr.msk.f32.mxu0 %vm6676_vm0, %v6675_v2 }
0x1328   : > { %6126 = vmatpush3.bf16.msra.mxu1 %v7123_v50  ;;  %6132 = vmatpush3.bf16.msra.mxu0 %v7070_v34 }
0x1329   : > { %6133 = vmatprep.subr.bf16.mxu1 %v6674_v1  ;;  %6139 = vmatprep.subr.bf16.mxu0 %v6674_v1 }
0x132b   : > { %5800 = vmatmul.mubr.msk.f32.vlgmr.msra.gmra.mrb[26].mxu1 %vm1116_vm7, %v2875_v6  ;;  %5811 = vmatmul.mubr.msk.f32.vlgmr.msra.gmra.mrb[26].mxu0 %vm1116_vm7, %v2875_v6 }
0x132c   : > { %6135 = vmatpush3.bf16.msra.mxu1 %v7090_v37  ;;  %6141 = vmatpush3.bf16.msra.mxu0 %v7055_v26 }
0x132d   : > { %6136 = vmatprep.subr.bf16.mxu1 %v6674_v1  ;;  %6142 = vmatprep.subr.bf16.mxu0 %v6674_v1 }
0x132e   : > { %5821 = vmatprep.mubr.msk.f32.mxu1 %vm6676_vm0, %v6675_v2  ;;  %5832 = vmatprep.mubr.msk.f32.mxu0 %vm6676_vm0, %v6675_v2 }
0x1330   : > { %6138 = vmatpush3.bf16.msra.mxu1 %v7100_v44  ;;  %6144 = vmatpush3.bf16.msra.mxu0 %v7061_v28 }
0x1331   : > { %6145 = vmatprep.subr.bf16.mxu1 %v6674_v1  ;;  %6151 = vmatprep.subr.bf16.mxu0 %v6674_v1 }
0x13f6   : > { %v2944_v7 = vpop.f32.mrb[24].mxu1  ;;  %v3018_v8 = vpop.f32.mrb[24].mxu0 }
0x13f7   : > { %v5779_v10 = vpop.f32.mrb[25].mxu1  ;;  %v5790_v11 = vpop.f32.mrb[25].mxu0  ;;  %v3023_v19 = vrot.slane %v3018_v8, 3  ;;  %v2949_v27 = vrot.slane %v2944_v7, 3 }
0x13f9   : > { %v2951_v29 = vadd.f32 %v2949_v27, %v7138_v63 }
0x13fb   : > { %v5278_v30 = vmul.f32 -1.442695, %v2951_v29 }
0x13fe   : > { %v3094_v12 = vpop.f32.mrb[26].mxu1  ;;  %v3170_v14 = vpop.f32.mrb[26].mxu0 }
0x13ff   : > { %v3099_v16 = vrot.slane %v3094_v12, 3  ;;  %v5801_v17 = vpop.f32.mrb[27].mxu1  ;;  %v5812_v18 = vpop.f32.mrb[27].mxu0  ;;  %v3175_v20 = vrot.slane %v3170_v14, 3 }
0x1401   : > { %3100 = vrot.lane.b32.xlu0 %v3099_v16, %s6677_s2 }
0x1405   : > { %3024 = vrot.lane.b32.xlu0 %v3023_v19, %s6678_s24 }
0x1409   : > { %3176 = vrot.lane.b32.xlu0 %v3175_v20, %s6679_s3 }
0x1473   : > { %v3101_v22 = vpop.permute.xlu0 %3100 }
0x1474   : > { %v3103_v24 = vadd.f32 %v3101_v22, %v7138_v63 }
0x1476   : > { %6398 = vtanh.f32 %v3103_v24 }
0x1477   : > { %6400 = vpow2.f32 %v5278_v30  ;;  %v3025_v39 = vpop.permute.xlu0 %3024 }
0x1478   : > { %v3027_v40 = vadd.f32 %v3025_v39, %v7138_v63 }
0x147a   : > { %v5279_v41 = vmul.f32 -1.442695, %v3027_v40 }
0x147b   : > { %v3177_v53 = vpop.permute.xlu0 %3176 }
0x147c   : > { %v3179_v54 = vadd.f32 %v3177_v53, %v7138_v63 }
0x147e   : > { %v5280_v56 = vmul.f32 -1.442695, %v3179_v54 }
0x1480   : > { %v6399_v25 = vpop.eup %6398 }
0x1481   : > { %3204 = vrot.lane.b32.xlu1 %v6399_v25, %s6677_s2  ;;  %v6401_v32 = vpop.eup %6400 }
0x1482   : > { %v3183_v33 = vadd.f32 1.0, %v6401_v32 }
0x1484   : > { %6402 = vrcp.f32 %v3183_v33 }
0x1485   : > { %6404 = vpow2.f32 %v5279_v41 }
0x148e   : > { %v6403_v35 = vpop.eup %6402 }
0x148f   : > { %v6405_v42 = vpop.eup %6404 }
0x1490   : > { %v3189_v43 = vadd.f32 1.0, %v6405_v42 }
0x1492   : > { %6406 = vrcp.f32 %v3189_v43 }
0x149c   : > { %v6407_v45 = vpop.eup %6406 }
0x149d   : > { %v3202_v48 = vmul.f32 %v6407_v45, %v3200_v46 }
0x14f3   : > { %v3205_v36 = vpop.permute.xlu1 %3204 }
0x14f4   : > { %v3207_v38 = vmul.f32 %v6403_v35, %v3205_v36 }
0x14f6   : > { %3209 = vrot.lane.b32.xlu1 %v3207_v38, %s6678_s24 }
0x1568   : > { %v3210_v49 = vpop.permute.xlu1 %3209 }
0x1569   : > { %v7374_v51 = vadd.f32 %v3210_v49, %v3202_v48 }
0x156b   : > { %6408 = vtanh.f32 %v7374_v51  ;;  %v3554_v38 = vrot.slane %v7374_v51, 7 }
0x156c   : > { %6410 = vpow2.f32 %v5280_v56 }
0x1575   : > { %v6409_v52 = vpop.eup %6408 }
0x1576   : > { %3215 = vrot.lane.b32.xlu1 %v6409_v52, %s6677_s2  ;;  %v6411_v57 = vpop.eup %6410 }
0x1577   : > { %v3196_v58 = vadd.f32 1.0, %v6411_v57 }
0x1579   : > { %6412 = vrcp.f32 %v3196_v58 }
0x1583   : > { %v6413_v59 = vpop.eup %6412 }
0x15e8   : > { %v3216_v61 = vpop.permute.xlu1 %3215 }
0x15e9   : > { %v7379_v55 = vmul.f32 %v6413_v59, %v3216_v61 }
0x15eb   : > { %v3227_v62 = vrot.slane %v7379_v55, 5 }
0x15ed   : > { %3228 = vrot.lane.b32.xlu0 %v3227_v62, %s6678_s24 }
0x165f   : > { %v3229_v0 = vpop.permute.xlu0 %3228 }
0x1660   : > { %5822 = vmatmul.mubr.msk.f32.vlgmr.msra.gmra.mrb[28].mxu1 %vm1116_vm7, %v3229_v0  ;;  %5833 = vmatmul.mubr.msk.f32.vlgmr.msra.gmra.mrb[28].mxu0 %vm1116_vm7, %v3229_v0 }
0x1661   : > { %6147 = vmatpush3.bf16.msra.mxu1 %v7112_v47  ;;  %6153 = vmatpush3.bf16.msra.mxu0 %v7065_v31 }
0x1662   : > { %6148 = vmatprep.subr.bf16.mxu1 %v6674_v1  ;;  %6154 = vmatprep.subr.bf16.mxu0 %v6674_v1 }
0x1663   : > { %5843 = vmatprep.mubr.msk.f32.mxu1 %vm6676_vm0, %v6675_v2  ;;  %5854 = vmatprep.mubr.msk.f32.mxu0 %vm6676_vm0, %v6675_v2 }
0x1665   : > { %6150 = vmatpush3.bf16.msra.mxu1 %v7123_v50  ;;  %6156 = vmatpush3.bf16.msra.mxu0 %v7070_v34 }
0x1666   : > { %6157 = vmatprep.subr.bf16.mxu1 %v6674_v1  ;;  %6163 = vmatprep.subr.bf16.mxu0 %v6674_v1 }
0x1668   : > { %5844 = vmatmul.mubr.msk.f32.vlgmr.msra.gmra.mrb[30].mxu1 %vm1116_vm7, %v3229_v0  ;;  %5855 = vmatmul.mubr.msk.f32.vlgmr.msra.gmra.mrb[30].mxu0 %vm1116_vm7, %v3229_v0 }
0x1669   : > { %6159 = vmatpush3.bf16.msra.mxu1 %v7090_v37  ;;  %6165 = vmatpush3.bf16.msra.mxu0 %v7055_v26 }
0x166a   : > { %6160 = vmatprep.subr.bf16.mxu1 %v6674_v1  ;;  %6166 = vmatprep.subr.bf16.mxu0 %v6674_v1 }
0x166b   : > { %5865 = vmatprep.mubr.msk.f32.mxu1 %vm6676_vm0, %v6675_v2  ;;  %5876 = vmatprep.mubr.msk.f32.mxu0 %vm6676_vm0, %v6675_v2 }
0x166d   : > { %6162 = vmatpush3.bf16.msra.mxu1 %v7100_v44  ;;  %6168 = vmatpush3.bf16.msra.mxu0 %v7061_v28 }
0x166e   : > { %6169 = vmatprep.subr.bf16.mxu1 %v6674_v1  ;;  %6175 = vmatprep.subr.bf16.mxu0 %v6674_v1 }
0x1733   : > { %v3298_v37 = vpop.f32.mrb[28].mxu1  ;;  %v3372_v26 = vpop.f32.mrb[28].mxu0 }
0x1734   : > { %v5823_v3 = vpop.f32.mrb[29].mxu1  ;;  %v5834_v4 = vpop.f32.mrb[29].mxu0  ;;  %v3377_v12 = vrot.slane %v3372_v26, 2  ;;  %v3303_v17 = vrot.slane %v3298_v37, 2 }
0x1736   : > { %v3305_v18 = vadd.f32 %v3303_v17, %v7138_v63 }
0x1738   : > { %v5285_v19 = vmul.f32 -1.442695, %v3305_v18 }
0x173b   : > { %v3448_v6 = vpop.f32.mrb[30].mxu1  ;;  %v3524_v7 = vpop.f32.mrb[30].mxu0 }
0x173c   : > { %v3453_v8 = vrot.slane %v3448_v6, 2  ;;  %v5845_v10 = vpop.f32.mrb[31].mxu1  ;;  %v5856_v11 = vpop.f32.mrb[31].mxu0  ;;  %v3529_v44 = vrot.slane %v3524_v7, 2 }
0x173e   : > { %3454 = vrot.lane.b32.xlu1 %v3453_v8, %s6677_s2 }
0x1742   : > { %3378 = vrot.lane.b32.xlu1 %v3377_v12, %s6678_s24 }
0x1746   : > { %3530 = vrot.lane.b32.xlu1 %v3529_v44, %s6679_s3 }
0x17b0   : > { %v3455_v28 = vpop.permute.xlu1 %3454 }
0x17b1   : > { %v3457_v14 = vadd.f32 %v3455_v28, %v7138_v63 }
0x17b3   : > { %6414 = vtanh.f32 %v3457_v14 }
0x17b4   : > { %6416 = vpow2.f32 %v5285_v19  ;;  %v3379_v29 = vpop.permute.xlu1 %3378 }
0x17b5   : > { %v3381_v30 = vadd.f32 %v3379_v29, %v7138_v63 }
0x17b7   : > { %v5286_v32 = vmul.f32 -1.442695, %v3381_v30 }
0x17b8   : > { %v3531_v43 = vpop.permute.xlu1 %3530 }
0x17b9   : > { %v3533_v45 = vadd.f32 %v3531_v43, %v7138_v63 }
0x17bb   : > { %v5287_v46 = vmul.f32 -1.442695, %v3533_v45  ;;  %v3939_v45 = vld [vmem:[#allocation11 + $0x18] sm:$0xff] }
0x17bd   : > { %v6415_v16 = vpop.eup %6414 }
0x17be   : > { %3558 = vrot.lane.b32.xlu0 %v6415_v16, %s6677_s2  ;;  %v6417_v20 = vpop.eup %6416 }
0x17bf   : > { %v3537_v22 = vadd.f32 1.0, %v6417_v20 }
0x17c1   : > { %6418 = vrcp.f32 %v3537_v22 }
0x17c2   : > { %6420 = vpow2.f32 %v5286_v32 }
0x17cb   : > { %v6419_v24 = vpop.eup %6418 }
0x17cc   : > { %v6421_v33 = vpop.eup %6420 }
0x17cd   : > { %v3543_v35 = vadd.f32 1.0, %v6421_v33 }
0x17cf   : > { %6422 = vrcp.f32 %v3543_v35 }
0x17d9   : > { %v6423_v36 = vpop.eup %6422 }
0x17da   : > { %v3556_v39 = vmul.f32 %v6423_v36, %v3554_v38  ;;  %v4022_v36 = vld [vmem:[%s7852_s11 + $0x10] sm:$0xff] }
0x1830   : > { %v3559_v25 = vpop.permute.xlu0 %3558 }
0x1831   : > { %v3561_v27 = vmul.f32 %v6419_v24, %v3559_v25 }
0x1833   : > { %3563 = vrot.lane.b32.xlu0 %v3561_v27, %s6678_s24 }
0x18a5   : > { %v3564_v40 = vpop.permute.xlu0 %3563 }
0x18a6   : > { %v7420_v41 = vadd.f32 %v3564_v40, %v3556_v39  ;;  %v3936_v39 = vld [vmem:[#allocation11] sm:$0xff] }
0x18a8   : > { %6424 = vtanh.f32 %v7420_v41  ;;  %v3908_v12 = vrot.slane %v7420_v41, 7  ;;  %v4025_v41 = vld [vmem:[%s7852_s11 + $0x28] sm:$0xff] }
0x18a9   : > { %6426 = vpow2.f32 %v5287_v46 }
0x18b2   : > { %v6425_v42 = vpop.eup %6424 }
0x18b3   : > { %3569 = vrot.lane.b32.xlu0 %v6425_v42, %s6677_s2  ;;  %v6427_v48 = vpop.eup %6426  ;;  %v3938_v42 = vld [vmem:[#allocation11 + $0x10] sm:$0xff] }
0x18b4   : > { %v3550_v49 = vadd.f32 1.0, %v6427_v48  ;;  %v6185_v46 = vpack.c.bf16 %v3939_v45, %v3938_v42  ;;  %v4498_v45 = vld [vmem:[%s7856_s15 + $0x28] sm:$0xff] }
0x18b6   : > { %6428 = vrcp.f32 %v3550_v49 }
0x18c0   : > { %v6429_v52 = vpop.eup %6428 }
0x1925   : > { %v3570_v53 = vpop.permute.xlu0 %3569 }
0x1926   : > { %v7425_v51 = vmul.f32 %v6429_v52, %v3570_v53 }
0x1928   : > { %v3581_v54 = vrot.slane %v7425_v51, 6 }
0x192a   : > { %3582 = vrot.lane.b32.xlu1 %v3581_v54, %s6678_s24 }
0x199c   : > { %v3583_v56 = vpop.permute.xlu1 %3582 }
0x199d   : > { %5866 = vmatmul.mubr.msk.f32.vlgmr.msra.gmra.mrb[32].mxu1 %vm1116_vm7, %v3583_v56  ;;  %5877 = vmatmul.mubr.msk.f32.vlgmr.msra.gmra.mrb[32].mxu0 %vm1116_vm7, %v3583_v56 }
0x199e   : > { %6171 = vmatpush3.bf16.msra.mxu1 %v7112_v47  ;;  %6177 = vmatpush3.bf16.msra.mxu0 %v7065_v31 }
0x199f   : > { %6172 = vmatprep.subr.bf16.mxu1 %v6674_v1  ;;  %6178 = vmatprep.subr.bf16.mxu0 %v6674_v1 }
0x19a0   : > { %5887 = vmatprep.mubr.msk.f32.mxu1 %vm6676_vm0, %v6675_v2  ;;  %5898 = vmatprep.mubr.msk.f32.mxu0 %vm6676_vm0, %v6675_v2 }
0x19a2   : > { %6174 = vmatpush3.bf16.msra.mxu1 %v7123_v50  ;;  %6180 = vmatpush3.bf16.msra.mxu0 %v7070_v34 }
0x19a3   : > { %6187 = vmatprep.subr.bf16.mxu0 %v6674_v1  ;;  %6181 = vmatprep.subr.bf16.mxu1 %v6674_v1 }
0x19a5   : > { %5888 = vmatmul.mubr.msk.f32.vlgmr.msra.gmra.mrb[34].mxu1 %vm1116_vm7, %v3583_v56  ;;  %5899 = vmatmul.mubr.msk.f32.vlgmr.msra.gmra.mrb[34].mxu0 %vm1116_vm7, %v3583_v56 }
0x19a6   : > { %5909 = vmatprep.mubr.msk.f32.mxu1 %vm6676_vm0, %v6675_v2  ;;  %5920 = vmatprep.mubr.msk.f32.mxu0 %vm6676_vm0, %v6675_v2 }
0x1a70   : > { %v3652_v31 = vpop.f32.mrb[32].mxu1  ;;  %v3726_v47 = vpop.f32.mrb[32].mxu0 }
0x1a71   : > { %v5867_v57 = vpop.f32.mrb[33].mxu1  ;;  %v5878_v50 = vpop.f32.mrb[33].mxu0  ;;  %v3731_v0 = vrot.slane %v3726_v47, 1  ;;  %v3657_v14 = vrot.slane %v3652_v31, 1  ;;  %v4028_v47 = vld [vmem:[%s7854_s13 + $0x10] sm:$0xff] }
0x1a72   : > { %v4029_v57 = vld [vmem:[%s7854_s13 + $0x18] sm:$0xff]  ;;  %v4020_v50 = vld [vmem:[%s7852_s11] sm:$0xff] }
0x1a73   : > { %v3659_v16 = vadd.f32 %v3657_v14, %v7138_v63  ;;  %v5302_v14 = vld [vmem:[%s7855_s14] ss:$0 sm:$0xff] }
0x1a75   : > { %v5292_v17 = vmul.f32 -1.442695, %v3659_v16 }
0x1a78   : > { %v3802_v58 = vpop.f32.mrb[34].mxu1  ;;  %v3878_v34 = vpop.f32.mrb[34].mxu0 }
0x1a79   : > { %v3807_v59 = vrot.slane %v3802_v58, 1  ;;  %v5889_v61 = vpop.f32.mrb[35].mxu1  ;;  %v5900_v62 = vpop.f32.mrb[35].mxu0  ;;  %v3883_v37 = vrot.slane %v3878_v34, 1  ;;  %v4021_v58 = vld [vmem:[%s7852_s11 + $0x8] sm:$0xff]  ;;  %v6197_v34 = vpack.c.bf16 %v4029_v57, %v4028_v47 }
0x1a7a   : > { %v4030_v61 = vld [vmem:[%s7854_s13 + $0x20] sm:$0xff]  ;;  %v4031_v62 = vld [vmem:[%s7854_s13 + $0x28] sm:$0xff] }
0x1a7b   : > { %3808 = vrot.lane.b32.xlu0 %v3807_v59, %s6677_s2  ;;  %v6194_v59 = vpack.c.bf16 %v4021_v58, %v4020_v50  ;;  %v7595_v57 = vld [vmem:[%s7927_s1] sm:$0x1f]  ;;  %v6680_v50 = vmov -10000.0   ;;  %s6590_s1 = scalar_lea.vmem %s5055_s29, 128 }
0x1a7c   : > { %p6591_p8 = scmp.ne.s32.totalorder %s5055_s29, %s6590_s1 }
0x1a7f   : > { %3732 = vrot.lane.b32.xlu0 %v3731_v0, %s6678_s24  ;;  %v4026_v0 = vld [vmem:[%s7854_s13] sm:$0xff] }
0x1a83   : > { %3884 = vrot.lane.b32.xlu0 %v3883_v37, %s6679_s3  ;;  %v4027_v37 = vld [vmem:[%s7854_s13 + $0x8] sm:$0xff]  ;;  %s7928_s3 = sld [smem:[#allocation32_spill]] }
0x1a87   : > { %1804 = vrot.lane.b32.xlu0 %v7195_v23, %s6678_s24 }
0x1a8b   : > { %2512 = vrot.lane.b32.xlu0 %v7287_v5, %s6678_s24 }
0x1a8f   : > { %3220 = vrot.lane.b32.xlu0 %v7379_v55, %s6678_s24 }
0x1aed   : > { %v3809_v26 = vpop.permute.xlu0 %3808 }
0x1aee   : > { %v3811_v3 = vadd.f32 %v3809_v26, %v7138_v63 }
0x1af0   : > { %6430 = vtanh.f32 %v3811_v3  ;;  %v6200_v3 = vpack.c.bf16 %v4031_v62, %v4030_v61 }
0x1af1   : > { %v3733_v4 = vpop.permute.xlu0 %3732 }
0x1af2   : > { %v3735_v6 = vadd.f32 %v3733_v4, %v7138_v63  ;;  %v6203_v4 = vpack.c.bf16 %v4027_v37, %v4026_v0 }
0x1af4   : > { %v5293_v7 = vmul.f32 -1.442695, %v3735_v6 }
0x1af5   : > { %v3885_v8 = vpop.permute.xlu0 %3884 }
0x1af6   : > { %6432 = vpow2.f32 %v5293_v7  ;;  %v3887_v30 = vadd.f32 %v3885_v8, %v7138_v63  ;;  %v4024_v63 = vld [vmem:[%s7852_s11 + $0x20] sm:$0xff] }
0x1af7   : > { %v6191_v43 = vpack.c.bf16 %v4025_v41, %v4024_v63  ;;  %v4496_v63 = vld [vmem:[%s7856_s15 + $0x18] sm:$0xff] }
0x1af8   : > { %v5294_v32 = vmul.f32 -1.442695, %v3887_v30 }
0x1af9   : > { %v1805_v10 = vpop.permute.xlu0 %1804 }
0x1afa   : > { %v6431_v23 = vpop.eup %6430  ;;  %1808 = vst.msk [vmem:[#allocation2] sm:$0x2] %vm1807_vm10, %v1805_v10  ;;  %vm3931_vm10 = vcmask 130055  }
0x1afb   : > { %1810 = vst.msk [vmem:[#allocation2 + $0x5] sm:$0x2] %vm1809_vm11, %v1805_v10  ;;  %3912 = vrot.lane.b32.xlu1 %v6431_v23, %s6677_s2  ;;  %vm3933_vm11 = vcmask 261255  }
0x1afd   : > { %v2513_v5 = vpop.permute.xlu0 %2512 }
0x1afe   : > { %2516 = vst.msk [vmem:[#allocation2] sm:$0x8] %vm2515_vm12, %v2513_v5 }
0x1aff   : > { %2518 = vst.msk [vmem:[#allocation2 + $0x1] sm:$0x8] %vm2517_vm13, %v2513_v5  ;;  %v5299_v5 = vld [vmem:[%s7853_s12] ss:$0 sm:$0xff] }
0x1b00   : > { %v6433_v55 = vpop.eup %6432 }
0x1b01   : > { %v3897_v11 = vadd.f32 1.0, %v6433_v55 }
0x1b03   : > { %6434 = vrcp.f32 %v3897_v11 }
0x1b04   : > { %6436 = vpow2.f32 %v5292_v17 }
0x1b0d   : > { %v6435_v44 = vpop.eup %6434 }
0x1b0e   : > { %v3910_v28 = vmul.f32 %v6435_v44, %v3908_v12  ;;  %v6437_v18 = vpop.eup %6436 }
0x1b0f   : > { %v3891_v19 = vadd.f32 1.0, %v6437_v18 }
0x1b11   : > { %6438 = vrcp.f32 %v3891_v19 }
0x1b1b   : > { %v6439_v20 = vpop.eup %6438 }
0x1b6d   : > { %v3913_v22 = vpop.permute.xlu1 %3912 }
0x1b6e   : > { %v3915_v24 = vmul.f32 %v6439_v20, %v3913_v22  ;;  %v4405_v22 = vld [vmem:[%s7858_s17] sm:$0xff] }
0x1b70   : > { %3917 = vrot.lane.b32.xlu1 %v3915_v24, %s6678_s24 }
0x1be2   : > { %v3918_v25 = vpop.permute.xlu1 %3917 }
0x1be3   : > { %v3920_v27 = vadd.f32 %v3918_v25, %v3910_v28 }
0x1be5   : > { %6440 = vtanh.f32 %v3920_v27 }
0x1be6   : > { %6442 = vpow2.f32 %v5294_v32 }
0x1bef   : > { %v6441_v29 = vpop.eup %6440 }
0x1bf0   : > { %3923 = vrot.lane.b32.xlu1 %v6441_v29, %s6677_s2  ;;  %v6443_v33 = vpop.eup %6442  ;;  %s6681_s2 = smov [#allocation12]  }
0x1bf1   : > { %v3904_v35 = vadd.f32 1.0, %v6443_v33 }
0x1bf3   : > { %6444 = vrcp.f32 %v3904_v35 }
0x1bf4   : > { %2158 = vrot.lane.b32.xlu1 %v7241_v13, %s6678_s24  ;;  %v4023_v13 = vld [vmem:[%s7852_s11 + $0x18] sm:$0xff] }
0x1bf5   : > { %v6188_v38 = vpack.c.bf16 %v4023_v13, %v4022_v36  ;;  %v4493_v36 = vld [vmem:[%s7856_s15] sm:$0xff]  ;;  %v4494_v13 = vld [vmem:[%s7856_s15 + $0x8] sm:$0xff] }
0x1bf7   : > { %6189 = vmatpush3.bf16.msra.mxu0 %v6188_v38 }
0x1bf8   : > { %2866 = vrot.lane.b32.xlu1 %v7333_v60, %s6678_s24  ;;  %v3937_v60 = vld [vmem:[#allocation11 + $0x8] sm:$0xff]  ;;  %6190 = vmatprep.subr.bf16.mxu0 %v6674_v1 }
0x1bf9   : > { %v6182_v40 = vpack.c.bf16 %v3937_v60, %v3936_v39  ;;  %v6212_v39 = vpack.c.bf16 %v4494_v13, %v4493_v36 }
0x1bfb   : > { %6183 = vmatpush3.bf16.msra.mxu1 %v6182_v40  ;;  %6192 = vmatpush3.bf16.msra.mxu0 %v6191_v43  ;;  %v4495_v40 = vld [vmem:[%s7856_s15 + $0x10] sm:$0xff]  ;;  %v4497_v43 = vld [vmem:[%s7856_s15 + $0x20] sm:$0xff] }
0x1bfc   : > { %3574 = vrot.lane.b32.xlu1 %v7425_v51, %s6678_s24  ;;  %6184 = vmatprep.subr.bf16.mxu1 %v6674_v1  ;;  %v3221_v51 = vpop.permute.xlu0 %3220  ;;  %v6215_v42 = vpack.c.bf16 %v4496_v63, %v4495_v40  ;;  %v4730_v40 = vsub.s32 2, %v7029_v15 }
0x1bfd   : > { %6196 = vmatprep.subr.bf16.mxu0 %v6674_v1  ;;  %v6445_v48 = vpop.eup %6444 }
0x1bff   : > { %6186 = vmatpush3.bf16.msra.mxu1 %v6185_v46  ;;  %v6206_v46 = vpack.c.bf16 %v4498_v45, %v4497_v43 }
0x1c00   : > { %6193 = vmatprep.subr.bf16.mxu1 %v6674_v1 }
0x1c62   : > { %v3924_v49 = vpop.permute.xlu1 %3923 }
0x1c63   : > { %v3926_v52 = vmul.f32 %v6445_v48, %v3924_v49  ;;  %v4499_v48 = vld [vmem:[%s7856_s15 + $0x30] sm:$0xff]  ;;  %v4500_v49 = vld [vmem:[%s7856_s15 + $0x38] sm:$0xff] }
0x1c65   : > { %3928 = vrot.lane.b32.xlu0 %v3926_v52, %s6678_s24  ;;  %v6209_v52 = vpack.c.bf16 %v4500_v49, %v4499_v48  ;;  %s7931_s24 = sld [smem:[#allocation36_spill]] }
0x1c66   : > { %v2159_v53 = vpop.permute.xlu1 %2158 }
0x1c67   : > { %2162 = vst.msk [vmem:[#allocation2] sm:$0x4] %vm2161_vm14, %v2159_v53 }
0x1c68   : > { %2164 = vst.msk [vmem:[#allocation2 + $0x3] sm:$0x4] %vm2163_vm15, %v2159_v53 }
0x1c69   : > { %3224 = vst.msk [vmem:[#allocation2] sm:$0x20] %vm3223_vm1, %v3221_v51 }
0x1c6a   : > { %3226 = vst.msk [vmem:[#allocation2 - $0x3] sm:$0x20] %vm3225_vm2, %v3221_v51  ;;  %v2867_v54 = vpop.permute.xlu1 %2866 }
0x1c6b   : > { %2870 = vst.msk [vmem:[#allocation2] sm:$0x10] %vm2869_vm3, %v2867_v54 }
0x1c6c   : > { %2872 = vst.msk [vmem:[#allocation2 - $0x1] sm:$0x10] %vm2871_vm4, %v2867_v54  ;;  %vm4890_vm4 = vcmask 36868  }
0x1c6e   : > { %v3575_v56 = vpop.permute.xlu1 %3574 }
0x1c6f   : > { %3578 = vst.msk [vmem:[#allocation2] sm:$0x40] %vm3577_vm8, %v3575_v56  ;;  %vm5030_vm8 = vcmask 7168  }
0x1c70   : > { %3580 = vst.msk [vmem:[#allocation2 - $0x5] sm:$0x40] %vm3579_vm9, %v3575_v56 }
0x1cd7   : > { %v3929_v31 = vpop.permute.xlu0 %3928 }
0x1cd8   : > { %3932 = vst.msk [vmem:[#allocation2] sm:$0x80] %vm3931_vm10, %v3929_v31 }
0x1cd9   : > { %3934 = vst.msk [vmem:[#allocation2 - $0x7] sm:$0x80] %vm3933_vm11, %v3929_v31 }
0x1ce0   : > { %v7513_v26 = vld [vmem:[#allocation2] sm:$0xff] }
0x1ce1   : > { %5910 = vmatmul.mubr.msk.f32.vlgmr.msra.gmra.mrb[36].mxu1 %vm1116_vm7, %v7513_v26  ;;  %5921 = vmatmul.mubr.msk.f32.vlgmr.msra.gmra.mrb[36].mxu0 %vm1116_vm7, %v7513_v26 }
0x1ce2   : > { %6198 = vmatpush3.bf16.msra.mxu0 %v6197_v34  ;;  %6195 = vmatpush3.bf16.msra.mxu1 %v6194_v59 }
0x1ce3   : > { %5927 = vmatprep.mubr.msk.f32.mxu1 %vm6676_vm0, %v6675_v2  ;;  %6199 = vmatprep.subr.bf16.mxu0 %v6674_v1 }
0x1ce4   : > { %6202 = vmatprep.subr.bf16.mxu1 %v6674_v1  ;;  %5938 = vmatprep.mubr.msk.f32.mxu0 %vm6676_vm0, %v6675_v2 }
0x1ce5   : > { %5928 = vmatmul.mubr.msk.f32.vlgmr.msra.gmra.mrb[38].mxu1 %vm945_vm5, %v7034_v21 }
0x1ce6   : > { %6201 = vmatpush3.bf16.msra.mxu0 %v6200_v3  ;;  %6204 = vmatpush3.bf16.msra.mxu1 %v6203_v4  ;;  %v5308_v4 = vld [vmem:[%s7928_s3] ss:$0 sm:$0xff]  ;;  %s7735_s3 = scalar_lea.vmem %s7931_s24, %s7001_s26  ;;  %s7932_s26 = sld [smem:[#allocation22_spill]] }
0x1ce7   : > { %5945 = vmatprep.mubr.msk.f32.mxu1 %vm6676_vm0, %v6675_v2  ;;  %5948 = vmatprep.subr.mxu1 %v6675_v2  ;;  %s6594_s24 = sshll.u32 %s6681_s2, 4  ;;  %s6595_s24 = int_to_ptr.vmem [resolvable:$false] %s6594_s24 }
0x1ce8   : > { %5953 = vmatprep.subr.mxu0 %v6675_v2  ;;  %s6596_s6 = scalar_lea.vmem %s6595_s24, 256  ;;  %p6597_p6 = scmp.lt.s32.totalorder %s5055_s29, %s6595_s24 }
0x1ce9   : > { %5939 = vmatmul.mubr.msk.f32.vlgmr.msra.gmra.mrb[38].mxu0 %vm1116_vm7, %v7513_v26  ;;  %5946 = vmatmul.mubr.msk.f32.vlgmr.msra.gmra.mrb[40].mxu1 %vm945_vm5, %v7034_v21  ;;  %v5295_v21 = vld [vmem:[%s7851_s10] ss:$0 sm:$0xff]  ;;  %vm4406_vm5 = vcmp.gt.f32.partialorder %v4405_v22, 0.0  ;;  %p6598_p9 = scmp.lt.s32.totalorder %s6596_s6, %s6590_s1 }
0x1cea   : > { %5950 = vmatprep.mubr.msk.f32.mxu1 %vm6676_vm0, %v6675_v2  ;;  %5955 = vmatprep.mubr.msk.f32.mxu0 %vm6676_vm0, %v6675_v2 }
0x1ceb   : > { %p6599_p5 = por %p6598_p9, %p6597_p6 }
0x1cec   : > { %p7934_p11 = scmp.ne.s32.totalorder %s7932_s26, 0 }
0x1cee   : > { %p6592_p13 = pnand %p6591_p8, %p7934_p11 }
0x1cf0   : > { %p6593_p1 = pneg %p6592_p13 }
0x1cf2   : > { %p6600_p0 = pnand %p6599_p5, %p6593_p1 }
0x1db4   : > { %v4016_v6 = vpop.f32.mrb[36].mxu1  ;;  %v4098_v7 = vpop.f32.mrb[36].mxu0 }
0x1db5   : > { %v5911_v8 = vpop.f32.mrb[37].mxu1  ;;  %v5922_v10 = vpop.f32.mrb[37].mxu0  ;;  %v4017_v19 = vadd.f32 %v5295_v21, %v4016_v6 }
0x1db8   : > { %v4168_v23 = vpop.f32.mrb[38].mxu1 }
0x1db9   : > { %v4169_v55 = vadd.f32 %v4168_v23, %v4098_v7  ;;  %v5929_v11 = vpop.f32.mrb[39].mxu1  ;;  %v4672_v23 = vsub.s32 0, %v7029_v15 }
0x1dbb   : > { %v4179_v12 = vadd.f32 %v5299_v5, %v4169_v55 }
0x1dbc   : > { %v4246_v44 = vpop.f32.mrb[38].mxu0  ;;  %v4316_v28 = vpop.f32.mrb[40].mxu1 }
0x1dbd   : > { %v5940_v16 = vpop.f32.mrb[39].mxu0  ;;  %v4317_v17 = vadd.f32 %v4316_v28, %v4246_v44  ;;  %v5947_v18 = vpop.f32.mrb[41].mxu1  ;;  %5949 = vmatpush3.xpose.msk.msra.mxu1 %vm1116_vm7, %v4179_v12 }
0x1dbe   : > { %6205 = vmatprep.subr.bf16.mxu1 %v6674_v1 }
0x1dbf   : > { %v4327_v20 = vadd.f32 %v5302_v14, %v4317_v17 }
0x1dc0   : > { %5951 = vmatmul.mubr.msk.f32.vlgmr.msra.gmra.mrb[42].mxu1 %vm1116_vm7, %v4017_v19 }
0x1dc1   : > { %5954 = vmatpush3.msra.mxu0 %v4327_v20  ;;  %5966 = vmatprep.mubr.msk.f32.mxu1 %vm6676_vm0, %v6675_v2 }
0x1dc2   : > { %6211 = vmatprep.subr.bf16.mxu0 %v6674_v1  ;;  %6207 = vmatpush3.bf16.msra.mxu1 %v6206_v46 }
0x1dc3   : > { %6208 = vmatprep.subr.bf16.mxu1 %v6674_v1 }
0x1dc6   : > { %6210 = vmatpush3.bf16.msra.mxu1 %v6209_v52 }
0x1e93   : > { %v4400_v24 = vpop.f32.mrb[42].mxu1 }
0x1e94   : > { %v4404_v25 = vmul.f32 0.17677669, %v4400_v24  ;;  %v5952_v27 = vpop.f32.mrb[43].mxu1 }
0x1e96   : > { %v4407_v29 = vsel %vm4406_vm5, %v4404_v25, -1e+30 }
0x1e97   : > { %v4408_v30 = vsel %vm867_vm6, %v4407_v29, -inf }
0x1e98   : > { %4409 = vmax.xlane.f32.xlu1 %v4408_v30 }
0x1f25   : > { %v4410_v32 = vpop.xlane.xlu1 %4409 }
0x1f26   : > { %v4411_v33 = vsub.f32 %v4407_v29, %v4410_v32 }
0x1f28   : > { %v4412_v35 = vmul.f32 1.442695, %v4411_v33 }
0x1f2a   : > { %6446 = vpow2.f32 %v4412_v35 }
0x1f34   : > { %v6447_v38 = vpop.eup %6446 }
0x1f35   : > { %v4414_v60 = vmul.f32 %v6447_v38, %v4405_v22  ;;  %v4701_v22 = vsub.s32 1, %v7029_v15 }
0x1f37   : > { %5956 = vmatmul.mubr.msk.f32.vlgmr.msra.gmra.mrb[40].mxu0 %vm867_vm6, %v4414_v60  ;;  %v4415_v41 = vsel %vm867_vm6, %v4414_v60, 0.0  ;;  %vm4661_vm6 = vcmask 36864  }
0x1f38   : > { %6213 = vmatpush3.bf16.msra.mxu0 %v6212_v39  ;;  %4416 = vadd.xlane.f32.xlu0 %v4415_v41 }
0x1f39   : > { %6214 = vmatprep.subr.bf16.mxu0 %v6674_v1  ;;  %5977 = vmatprep.mubr.msk.f32.mxu0 %vm6676_vm0, %v6675_v2  ;;  %vm4658_vm0 = vcmp.eq.s32.totalorder %v7029_v15, 3 }
0x1f3a   : > { %v4659_v58 = vsel %vm4658_vm0, 0.0, %v6680_v50  ;;  %vm4911_vm0 = vcmask 4100  }
0x1f3b   : > { %v4660_v34 = vadd.f32 %v4659_v58, %v7595_v57 }
0x1f3c   : > { %6216 = vmatpush3.bf16.msra.mxu0 %v6215_v42 }
0x1f3d   : > { %v4662_v59 = vsel %vm4661_vm6, %v4660_v34, -inf }
0x1f3e   : > { %v4663_v61 = vrot.slane %v4662_v59, 4 }
0x1f3f   : > { %5978 = vmatmul.mubr.msk.f32.vlgmr.msra.gmra.mrb[42].mxu0 %vm1116_vm7, %v7513_v26 }
0x1f40   : > { %v4664_v62 = vmax.f32 %v4662_v59, %v4663_v61 }
0x1f42   : > { %v4665_v0 = vrot.slane %v4664_v62, 2 }
0x1f44   : > { %v4666_v37 = vmax.f32 %v4664_v62, %v4665_v0 }
0x1f46   : > { %v4667_v26 = vrot.slane %v4666_v37, 1 }
0x1f48   : > { %v4668_v8 = vmax.f32 %v4666_v37, %v4667_v26 }
0x1fc5   : > { %v4417_v53 = vpop.xlane.xlu0 %4416 }
0x1fc6   : > { %6448 = vrcp.f32 %v4417_v53 }
0x1fd0   : > { %v6449_v51 = vpop.eup %6448 }
0x200a   : > { %v4487_v54 = vpop.f32.mrb[40].mxu0 }
0x200b   : > { %v4492_v56 = vmul.f32 %v6449_v51, %v4487_v54  ;;  %v5957_v31 = vpop.f32.mrb[41].mxu0 }
0x200c   : > { %v4759_v31 = vsub.s32 3, %v7029_v15 }
0x200d   : > { %5967 = vmatmul.mubr.msk.f32.vlgmr.msra.gmra.mrb[44].mxu1 %vm1116_vm7, %v4492_v56  ;;  %vm4655_vm7 = vcmp.eq.s32.totalorder %v7029_v15, %v7022_v9 }
0x200e   : > { %v7618_v55 = vsel %vm4655_vm7, 1.0, %v6675_v2 }
0x2012   : > { %v4640_v1 = vpop.f32.mrb[42].mxu0 }
0x2013   : > { %v5979_v47 = vpop.f32.mrb[43].mxu0 }
0x20e0   : > { %v4570_v3 = vpop.f32.mrb[44].mxu1 }
0x20e1   : > { %v4641_v6 = vadd.f32 %v4640_v1, %v4570_v3  ;;  %v5968_v7 = vpop.f32.mrb[45].mxu1 }
0x20e3   : > { %v7607_v10 = vadd.f32 %v5308_v4, %v4641_v6  ;;  %v4788_v6 = vsub.s32 4, %v7029_v15 }
0x20e5   : > { %v4669_v5 = vadd.f32 %v4668_v8, %v7607_v10  ;;  %4652 = vst [vmem:[%s746_s16] sm:$0xff] %v7607_v10 }
0x20e7   : > { %v4673_v11 = vrot.slane %v4669_v5, %v4672_v23 }
0x20e9   : > { %v4674_v21 = vmul.f32 %v7618_v55, %v4673_v11 }
0x20eb   : > { %v4675_v12 = vsel %vm4661_vm6, %v4674_v21, 0.0 }
0x20ec   : > { %4676 = vadd.xlane.f32.xlu0 %v4675_v12 }
0x2179   : > { %v4677_v44 = vpop.xlane.xlu0 %4676 }
0x217a   : > { %v7623_v28 = vadd.f32 %v4677_v44, %v7595_v57 }
0x217c   : > { %v4679_v14 = vsel %vm4661_vm6, %v7623_v28, -inf }
0x217d   : > { %v4680_v16 = vrot.slane %v4679_v14, 4 }
0x217f   : > { %v4681_v17 = vmax.f32 %v4679_v14, %v4680_v16 }
0x2181   : > { %v4682_v18 = vrot.slane %v4681_v17, 2 }
0x2183   : > { %v4683_v19 = vmax.f32 %v4681_v17, %v4682_v18 }
0x2185   : > { %v4684_v20 = vrot.slane %v4683_v19, 1 }
0x2187   : > { %v7627_v2 = vmax.f32 %v4683_v19, %v4684_v20  ;;  %v4817_v20 = vsub.s32 5, %v7029_v15 }
0x2189   : > { %vm4686_vm12 = vcmp.ge.f32.partialorder %v7623_v28, %v7627_v2  ;;  %v4698_v24 = vadd.f32 %v7627_v2, %v7607_v10 }
0x218b   : > { %v4702_v25 = vrot.slane %v4698_v24, %v4701_v22 }
0x218d   : > { %v4703_v27 = vmul.f32 %v7618_v55, %v4702_v25 }
0x218f   : > { %v4704_v29 = vsel %vm4661_vm6, %v4703_v27, 0.0 }
0x2190   : > { %4705 = vadd.xlane.f32.xlu1 %v4704_v29 }
0x221d   : > { %v4706_v30 = vpop.xlane.xlu1 %4705 }
0x221e   : > { %v7637_v32 = vadd.f32 %v4706_v30, %v7595_v57 }
0x2220   : > { %v4708_v33 = vsel %vm4661_vm6, %v7637_v32, -inf }
0x2221   : > { %v4709_v35 = vrot.slane %v4708_v33, 4 }
0x2223   : > { %v4710_v36 = vmax.f32 %v4708_v33, %v4709_v35 }
0x2225   : > { %v4711_v13 = vrot.slane %v4710_v36, 2 }
0x2227   : > { %v4712_v38 = vmax.f32 %v4710_v36, %v4711_v13 }
0x2229   : > { %v4713_v39 = vrot.slane %v4712_v38, 1 }
0x222b   : > { %v7641_v60 = vmax.f32 %v4712_v38, %v4713_v39 }
0x222d   : > { %vm4715_vm13 = vcmp.ge.f32.partialorder %v7637_v32, %v7641_v60  ;;  %v4727_v63 = vadd.f32 %v7641_v60, %v7607_v10 }
0x222f   : > { %v4731_v41 = vrot.slane %v4727_v63, %v4730_v40  ;;  %v4846_v63 = vsub.s32 6, %v7029_v15 }
0x2231   : > { %v4732_v42 = vmul.f32 %v7618_v55, %v4731_v41 }
0x2233   : > { %v4733_v43 = vsel %vm4661_vm6, %v4732_v42, 0.0 }
0x2234   : > { %4734 = vadd.xlane.f32.xlu0 %v4733_v43 }
0x22c1   : > { %v4735_v45 = vpop.xlane.xlu0 %4734 }
0x22c2   : > { %v7651_v46 = vadd.f32 %v4735_v45, %v7595_v57 }
0x22c4   : > { %v4737_v48 = vsel %vm4661_vm6, %v7651_v46, -inf }
0x22c5   : > { %v4738_v49 = vrot.slane %v4737_v48, 4 }
0x22c7   : > { %v4739_v52 = vmax.f32 %v4737_v48, %v4738_v49 }
0x22c9   : > { %v4740_v53 = vrot.slane %v4739_v52, 2 }
0x22cb   : > { %v4741_v51 = vmax.f32 %v4739_v52, %v4740_v53 }
0x22cd   : > { %v4742_v54 = vrot.slane %v4741_v51, 1 }
0x22cf   : > { %v7655_v56 = vmax.f32 %v4741_v51, %v4742_v54 }
0x22d1   : > { %vm4744_vm14 = vcmp.ge.f32.partialorder %v7651_v46, %v7655_v56  ;;  %v4756_v1 = vadd.f32 %v7655_v56, %v7607_v10 }
0x22d3   : > { %v4760_v47 = vrot.slane %v4756_v1, %v4759_v31 }
0x22d5   : > { %v4761_v50 = vmul.f32 %v7618_v55, %v4760_v47 }
0x22d7   : > { %v4762_v58 = vsel %vm4661_vm6, %v4761_v50, 0.0  ;;  %v4875_v50 = vsub.s32 7, %v7029_v15 }
0x22d8   : > { %4763 = vadd.xlane.f32.xlu1 %v4762_v58 }
0x2365   : > { %v4764_v34 = vpop.xlane.xlu1 %4763 }
0x2366   : > { %v7665_v59 = vadd.f32 %v4764_v34, %v7595_v57 }
0x2368   : > { %v4766_v61 = vsel %vm4661_vm6, %v7665_v59, -inf }
0x2369   : > { %v4767_v62 = vrot.slane %v4766_v61, 4 }
0x236b   : > { %v4768_v0 = vmax.f32 %v4766_v61, %v4767_v62 }
0x236d   : > { %v4769_v37 = vrot.slane %v4768_v0, 2 }
0x236f   : > { %v4770_v26 = vmax.f32 %v4768_v0, %v4769_v37 }
0x2371   : > { %v4771_v3 = vrot.slane %v4770_v26, 1 }
0x2373   : > { %v7669_v4 = vmax.f32 %v4770_v26, %v4771_v3 }
0x2375   : > { %vm4773_vm15 = vcmp.ge.f32.partialorder %v7665_v59, %v7669_v4  ;;  %v4785_v7 = vadd.f32 %v7669_v4, %v7607_v10 }
0x2377   : > { %v4789_v8 = vrot.slane %v4785_v7, %v4788_v6 }
0x2379   : > { %v4790_v23 = vmul.f32 %v7618_v55, %v4789_v8 }
0x237b   : > { %v4791_v5 = vsel %vm4661_vm6, %v4790_v23, 0.0 }
0x237c   : > { %4792 = vadd.xlane.f32.xlu0 %v4791_v5 }
0x2409   : > { %v4793_v11 = vpop.xlane.xlu0 %4792 }
0x240a   : > { %v7681_v21 = vadd.f32 %v4793_v11, %v7595_v57 }
0x240c   : > { %v4795_v12 = vsel %vm4661_vm6, %v7681_v21, -inf }
0x240d   : > { %v4796_v44 = vrot.slane %v4795_v12, 4 }
0x240f   : > { %v4797_v14 = vmax.f32 %v4795_v12, %v4796_v44 }
0x2411   : > { %v4798_v16 = vrot.slane %v4797_v14, 2 }
0x2413   : > { %v4799_v17 = vmax.f32 %v4797_v14, %v4798_v16 }
0x2415   : > { %v4800_v18 = vrot.slane %v4799_v17, 1 }
0x2417   : > { %v7685_v19 = vmax.f32 %v4799_v17, %v4800_v18 }
0x2419   : > { %vm4802_vm1 = vcmp.ge.f32.partialorder %v7681_v21, %v7685_v19  ;;  %v4814_v22 = vadd.f32 %v7685_v19, %v7607_v10 }
0x241b   : > { %v4818_v24 = vrot.slane %v4814_v22, %v4817_v20 }
0x241d   : > { %v4819_v25 = vmul.f32 %v7618_v55, %v4818_v24 }
0x241f   : > { %v4820_v27 = vsel %vm4661_vm6, %v4819_v25, 0.0 }
0x2420   : > { %4821 = vadd.xlane.f32.xlu1 %v4820_v27 }
0x24ad   : > { %v4822_v29 = vpop.xlane.xlu1 %4821 }
0x24ae   : > { %v7695_v30 = vadd.f32 %v4822_v29, %v7595_v57 }
0x24b0   : > { %v4824_v33 = vsel %vm4661_vm6, %v7695_v30, -inf }
0x24b1   : > { %v4825_v35 = vrot.slane %v4824_v33, 4 }
0x24b3   : > { %v4826_v36 = vmax.f32 %v4824_v33, %v4825_v35 }
0x24b5   : > { %v4827_v13 = vrot.slane %v4826_v36, 2 }
0x24b7   : > { %v4828_v38 = vmax.f32 %v4826_v36, %v4827_v13 }
0x24b9   : > { %v4829_v39 = vrot.slane %v4828_v38, 1 }
0x24bb   : > { %v7699_v40 = vmax.f32 %v4828_v38, %v4829_v39 }
0x24bd   : > { %vm4831_vm2 = vcmp.ge.f32.partialorder %v7695_v30, %v7699_v40  ;;  %v4843_v41 = vadd.f32 %v7699_v40, %v7607_v10 }
0x24bf   : > { %v4847_v42 = vrot.slane %v4843_v41, %v4846_v63 }
0x24c1   : > { %v4848_v43 = vmul.f32 %v7618_v55, %v4847_v42 }
0x24c3   : > { %v4849_v45 = vsel %vm4661_vm6, %v4848_v43, 0.0 }
0x24c4   : > { %4850 = vadd.xlane.f32.xlu0 %v4849_v45 }
0x2551   : > { %v4851_v48 = vpop.xlane.xlu0 %4850 }
0x2552   : > { %v4852_v49 = vadd.f32 %v4851_v48, %v7595_v57 }
0x2554   : > { %v4853_v52 = vsel %vm4661_vm6, %v4852_v49, -inf }
0x2555   : > { %v4854_v53 = vrot.slane %v4853_v52, 4 }
0x2557   : > { %v4855_v51 = vmax.f32 %v4853_v52, %v4854_v53 }
0x2559   : > { %v4856_v54 = vrot.slane %v4855_v51, 2 }
0x255b   : > { %v4857_v31 = vmax.f32 %v4855_v51, %v4856_v54  ;;  %v4832_v54 = vsel %vm4831_vm2, %v7029_v15, 5 }
0x255d   : > { %v4858_v1 = vrot.slane %v4857_v31, 1 }
0x255f   : > { %v4859_v47 = vmax.f32 %v4857_v31, %v4858_v1  ;;  %v4833_v31 = vsel %vm4661_vm6, %v4832_v54, 2147483647 }
0x2560   : > { %v4834_v1 = vrot.slane %v4833_v31, 4 }
0x2561   : > { %vm4860_vm3 = vcmp.ge.f32.partialorder %v4852_v49, %v4859_v47  ;;  %v4872_v58 = vadd.f32 %v4859_v47, %v7607_v10  ;;  %v4653_v10 = vld [vmem:[%s7929_s18] sm:$0x1f] }
0x2562   : > { %v4861_v27 = vsel %vm4860_vm3, %v7029_v15, 5 }
0x2563   : > { %v4876_v34 = vrot.slane %v4872_v58, %v4875_v50 }
0x2565   : > { %v4877_v61 = vmul.f32 %v7618_v55, %v4876_v34 }
0x2567   : > { %v4878_v62 = vsel %vm4661_vm6, %v4877_v61, 0.0 }
0x2568   : > { %4879 = vadd.xlane.f32.xlu1 %v4878_v62 }
0x25f5   : > { %v4880_v57 = vpop.xlane.xlu1 %4879 }
0x25f6   : > { %v4881_v0 = vmul.f32 %v7618_v55, %v4880_v57 }
0x25f8   : > { %v4882_v37 = vsel %vm4661_vm6, %v4881_v0, 0.0 }
0x25f9   : > { %v4883_v26 = vrot.slane %v4882_v37, 4 }
0x25fb   : > { %v4884_v3 = vadd.f32 %v4883_v26, %v4882_v37 }
0x25fd   : > { %v4885_v7 = vrot.slane %v4884_v3, 2 }
0x25ff   : > { %v4886_v8 = vadd.f32 %v4885_v7, %v4884_v3 }
0x2601   : > { %v4887_v23 = vrot.slane %v4886_v8, 1 }
0x2603   : > { %v4888_v5 = vadd.f32 %v4887_v23, %v4886_v8 }
0x2605   : > { %v4889_v11 = vadd.f32 %v4888_v5, %v4653_v10  ;;  %v4803_v5 = vsel %vm4802_vm1, %v7029_v15, 5 }
0x2607   : > { %v4891_v12 = vsel %vm4890_vm4, %v4889_v11, -inf }
0x2608   : > { %4892 = vmax.xlane.f32.xlu0 %v4891_v12 }
0x2695   : > { %v4893_v55 = vpop.xlane.xlu0 %4892 }
0x2696   : > { %vm4894_vm9 = vcmp.ge.f32.partialorder %v4889_v11, %v4893_v55  ;;  %v5028_v44 = vrot.slane %v4893_v55, %v4788_v6  ;;  %v4862_v6 = vsel %vm4661_vm6, %v4861_v27, 2147483647  ;;  %v4804_v11 = vsel %vm4661_vm6, %v4803_v5, 2147483647 }
0x2697   : > { %v4895_v14 = vsel %vm4894_vm9, %v7022_v9, 5  ;;  %v4863_v29 = vrot.slane %v4862_v6, 4  ;;  %v4805_v12 = vrot.slane %v4804_v11, 4 }
0x2698   : > { %5031 = vst.msk [vmem:[%s770_s30] sm:$0xff] %vm5030_vm8, %v5028_v44  ;;  %v4896_v16 = vsel %vm4890_vm4, %v4895_v14, 2147483647  ;;  %vm4835_vm8 = vcmp.lt.s32.totalorder %v4833_v31, %v4834_v1  ;;  %s5033_s30 = scalar_lea.sflag [#allocation5], %s744_s8 }
0x2699   : > { %v4898_v17 = vshra.s32 %v4896_v16, 16  ;;  %v4897_v20 = vand.u32 65535, %v4896_v16  ;;  %vm4864_vm11 = vcmp.lt.s32.totalorder %v4862_v6, %v4863_v29  ;;  %v4836_v47 = vsel %vm4835_vm8, %v4833_v31, %v4834_v1 }
0x269a   : > { %v4865_v33 = vsel %vm4864_vm11, %v4862_v6, %v4863_v29  ;;  %v4837_v50 = vrot.slane %v4836_v47, 2  ;;  %vm4806_vm11 = vcmp.lt.s32.totalorder %v4804_v11, %v4805_v12 }
0x269b   : > { %v4900_v18 = vcvt.s32.f32 %v4898_v17  ;;  %v4899_v24 = vcvt.s32.f32 %v4897_v20  ;;  %v4866_v35 = vrot.slane %v4865_v33, 2  ;;  %v4807_v55 = vsel %vm4806_vm11, %v4804_v11, %v4805_v12 }
0x269c   : > { %vm4838_vm9 = vcmp.lt.s32.totalorder %v4836_v47, %v4837_v50  ;;  %v4808_v44 = vrot.slane %v4807_v55, 2  ;;  %v4716_v12 = vsel %vm4715_vm13, %v7029_v15, 5 }
0x269d   : > { %4901 = vmin.xlane.f32.xlu1 %v4900_v18  ;;  %vm4867_vm5 = vcmp.lt.s32.totalorder %v4865_v33, %v4866_v35  ;;  %v4839_v58 = vsel %vm4838_vm9, %v4836_v47, %v4837_v50  ;;  %v4745_v50 = vsel %vm4744_vm14, %v7029_v15, 5 }
0x269e   : > { %v4868_v36 = vsel %vm4867_vm5, %v4865_v33, %v4866_v35  ;;  %v4840_v62 = vrot.slane %v4839_v58, 1  ;;  %vm4809_vm5 = vcmp.lt.s32.totalorder %v4807_v55, %v4808_v44 }
0x269f   : > { %v4869_v38 = vrot.slane %v4868_v36, 1  ;;  %v4810_v14 = vsel %vm4809_vm5, %v4807_v55, %v4808_v44  ;;  %v4717_v55 = vsel %vm4661_vm6, %v4716_v12, 2147483647 }
0x26a0   : > { %v4718_v44 = vrot.slane %v4717_v55, 4 }
0x26a1   : > { %vm4870_vm7 = vcmp.lt.s32.totalorder %v4868_v36, %v4869_v38 }
0x26a2   : > { %v4871_v43 = vsel %vm4870_vm7, %v4868_v36, %v4869_v38  ;;  %v4774_v36 = vsel %vm4773_vm15, %v7029_v15, 5  ;;  %vm4719_vm5 = vcmp.lt.s32.totalorder %v4717_v55, %v4718_v44 }
0x272a   : > { %v4902_v22 = vpop.xlane.xlu1 %4901 }
0x272b   : > { %vm4903_vm10 = vcmp.eq.f32.partialorder %v4900_v18, %v4902_v22  ;;  %v4908_v13 = vcvt.f32.s32 %v4902_v22  ;;  %v4811_v18 = vrot.slane %v4810_v14, 1 }
0x272c   : > { %v4904_v25 = vsel %vm4903_vm10, %v4899_v24, inf  ;;  %vm4841_vm10 = vcmp.lt.s32.totalorder %v4839_v58, %v4840_v62 }
0x272d   : > { %4905 = vmin.xlane.f32.xlu0 %v4904_v25  ;;  %v4909_v63 = vshll.u32 %v4908_v13, 16  ;;  %v4842_v30 = vsel %vm4841_vm10, %v4839_v58, %v4840_v62  ;;  %vm4812_vm7 = vcmp.lt.s32.totalorder %v4810_v14, %v4811_v18  ;;  %v4775_v13 = vsel %vm4661_vm6, %v4774_v36, 2147483647 }
0x272e   : > { %v4813_v21 = vsel %vm4812_vm7, %v4810_v14, %v4811_v18  ;;  %v4776_v38 = vrot.slane %v4775_v13, 4  ;;  %v4746_v58 = vsel %vm4661_vm6, %v4745_v50, 2147483647  ;;  %v4720_v14 = vsel %vm4719_vm5, %v4717_v55, %v4718_v44 }
0x272f   : > { %v4687_v36 = vsel %vm4686_vm12, %v7029_v15, 5 }
0x27ba   : > { %v4906_v39 = vpop.xlane.xlu0 %4905 }
0x27bb   : > { %v4907_v41 = vcvt.f32.s32 %v4906_v39 }
0x27bd   : > { %v4910_v42 = vadd.s32 %v4909_v63, %v4907_v41 }
0x27bf   : > { %4912 = vst.msk [vmem:[%s7735_s3 + $0x3] sm:$0x10] %vm4911_vm0, %v4910_v42  ;;  %vm4913_vm3 = vcmp.eq.s32.totalorder %v7022_v9, %v4910_v42 }
0x27c0   : > { %v4914_v45 = vsel %vm4913_vm3, %v4871_v43, 0  ;;  %vm4777_vm3 = vcmp.lt.s32.totalorder %v4775_v13, %v4776_v38 }
0x27c1   : > { %v4915_v48 = vsel %vm4890_vm4, %v4914_v45, 0  ;;  %v4778_v39 = vsel %vm4777_vm3, %v4775_v13, %v4776_v38  ;;  %v4688_v13 = vsel %vm4661_vm6, %v4687_v36, 2147483647 }
0x27c2   : > { %v4917_v49 = vshrl.u32 %v4915_v48, 16  ;;  %v4916_v52 = vand.u32 65535, %v4915_v48  ;;  %v4779_v63 = vrot.slane %v4778_v39, 2  ;;  %v4689_v38 = vrot.slane %v4688_v13, 4 }
0x27c4   : > { %v4919_v53 = vcvt.s32.f32 %v4917_v49  ;;  %v4918_v51 = vcvt.s32.f32 %v4916_v52  ;;  %vm4780_vm8 = vcmp.lt.s32.totalorder %v4778_v39, %v4779_v63  ;;  %vm4690_vm3 = vcmp.lt.s32.totalorder %v4688_v13, %v4689_v38 }
0x27c5   : > { %v4781_v41 = vsel %vm4780_vm8, %v4778_v39, %v4779_v63  ;;  %v4691_v39 = vsel %vm4690_vm3, %v4688_v13, %v4689_v38 }
0x27c6   : > { %4922 = vadd.xlane.f32.xlu1 %v4919_v53  ;;  %4920 = vadd.xlane.f32.xlu0 %v4918_v51  ;;  %v4782_v45 = vrot.slane %v4781_v41, 1  ;;  %v4692_v63 = vrot.slane %v4691_v39, 2 }
0x27c8   : > { %vm4783_vm9 = vcmp.lt.s32.totalorder %v4781_v41, %v4782_v45  ;;  %vm4693_vm8 = vcmp.lt.s32.totalorder %v4691_v39, %v4692_v63 }
0x27c9   : > { %v4784_v59 = vsel %vm4783_vm9, %v4781_v41, %v4782_v45  ;;  %v4694_v41 = vsel %vm4693_vm8, %v4691_v39, %v4692_v63 }
0x27ca   : > { %v4695_v45 = vrot.slane %v4694_v41, 1 }
0x27cc   : > { %vm4696_vm9 = vcmp.lt.s32.totalorder %v4694_v41, %v4695_v45 }
0x27cd   : > { %v4697_v15 = vsel %vm4696_vm9, %v4694_v41, %v4695_v45 }
0x2853   : > { %v4923_v34 = vpop.xlane.xlu1 %4922  ;;  %v4921_v61 = vpop.xlane.xlu0 %4920 }
0x2854   : > { %v4925_v57 = vcvt.f32.s32 %v4923_v34  ;;  %v4924_v37 = vcvt.f32.s32 %v4921_v61  ;;  %v4747_v34 = vrot.slane %v4746_v58, 4 }
0x2856   : > { %v4926_v0 = vshll.u32 %v4925_v57, 16  ;;  %vm4748_vm10 = vcmp.lt.s32.totalorder %v4746_v58, %v4747_v34 }
0x2857   : > { %v4749_v61 = vsel %vm4748_vm10, %v4746_v58, %v4747_v34 }
0x2858   : > { %v4927_v26 = vadd.s32 %v4926_v0, %v4924_v37  ;;  %v4750_v62 = vrot.slane %v4749_v61, 2 }
0x285a   : > { %4928 = vst.msk [vmem:[%s7735_s3 + $0x2] sm:$0x10] %vm4911_vm0, %v4927_v26  ;;  %vm4929_vm2 = vcmp.eq.s32.totalorder %v7022_v9, %v4927_v26 }
0x285b   : > { %v4930_v40 = vsel %vm4929_vm2, %v4842_v30, 0  ;;  %vm4751_vm2 = vcmp.lt.s32.totalorder %v4749_v61, %v4750_v62 }
0x285c   : > { %v4931_v3 = vsel %vm4890_vm4, %v4930_v40, 0  ;;  %v4752_v57 = vsel %vm4751_vm2, %v4749_v61, %v4750_v62 }
0x285d   : > { %v4933_v7 = vshrl.u32 %v4931_v3, 16  ;;  %v4932_v8 = vand.u32 65535, %v4931_v3  ;;  %v4753_v26 = vrot.slane %v4752_v57, 1 }
0x285f   : > { %v4935_v23 = vcvt.s32.f32 %v4933_v7  ;;  %v4934_v10 = vcvt.s32.f32 %v4932_v8  ;;  %vm4754_vm11 = vcmp.lt.s32.totalorder %v4752_v57, %v4753_v26 }
0x2860   : > { %v4755_v46 = vsel %vm4754_vm11, %v4752_v57, %v4753_v26 }
0x2861   : > { %4938 = vadd.xlane.f32.xlu1 %v4935_v23  ;;  %4936 = vadd.xlane.f32.xlu0 %v4934_v10 }
0x28ee   : > { %v4939_v16 = vpop.xlane.xlu1 %4938  ;;  %v4937_v17 = vpop.xlane.xlu0 %4936 }
0x28ef   : > { %v4941_v20 = vcvt.f32.s32 %v4939_v16  ;;  %v4940_v24 = vcvt.f32.s32 %v4937_v17  ;;  %v4721_v16 = vrot.slane %v4720_v14, 2 }
0x28f1   : > { %v4942_v22 = vshll.u32 %v4941_v20, 16  ;;  %vm4722_vm7 = vcmp.lt.s32.totalorder %v4720_v14, %v4721_v16 }
0x28f2   : > { %v4723_v17 = vsel %vm4722_vm7, %v4720_v14, %v4721_v16 }
0x28f3   : > { %v4943_v25 = vadd.s32 %v4942_v22, %v4940_v24  ;;  %v4724_v22 = vrot.slane %v4723_v17, 1 }
0x28f5   : > { %4944 = vst.msk [vmem:[%s7735_s3 + $0x1] sm:$0x10] %vm4911_vm0, %v4943_v25  ;;  %vm4945_vm1 = vcmp.eq.s32.totalorder %v7022_v9, %v4943_v25 }
0x28f6   : > { %v4946_v19 = vsel %vm4945_vm1, %v4813_v21, 0  ;;  %vm4725_vm1 = vcmp.lt.s32.totalorder %v4723_v17, %v4724_v22 }
0x28f7   : > { %v4947_v27 = vsel %vm4890_vm4, %v4946_v19, 0  ;;  %v4726_v32 = vsel %vm4725_vm1, %v4723_v17, %v4724_v22 }
0x28f8   : > { %v4949_v6 = vshrl.u32 %v4947_v27, 16  ;;  %v4948_v29 = vand.u32 65535, %v4947_v27 }
0x28fa   : > { %v4951_v33 = vcvt.s32.f32 %v4949_v6  ;;  %v4950_v35 = vcvt.s32.f32 %v4948_v29 }
0x28fc   : > { %4954 = vadd.xlane.f32.xlu1 %v4951_v33  ;;  %4952 = vadd.xlane.f32.xlu0 %v4950_v35 }
0x2989   : > { %v4955_v42 = vpop.xlane.xlu1 %4954  ;;  %v4953_v43 = vpop.xlane.xlu0 %4952 }
0x298a   : > { %v4957_v48 = vcvt.f32.s32 %v4955_v42  ;;  %v4956_v52 = vcvt.f32.s32 %v4953_v43 }
0x298c   : > { %v4958_v49 = vshll.u32 %v4957_v48, 16 }
0x298e   : > { %v4959_v53 = vadd.s32 %v4958_v49, %v4956_v52 }
0x2990   : > { %4960 = vst.msk [vmem:[%s7735_s3] sm:$0x10] %vm4911_vm0, %v4959_v53  ;;  %vm4961_vm15 = vcmp.eq.s32.totalorder %v7022_v9, %v4959_v53 }
0x2991   : > { %v4962_v4 = vsel %vm4961_vm15, %v4784_v59, 0 }
0x2992   : > { %v4963_v51 = vsel %vm4890_vm4, %v4962_v4, 0 }
0x2993   : > { %v4965_v54 = vshrl.u32 %v4963_v51, 16  ;;  %v4964_v31 = vand.u32 65535, %v4963_v51 }
0x2995   : > { %v4967_v1 = vcvt.s32.f32 %v4965_v54  ;;  %v4966_v47 = vcvt.s32.f32 %v4964_v31 }
0x2997   : > { %4970 = vadd.xlane.f32.xlu1 %v4967_v1  ;;  %4968 = vadd.xlane.f32.xlu0 %v4966_v47 }
0x2a24   : > { %v4971_v0 = vpop.xlane.xlu1 %4970  ;;  %v4969_v37 = vpop.xlane.xlu0 %4968 }
0x2a25   : > { %v4973_v30 = vcvt.f32.s32 %v4971_v0  ;;  %v4972_v3 = vcvt.f32.s32 %v4969_v37 }
0x2a27   : > { %v4974_v40 = vshll.u32 %v4973_v30, 16 }
0x2a29   : > { %v4975_v7 = vadd.s32 %v4974_v40, %v4972_v3 }
0x2a2b   : > { %4976 = vst.msk [vmem:[%s7735_s3 - $0x1] sm:$0x10] %vm4911_vm0, %v4975_v7  ;;  %vm4977_vm14 = vcmp.eq.s32.totalorder %v7022_v9, %v4975_v7 }
0x2a2c   : > { %v4978_v56 = vsel %vm4977_vm14, %v4755_v46, 0 }
0x2a2d   : > { %v4979_v8 = vsel %vm4890_vm4, %v4978_v56, 0 }
0x2a2e   : > { %v4981_v23 = vshrl.u32 %v4979_v8, 16  ;;  %v4980_v10 = vand.u32 65535, %v4979_v8 }
0x2a30   : > { %v4983_v5 = vcvt.s32.f32 %v4981_v23  ;;  %v4982_v11 = vcvt.s32.f32 %v4980_v10 }
0x2a32   : > { %4986 = vadd.xlane.f32.xlu1 %v4983_v5  ;;  %4984 = vadd.xlane.f32.xlu0 %v4982_v11 }
0x2abf   : > { %v4987_v18 = vpop.xlane.xlu1 %4986  ;;  %v4985_v20 = vpop.xlane.xlu0 %4984 }
0x2ac0   : > { %v4989_v24 = vcvt.f32.s32 %v4987_v18  ;;  %v4988_v21 = vcvt.f32.s32 %v4985_v20 }
0x2ac2   : > { %v4990_v25 = vshll.u32 %v4989_v24, 16 }
0x2ac4   : > { %v4991_v19 = vadd.s32 %v4990_v25, %v4988_v21 }
0x2ac6   : > { %4992 = vst.msk [vmem:[%s7735_s3 - $0x2] sm:$0x10] %vm4911_vm0, %v4991_v19  ;;  %vm4993_vm13 = vcmp.eq.s32.totalorder %v7022_v9, %v4991_v19 }
0x2ac7   : > { %v4994_v60 = vsel %vm4993_vm13, %v4726_v32, 0 }
0x2ac8   : > { %v4995_v27 = vsel %vm4890_vm4, %v4994_v60, 0 }
0x2ac9   : > { %v4997_v6 = vshrl.u32 %v4995_v27, 16  ;;  %v4996_v29 = vand.u32 65535, %v4995_v27 }
0x2acb   : > { %v4999_v33 = vcvt.s32.f32 %v4997_v6  ;;  %v4998_v35 = vcvt.s32.f32 %v4996_v29 }
0x2acd   : > { %5002 = vadd.xlane.f32.xlu1 %v4999_v33  ;;  %5000 = vadd.xlane.f32.xlu0 %v4998_v35 }
0x2b5a   : > { %v5003_v42 = vpop.xlane.xlu1 %5002  ;;  %v5001_v43 = vpop.xlane.xlu0 %5000 }
0x2b5b   : > { %v5005_v48 = vcvt.f32.s32 %v5003_v42  ;;  %v5004_v52 = vcvt.f32.s32 %v5001_v43 }
0x2b5d   : > { %v5006_v49 = vshll.u32 %v5005_v48, 16 }
0x2b5f   : > { %v5007_v28 = vadd.s32 %v5006_v49, %v5004_v52 }
0x2b61   : > { %5008 = vst.msk [vmem:[%s7735_s3 - $0x3] sm:$0x10] %vm4911_vm0, %v5007_v28  ;;  %vm5009_vm6 = vcmp.eq.s32.totalorder %v7022_v9, %v5007_v28 }
0x2b62   : > { %v5010_v2 = vsel %vm5009_vm6, %v4697_v15, 0 }
0x2b63   : > { %v5011_v53 = vsel %vm4890_vm4, %v5010_v2, 0 }
0x2b64   : > { %v5013_v59 = vshrl.u32 %v5011_v53, 16  ;;  %v5012_v4 = vand.u32 65535, %v5011_v53 }
0x2b66   : > { %v5015_v51 = vcvt.s32.f32 %v5013_v59  ;;  %v5014_v54 = vcvt.s32.f32 %v5012_v4 }
0x2b68   : > { %5018 = vadd.xlane.f32.xlu1 %v5015_v51  ;;  %5016 = vadd.xlane.f32.xlu0 %v5014_v54 }
0x2b69   : > { %6603 = shalt.err (!%p6600_p0)
}
0x2b6a   : > { %s6604_s4 = scalar_lea.hbm %s7801_s23, 128  ;;  %s6608_s16 = scalar_lea.hbm %s7933_s0, 256 }
0x2b6b   : > { %p6605_p10 = scmp.ne.s32.totalorder %s7801_s23, %s6604_s4  ;;  %p6609_p4 = scmp.lt.u32.totalorder %s7801_s23, %s7933_s0 }
0x2b6c   : > { %p6610_p12 = scmp.lt.u32.totalorder %s6608_s16, %s6604_s4  ;;  %p6612_p8 = scmp.lt.u32.totalorder %s6604_s4, %s7801_s23 }
0x2b6d   : > { %p6606_p2 = pnand %p6605_p10, %p7934_p11 }
0x2b6e   : > { %p6611_p7 = por %p6610_p12, %p6609_p4 }
0x2b6f   : > { %p6607_p3 = pneg %p6606_p2 }
0x2b70   : > { %p6613_p13 = por %p6612_p8, %p6611_p7 }
0x2b72   : > { %p6614_p1 = pnand %p6613_p13, %p6607_p3 }
0x2b74   : > { %6617 = shalt.err (!%p6614_p1)
}
0x2b75   : > { %6237 = dma.vmem_to_hbm [thread:$0]  (%p7934_p11), %s5055_s29, 128, %s7801_s23, %s5033_s30  }
0x2bf5   : > { %v5019_v9 = vpop.xlane.xlu1 %5018  ;;  %v5017_v31 = vpop.xlane.xlu0 %5016 }
0x2bf6   : > { %v5021_v1 = vcvt.f32.s32 %v5019_v9  ;;  %v5020_v50 = vcvt.f32.s32 %v5017_v31 }
0x2bf8   : > { %v5022_v47 = vshll.u32 %v5021_v1, 16 }
0x2bfa   : > { %v5023_v58 = vadd.s32 %v5022_v47, %v5020_v50 }
0x2bfc   : > { %5024 = vst.msk [vmem:[%s7735_s3 - $0x4] sm:$0x10] %vm4911_vm0, %v5023_v58 }
0x2bfd PF: > { %s7935_s6 = sld [smem:[#allocation19_spill]]  ;;  %s7936_s21 = sld [smem:[#allocation17_spill]] }
0x2bfe   : > { %s7937_s1 = sld [smem:[#allocation23_spill]] }
0x2c03   : > { %p6269_p6 = scmp.ge.s32.totalorder %s7935_s6, 2  ;;  %s5072_s2 = sand.u32 1, %s7936_s21  }
0x2c04   : > { %p7938_p9 = scmp.ne.s32.totalorder %s7937_s1, 0  ;;  %s5073_s26 = scalar_lea.sflag [#allocation5], %s5072_s2 }
0x2c06   : > { %p6256_p5 = pnand %p6269_p6, %p7938_p9 }
0x2c08   : > { %6647 = dma.done.wait (!%p6256_p5), %s5073_s26, 128  }
0x2c09   : > { %6649 = vsyncadd (!%p6256_p5), %s5073_s26, 4294967168  ;;  %s7939_s30 = sld [smem:[#allocation20_spill]]  ;;  %s7940_s29 = sld [smem:[#allocation18_spill]] }
0x2c0a   : > { %s7941_s23 = sld [smem:[#allocation21_spill]]  ;;  %s7942_s3 = smov %s6656_s28 }
0x2c0f   : > { %p36_p11 = scmp.ge.s32.totalorder %s7939_s30, 4   ;;  %s7943_s28 = smov %s7940_s29 }
0x2c10   : > { %s7944_s29 = smov %s7941_s23 }
0x2c11   :  { %38 = sbr.rel (!%p36_p11) target bundleno = 21 (0x15), region = 180 }
0x2c18   :  { %5092 = vsyncpa [#allocation4], 1 }
0x2c19   :  { %5094 = vsyncpa [#allocation4 + $0x1], 1 }
0x2c1a   :  { %5095 = vsyncpa [#allocation7], 1 }
0x2c1b   :  { %5096 = vsyncpa [#allocation10], 1 }
0x2c1c   :  { %5097 = vsyncpa [#allocation5], 1 }
0x2c1d   :  { %5099 = vsyncpa [#allocation5 + $0x1], 1 }

</bundles_post_ra>
